<compile_context>
chip_gen: v7x
topology: tpu7x:2x2x1
jax: 0.10.0
libtpu: 0.0.40
codegen_flags: <defaults>
</compile_context>

<pallas_src>
import numpy as np
import jax
import jax.numpy as jnp
from jax.experimental import pallas as pl
from jax.experimental.pallas import tpu as pltpu

# db4 reconstruction lowpass (scaling) filter -- same coefficients as pywt.Wavelet('db4').rec_lo
_DB4_REC_LO = np.array([
    0.23037781330885523, 0.71484657055254153, 0.63088076792959036,
    -0.027983769416983849, -0.18703481171888114, 0.030841381835986965,
    0.032883011666982945, -0.010597401784997278], dtype=np.float64)

# Soft-thresholding with this lambda value exactly zeroes a quadrant (|coef| << 1e30);
# the structurally-discarded LL quadrants of levels 1/2 are handled this way and the
# reconstructed LL band is added back in (it lands exactly on the zeroed positions).
_BIG = 1e30


# ------------------------------ host-side constants --------------------------------

def _build_dwt_matrix(N):
    """Orthonormal periodized single-level 1-D db4 analysis matrix (N x N), float64."""
    lo = _DB4_REC_LO[::-1]                      # analysis lowpass (dec_lo)
    L = lo.shape[0]
    hi = ((-1.0) ** np.arange(L)) * lo[::-1]    # QMF highpass
    A = np.zeros((N, N), dtype=np.float64)
    half = N // 2
    for k in range(half):
        for m in range(L):
            col = (2 * k + m) % N
            A[k, col] += lo[m]
            A[half + k, col] += hi[m]
    return A


def _embed_blockdiag(A, N, offsets):
    """Place A on the diagonal at the given (row==col) offsets of an NxN zero matrix."""
    n = A.shape[0]
    M = np.zeros((N, N), dtype=np.float64)
    for off in offsets:
        M[off:off + n, off:off + n] = A
    return M


def _packed_operators():
    """(6,128,128) f32 slab: [Q1, Q1^T, P2, P2^T, P3, P3^T].

    Planes are packed 2x2 into a 128x128 tile (plane (r,q) occupies [64r:64r+64, 64q:64q+64]).
      Q1 = blockdiag(A64, A64)      -> level-1 transform of all 4 planes at once.
      P2 = A32 embedded at rows/cols {0:32, 64:96}   -> level-2 of each plane's LL1 quadrant.
      P3 = A16 embedded at rows/cols {0:16, 64:80}   -> level-3 of each plane's LL2 quadrant.
    P2/P3 results (and their transposed inverses) land exactly at the packed LL positions,
    with exact zeros elsewhere.
    """
    A64 = _build_dwt_matrix(64)
    A32 = _build_dwt_matrix(32)
    A16 = _build_dwt_matrix(16)
    Q1 = _embed_blockdiag(A64, 128, (0, 64))
    P2 = _embed_blockdiag(A32, 128, (0, 64))
    P3 = _embed_blockdiag(A16, 128, (0, 64))
    ops = np.stack([Q1, Q1.T, P2, P2.T, P3, P3.T]).astype(np.float32)
    return jnp.asarray(ops)


def _plane_lambda_maps(lamda0, lamda1, lamda2, lamda3):
    """Per-plane coefficient lambda maps (64x64, 32x32, 16x16); quadrant layout
       [ LL | band0 ] / [ band1 | band2 ]; LL of levels 1/2 holds _BIG."""
    l0 = jnp.asarray(lamda0, jnp.float32).reshape(8, 8)
    l1 = jnp.asarray(lamda1, jnp.float32).reshape(3, 32, 32)
    l2 = jnp.asarray(lamda2, jnp.float32).reshape(3, 16, 16)
    l3 = jnp.asarray(lamda3, jnp.float32).reshape(3, 8, 8)

    def quad(ll, bands):
        top = jnp.concatenate([ll, bands[0]], axis=1)
        bot = jnp.concatenate([bands[1], bands[2]], axis=1)
        return jnp.concatenate([top, bot], axis=0)

    lam1 = quad(jnp.full((32, 32), _BIG, jnp.float32), l1)   # 64x64
    lam2 = quad(jnp.full((16, 16), _BIG, jnp.float32), l2)   # 32x32
    lam3 = quad(l0, l3)                                      # 16x16
    return lam1, lam2, lam3


def _packed_lambda_maps(lam1, lam2, lam3):
    """(3,128,128) lambda maps in the packed 2x2 plane layout.  Positions that are
       structurally zero in the embedded coefficient arrays may hold anything (_BIG)."""
    def embed(m):
        n = m.shape[0]
        blk = jnp.full((64, 64), _BIG, jnp.float32).at[:n, :n].set(m)
        return jnp.tile(blk, (2, 2))
    return jnp.stack([jnp.tile(lam1, (2, 2)), embed(lam2), embed(lam3)])


def _choose_superblock(G, cap=8):
    """Supertiles (4 planes each) per grid step: largest divisor of G <= cap (32 planes),
    preferring >=2 grid steps so both v7x TensorCores get a 'parallel' share; the extra
    ~0.35us/step on single-TC chips is negligible vs. 12 x 128^3 matmuls per supertile."""
    divisors = [d for d in range(1, min(cap, G) + 1) if G % d == 0]
    preferred = [d for d in divisors if G // d >= 2]
    return max(preferred) if preferred else max(divisors)


# ------------------------------ fused kernel --------------------------------

def _split_bf16(a):
    hi = a.astype(jnp.bfloat16)
    lo = (a - hi.astype(jnp.float32)).astype(jnp.bfloat16)
    return hi, lo


def _mm3(a, b):
    """~f32-accurate matmul as 3 single-pass bf16 MXU matmuls (BF16_BF16_F32_X3-style).

    Half the MXU passes of Precision.HIGHEST; the hi/lo splits are a handful of VPU ops
    in an otherwise idle VALU slot.  Zero operand rows/cols stay exactly zero.
    """
    ah, al = _split_bf16(a)
    bh, bl = _split_bf16(b)
    d = lambda u, v: jnp.dot(u, v, preferred_element_type=jnp.float32)
    return d(ah, bh) + d(ah, bl) + d(al, bh)


def _prox_fused_kernel(x_ref, c_ref, o_ref):
    # c_ref slab layout: 0:Q1  1:Q1^T  2:P2  3:P2^T  4:P3  5:P3^T  6:LAM1  7:LAM2  8:LAM3
    def soft(c, lam):
        # relu(c - lam) - relu(-c - lam), exactly as in the PyTorch module (f32 throughout)
        return jnp.maximum(c - lam, 0.0) - jnp.maximum(-c - lam, 0.0)

    def body(s, carry):
        x = x_ref[s]                                        # (128,128) = 4 packed planes
        # ---- forward DWT, 3 levels (all 128x128x128 matmuls) ----
        c1 = _mm3(_mm3(c_ref[0], x), c_ref[1])              # level 1, all 4 planes
        c2 = _mm3(_mm3(c_ref[2], c1), c_ref[3])             # level 2 (embedded at LL1 positions)
        c3 = _mm3(_mm3(c_ref[4], c2), c_ref[5])             # level 3 (embedded at LL2 positions)
        # ---- soft-threshold (LL quadrants of LAM1/LAM2 hold _BIG -> become exactly 0) ----
        c1 = soft(c1, c_ref[6])
        c2 = soft(c2, c_ref[7])
        c3 = soft(c3, c_ref[8])
        # ---- inverse DWT; reconstructed LL bands are nonzero only at the zeroed
        #      quadrants, so re-insertion is a plain add (no slicing / masking) ----
        c2 = c2 + _mm3(_mm3(c_ref[5], c3), c_ref[4])        # LL2 back into level-2 coeffs
        c1 = c1 + _mm3(_mm3(c_ref[3], c2), c_ref[2])        # LL1 back into level-1 coeffs
        o_ref[s] = _mm3(_mm3(c_ref[1], c1), c_ref[0])       # level-1 inverse -> image planes
        return carry

    jax.lax.fori_loop(0, x_ref.shape[0], body, 0)


# ------------------------------ forward pass --------------------------------

def proxlayer_forward(x, y, lamda0, lamda1, lamda2, lamda3):
    """Equivalent of proxlayer.forward(x, y).  `y` is accepted but unused (as in PyTorch)."""
    del y
    B, C, H, W = x.shape
    assert H == 64 and W == 64, "lamda shapes imply a 64x64 input with 3 DWT levels"
    M = B * C
    xb = x.reshape(M, H, W).astype(jnp.float32)

    # Pack 4 planes -> one lane-dense 128x128 supertile (2x2 spatial arrangement).
    pad = (-M) % 4
    if pad:
        xb = jnp.concatenate([xb, jnp.zeros((pad, H, W), jnp.float32)], axis=0)
    Mp = M + pad
    G = Mp // 4
    xp = xb.reshape(G, 2, 2, 64, 64).transpose(0, 1, 3, 2, 4).reshape(G, 128, 128)

    ops = _packed_operators()                                          # (6,128,128) f32
    lam1, lam2, lam3 = _plane_lambda_maps(lamda0, lamda1, lamda2, lamda3)
    lams = _packed_lambda_maps(lam1, lam2, lam3)                       # (3,128,128) f32
    consts = jnp.concatenate([ops, lams], axis=0)                      # (9,128,128) f32

    gblk = _choose_superblock(G)
    grid = (G // gblk,)

    out = pl.pallas_call(
        _prox_fused_kernel,
        out_shape=jax.ShapeDtypeStruct((G, 128, 128), jnp.float32),
        grid_spec=pltpu.PrefetchScalarGridSpec(
            num_scalar_prefetch=0,
            grid=grid,
            in_specs=[pl.BlockSpec((gblk, 128, 128), lambda i: (i, 0, 0)),
                      # constant index_map -> single resident DMA for all constants
                      pl.BlockSpec((9, 128, 128), lambda i: (0, 0, 0))],
            out_specs=pl.BlockSpec((gblk, 128, 128), lambda i: (i, 0, 0))),
        compiler_params=pltpu.CompilerParams(dimension_semantics=("parallel",)),
    )(xp, consts)

    ob = out.reshape(G, 2, 64, 2, 64).transpose(0, 1, 3, 2, 4).reshape(Mp, 64, 64)
    return ob[:M].reshape(B, C, H, W)


# ------------------------- pure-JAX reference (testing) ----------------------

def _reference_forward(x, lamda0, lamda1, lamda2, lamda3):
    """Plain-XLA reference (per-plane split/merge formulation, HIGHEST precision)."""
    hp = jax.lax.Precision.HIGHEST
    mm = lambda a, b: jnp.matmul(a, b, precision=hp)
    soft = lambda c, l: jnp.maximum(c - l, 0.0) - jnp.maximum(-c - l, 0.0)
    B, C, H, W = x.shape
    xb = x.reshape(B * C, H, W).astype(jnp.float32)
    A64 = jnp.asarray(_build_dwt_matrix(64), jnp.float32)
    A32 = jnp.asarray(_build_dwt_matrix(32), jnp.float32)
    A16 = jnp.asarray(_build_dwt_matrix(16), jnp.float32)
    lam1, lam2, lam3 = _plane_lambda_maps(lamda0, lamda1, lamda2, lamda3)
    c1 = mm(mm(A64, xb), A64.T)
    c2 = mm(mm(A32, c1[:, :32, :32]), A32.T)
    c3 = mm(mm(A16, c2[:, :16, :16]), A16.T)
    c1t, c2t, c3t = soft(c1, lam1), soft(c2, lam2), soft(c3, lam3)
    ll2 = mm(mm(A16.T, c3t), A16)
    c2m = c2t.at[:, :16, :16].set(ll2)
    ll1 = mm(mm(A32.T, c2m), A32)
    c1m = c1t.at[:, :32, :32].set(ll1)
    out = mm(mm(A64.T, c1m), A64)
    return out.reshape(B, C, H, W)


# --------------------------------- main --------------------------------------

if __name__ == "__main__":
    key = jax.random.PRNGKey(0)
    B, C, H, W = 2, 2, 64, 64
    kx, ky = jax.random.split(key)
    x = jax.random.normal(kx, (B, C, H, W), dtype=jnp.float32)
    y = jax.random.normal(ky, (B, C, H, W), dtype=jnp.float32)   # unused, as in the module

    # deterministic parameter init (prox_in[i] * ones, matching __init__ shapes)
    prox_in = [0.10, 0.05, 0.03, 0.02]
    lamda0 = prox_in[0] * jnp.ones((1, 1, 8, 8), jnp.float32)
    lamda1 = prox_in[1] * jnp.ones((1, 1, 3, 32, 32), jnp.float32)
    lamda2 = prox_in[2] * jnp.ones((1, 1, 3, 16, 16), jnp.float32)
    lamda3 = prox_in[3] * jnp.ones((1, 1, 3, 8, 8), jnp.float32)

    fwd = jax.jit(proxlayer_forward)
    out = fwd(x, y, lamda0, lamda1, lamda2, lamda3)
    jax.block_until_ready(out)
    assert out.shape == x.shape and out.dtype == jnp.float32

    # cross-check the fused packed kernel against an independent plain-XLA reference
    # (tolerance covers the 3-pass bf16 matmul emulation, typically ~1e-4)
    ref = _reference_forward(x, lamda0, lamda1, lamda2, lamda3)
    err_ref = float(jnp.max(jnp.abs(out - ref)))
    assert err_ref < 2e-3, f"mismatch vs XLA reference: {err_ref}"

    # sanity: with zero thresholds the layer is a perfect-reconstruction identity
    z = lambda a: jnp.zeros_like(a)
    out_id = fwd(x, y, z(lamda0), z(lamda1), z(lamda2), z(lamda3))
    err_id = float(jnp.max(jnp.abs(out_id - x)))
    assert err_id < 2e-3, f"perfect-reconstruction error too large: {err_id}"

    print("KERNEL_OK")
</pallas_src>

<mosaic_0001>
module attributes {stable_mosaic.version = 11 : i64} {
  func.func @_prox_fused_kernel(%arg0: i32, %arg1: memref<1x128x128xf32, #tpu.memory_space<vmem>>, %arg2: memref<9x128x128xf32, #tpu.memory_space<vmem>>, %arg3: memref<1x128x128xf32, #tpu.memory_space<vmem>>) attributes {dimension_semantics = [#tpu.dimension_semantics<parallel>], iteration_bounds = array<i64: 1>, scalar_prefetch = 0 : i64, scratch_operands = 0 : i64, tpu.core_type = #tpu.core_type<tc>, window_params = [{transform_indices = @transform_0, window_bounds = array<i64: 1, 128, 128>}, {pipeline_mode = #tpu.pipeline_mode<synchronous>, transform_indices = @transform_1, window_bounds = array<i64: 9, 128, 128>}, {transform_indices = @transform_2, window_bounds = array<i64: 1, 128, 128>}]} {
    %c0_i32 = arith.constant 0 : i32
    %0 = arith.index_cast %c0_i32 : i32 to index
    %c0 = arith.constant 0 : index
    %c0_0 = arith.constant 0 : index
    %1 = vector.load %arg1[%0, %c0, %c0_0] : memref<1x128x128xf32, #tpu.memory_space<vmem>>, vector<1x128x128xf32>
    %2 = vector.shape_cast %1 : vector<1x128x128xf32> to vector<128x128xf32>
    %c0_1 = arith.constant 0 : index
    %c0_2 = arith.constant 0 : index
    %c0_3 = arith.constant 0 : index
    %3 = vector.load %arg2[%c0_1, %c0_2, %c0_3] : memref<9x128x128xf32, #tpu.memory_space<vmem>>, vector<1x128x128xf32>
    %4 = vector.shape_cast %3 : vector<1x128x128xf32> to vector<128x128xf32>
    %5 = arith.truncf %4 : vector<128x128xf32> to vector<128x128xbf16>
    %6 = arith.extf %5 : vector<128x128xbf16> to vector<128x128xf32>
    %7 = arith.subf %4, %6 : vector<128x128xf32>
    %8 = arith.truncf %7 : vector<128x128xf32> to vector<128x128xbf16>
    %9 = arith.truncf %2 : vector<128x128xf32> to vector<128x128xbf16>
    %10 = arith.extf %9 : vector<128x128xbf16> to vector<128x128xf32>
    %11 = arith.subf %2, %10 : vector<128x128xf32>
    %12 = arith.truncf %11 : vector<128x128xf32> to vector<128x128xbf16>
    %cst = arith.constant dense<0.000000e+00> : vector<128x128xf32>
    %13 = tpu.matmul %5, %9, %cst {dimension_numbers = #tpu.dot_dimension_numbers<[1], [0], [0], [1], [0, 0, 1, 1], [], []>} : vector<128x128xbf16>, vector<128x128xbf16>, vector<128x128xf32> -> vector<128x128xf32>
    %cst_4 = arith.constant dense<0.000000e+00> : vector<128x128xf32>
    %14 = tpu.matmul %5, %12, %cst_4 {dimension_numbers = #tpu.dot_dimension_numbers<[1], [0], [0], [1], [0, 0, 1, 1], [], []>} : vector<128x128xbf16>, vector<128x128xbf16>, vector<128x128xf32> -> vector<128x128xf32>
    %15 = arith.addf %13, %14 : vector<128x128xf32>
    %cst_5 = arith.constant dense<0.000000e+00> : vector<128x128xf32>
    %16 = tpu.matmul %8, %9, %cst_5 {dimension_numbers = #tpu.dot_dimension_numbers<[1], [0], [0], [1], [0, 0, 1, 1], [], []>} : vector<128x128xbf16>, vector<128x128xbf16>, vector<128x128xf32> -> vector<128x128xf32>
    %17 = arith.addf %15, %16 : vector<128x128xf32>
    %c1 = arith.constant 1 : index
    %c0_6 = arith.constant 0 : index
    %c0_7 = arith.constant 0 : index
    %18 = vector.load %arg2[%c1, %c0_6, %c0_7] : memref<9x128x128xf32, #tpu.memory_space<vmem>>, vector<1x128x128xf32>
    %19 = vector.shape_cast %18 : vector<1x128x128xf32> to vector<128x128xf32>
    %20 = arith.truncf %17 : vector<128x128xf32> to vector<128x128xbf16>
    %21 = arith.extf %20 : vector<128x128xbf16> to vector<128x128xf32>
    %22 = arith.subf %17, %21 : vector<128x128xf32>
    %23 = arith.truncf %22 : vector<128x128xf32> to vector<128x128xbf16>
    %24 = arith.truncf %19 : vector<128x128xf32> to vector<128x128xbf16>
    %25 = arith.extf %24 : vector<128x128xbf16> to vector<128x128xf32>
    %26 = arith.subf %19, %25 : vector<128x128xf32>
    %27 = arith.truncf %26 : vector<128x128xf32> to vector<128x128xbf16>
    %cst_8 = arith.constant dense<0.000000e+00> : vector<128x128xf32>
    %28 = tpu.matmul %20, %24, %cst_8 {dimension_numbers = #tpu.dot_dimension_numbers<[1], [0], [0], [1], [0, 0, 1, 1], [], []>} : vector<128x128xbf16>, vector<128x128xbf16>, vector<128x128xf32> -> vector<128x128xf32>
    %cst_9 = arith.constant dense<0.000000e+00> : vector<128x128xf32>
    %29 = tpu.matmul %20, %27, %cst_9 {dimension_numbers = #tpu.dot_dimension_numbers<[1], [0], [0], [1], [0, 0, 1, 1], [], []>} : vector<128x128xbf16>, vector<128x128xbf16>, vector<128x128xf32> -> vector<128x128xf32>
    %30 = arith.addf %28, %29 : vector<128x128xf32>
    %cst_10 = arith.constant dense<0.000000e+00> : vector<128x128xf32>
    %31 = tpu.matmul %23, %24, %cst_10 {dimension_numbers = #tpu.dot_dimension_numbers<[1], [0], [0], [1], [0, 0, 1, 1], [], []>} : vector<128x128xbf16>, vector<128x128xbf16>, vector<128x128xf32> -> vector<128x128xf32>
    %32 = arith.addf %30, %31 : vector<128x128xf32>
    %c2 = arith.constant 2 : index
    %c0_11 = arith.constant 0 : index
    %c0_12 = arith.constant 0 : index
    %33 = vector.load %arg2[%c2, %c0_11, %c0_12] : memref<9x128x128xf32, #tpu.memory_space<vmem>>, vector<1x128x128xf32>
    %34 = vector.shape_cast %33 : vector<1x128x128xf32> to vector<128x128xf32>
    %35 = arith.truncf %34 : vector<128x128xf32> to vector<128x128xbf16>
    %36 = arith.extf %35 : vector<128x128xbf16> to vector<128x128xf32>
    %37 = arith.subf %34, %36 : vector<128x128xf32>
    %38 = arith.truncf %37 : vector<128x128xf32> to vector<128x128xbf16>
    %39 = arith.truncf %32 : vector<128x128xf32> to vector<128x128xbf16>
    %40 = arith.extf %39 : vector<128x128xbf16> to vector<128x128xf32>
    %41 = arith.subf %32, %40 : vector<128x128xf32>
    %42 = arith.truncf %41 : vector<128x128xf32> to vector<128x128xbf16>
    %cst_13 = arith.constant dense<0.000000e+00> : vector<128x128xf32>
    %43 = tpu.matmul %35, %39, %cst_13 {dimension_numbers = #tpu.dot_dimension_numbers<[1], [0], [0], [1], [0, 0, 1, 1], [], []>} : vector<128x128xbf16>, vector<128x128xbf16>, vector<128x128xf32> -> vector<128x128xf32>
    %cst_14 = arith.constant dense<0.000000e+00> : vector<128x128xf32>
    %44 = tpu.matmul %35, %42, %cst_14 {dimension_numbers = #tpu.dot_dimension_numbers<[1], [0], [0], [1], [0, 0, 1, 1], [], []>} : vector<128x128xbf16>, vector<128x128xbf16>, vector<128x128xf32> -> vector<128x128xf32>
    %45 = arith.addf %43, %44 : vector<128x128xf32>
    %cst_15 = arith.constant dense<0.000000e+00> : vector<128x128xf32>
    %46 = tpu.matmul %38, %39, %cst_15 {dimension_numbers = #tpu.dot_dimension_numbers<[1], [0], [0], [1], [0, 0, 1, 1], [], []>} : vector<128x128xbf16>, vector<128x128xbf16>, vector<128x128xf32> -> vector<128x128xf32>
    %47 = arith.addf %45, %46 : vector<128x128xf32>
    %c3 = arith.constant 3 : index
    %c0_16 = arith.constant 0 : index
    %c0_17 = arith.constant 0 : index
    %48 = vector.load %arg2[%c3, %c0_16, %c0_17] : memref<9x128x128xf32, #tpu.memory_space<vmem>>, vector<1x128x128xf32>
    %49 = vector.shape_cast %48 : vector<1x128x128xf32> to vector<128x128xf32>
    %50 = arith.truncf %47 : vector<128x128xf32> to vector<128x128xbf16>
    %51 = arith.extf %50 : vector<128x128xbf16> to vector<128x128xf32>
    %52 = arith.subf %47, %51 : vector<128x128xf32>
    %53 = arith.truncf %52 : vector<128x128xf32> to vector<128x128xbf16>
    %54 = arith.truncf %49 : vector<128x128xf32> to vector<128x128xbf16>
    %55 = arith.extf %54 : vector<128x128xbf16> to vector<128x128xf32>
    %56 = arith.subf %49, %55 : vector<128x128xf32>
    %57 = arith.truncf %56 : vector<128x128xf32> to vector<128x128xbf16>
    %cst_18 = arith.constant dense<0.000000e+00> : vector<128x128xf32>
    %58 = tpu.matmul %50, %54, %cst_18 {dimension_numbers = #tpu.dot_dimension_numbers<[1], [0], [0], [1], [0, 0, 1, 1], [], []>} : vector<128x128xbf16>, vector<128x128xbf16>, vector<128x128xf32> -> vector<128x128xf32>
    %cst_19 = arith.constant dense<0.000000e+00> : vector<128x128xf32>
    %59 = tpu.matmul %50, %57, %cst_19 {dimension_numbers = #tpu.dot_dimension_numbers<[1], [0], [0], [1], [0, 0, 1, 1], [], []>} : vector<128x128xbf16>, vector<128x128xbf16>, vector<128x128xf32> -> vector<128x128xf32>
    %60 = arith.addf %58, %59 : vector<128x128xf32>
    %cst_20 = arith.constant dense<0.000000e+00> : vector<128x128xf32>
    %61 = tpu.matmul %53, %54, %cst_20 {dimension_numbers = #tpu.dot_dimension_numbers<[1], [0], [0], [1], [0, 0, 1, 1], [], []>} : vector<128x128xbf16>, vector<128x128xbf16>, vector<128x128xf32> -> vector<128x128xf32>
    %62 = arith.addf %60, %61 : vector<128x128xf32>
    %c4 = arith.constant 4 : index
    %c0_21 = arith.constant 0 : index
    %c0_22 = arith.constant 0 : index
    %63 = vector.load %arg2[%c4, %c0_21, %c0_22] : memref<9x128x128xf32, #tpu.memory_space<vmem>>, vector<1x128x128xf32>
    %64 = vector.shape_cast %63 : vector<1x128x128xf32> to vector<128x128xf32>
    %65 = arith.truncf %64 : vector<128x128xf32> to vector<128x128xbf16>
    %66 = arith.extf %65 : vector<128x128xbf16> to vector<128x128xf32>
    %67 = arith.subf %64, %66 : vector<128x128xf32>
    %68 = arith.truncf %67 : vector<128x128xf32> to vector<128x128xbf16>
    %69 = arith.truncf %62 : vector<128x128xf32> to vector<128x128xbf16>
    %70 = arith.extf %69 : vector<128x128xbf16> to vector<128x128xf32>
    %71 = arith.subf %62, %70 : vector<128x128xf32>
    %72 = arith.truncf %71 : vector<128x128xf32> to vector<128x128xbf16>
    %cst_23 = arith.constant dense<0.000000e+00> : vector<128x128xf32>
    %73 = tpu.matmul %65, %69, %cst_23 {dimension_numbers = #tpu.dot_dimension_numbers<[1], [0], [0], [1], [0, 0, 1, 1], [], []>} : vector<128x128xbf16>, vector<128x128xbf16>, vector<128x128xf32> -> vector<128x128xf32>
    %cst_24 = arith.constant dense<0.000000e+00> : vector<128x128xf32>
    %74 = tpu.matmul %65, %72, %cst_24 {dimension_numbers = #tpu.dot_dimension_numbers<[1], [0], [0], [1], [0, 0, 1, 1], [], []>} : vector<128x128xbf16>, vector<128x128xbf16>, vector<128x128xf32> -> vector<128x128xf32>
    %75 = arith.addf %73, %74 : vector<128x128xf32>
    %cst_25 = arith.constant dense<0.000000e+00> : vector<128x128xf32>
    %76 = tpu.matmul %68, %69, %cst_25 {dimension_numbers = #tpu.dot_dimension_numbers<[1], [0], [0], [1], [0, 0, 1, 1], [], []>} : vector<128x128xbf16>, vector<128x128xbf16>, vector<128x128xf32> -> vector<128x128xf32>
    %77 = arith.addf %75, %76 : vector<128x128xf32>
    %c5 = arith.constant 5 : index
    %c0_26 = arith.constant 0 : index
    %c0_27 = arith.constant 0 : index
    %78 = vector.load %arg2[%c5, %c0_26, %c0_27] : memref<9x128x128xf32, #tpu.memory_space<vmem>>, vector<1x128x128xf32>
    %79 = vector.shape_cast %78 : vector<1x128x128xf32> to vector<128x128xf32>
    %80 = arith.truncf %77 : vector<128x128xf32> to vector<128x128xbf16>
    %81 = arith.extf %80 : vector<128x128xbf16> to vector<128x128xf32>
    %82 = arith.subf %77, %81 : vector<128x128xf32>
    %83 = arith.truncf %82 : vector<128x128xf32> to vector<128x128xbf16>
    %84 = arith.truncf %79 : vector<128x128xf32> to vector<128x128xbf16>
    %85 = arith.extf %84 : vector<128x128xbf16> to vector<128x128xf32>
    %86 = arith.subf %79, %85 : vector<128x128xf32>
    %87 = arith.truncf %86 : vector<128x128xf32> to vector<128x128xbf16>
    %cst_28 = arith.constant dense<0.000000e+00> : vector<128x128xf32>
    %88 = tpu.matmul %80, %84, %cst_28 {dimension_numbers = #tpu.dot_dimension_numbers<[1], [0], [0], [1], [0, 0, 1, 1], [], []>} : vector<128x128xbf16>, vector<128x128xbf16>, vector<128x128xf32> -> vector<128x128xf32>
    %cst_29 = arith.constant dense<0.000000e+00> : vector<128x128xf32>
    %89 = tpu.matmul %80, %87, %cst_29 {dimension_numbers = #tpu.dot_dimension_numbers<[1], [0], [0], [1], [0, 0, 1, 1], [], []>} : vector<128x128xbf16>, vector<128x128xbf16>, vector<128x128xf32> -> vector<128x128xf32>
    %90 = arith.addf %88, %89 : vector<128x128xf32>
    %cst_30 = arith.constant dense<0.000000e+00> : vector<128x128xf32>
    %91 = tpu.matmul %83, %84, %cst_30 {dimension_numbers = #tpu.dot_dimension_numbers<[1], [0], [0], [1], [0, 0, 1, 1], [], []>} : vector<128x128xbf16>, vector<128x128xbf16>, vector<128x128xf32> -> vector<128x128xf32>
    %92 = arith.addf %90, %91 : vector<128x128xf32>
    %c6 = arith.constant 6 : index
    %c0_31 = arith.constant 0 : index
    %c0_32 = arith.constant 0 : index
    %93 = vector.load %arg2[%c6, %c0_31, %c0_32] : memref<9x128x128xf32, #tpu.memory_space<vmem>>, vector<1x128x128xf32>
    %94 = vector.shape_cast %93 : vector<1x128x128xf32> to vector<128x128xf32>
    %95 = arith.subf %32, %94 : vector<128x128xf32>
    %cst_33 = arith.constant 0.000000e+00 : f32
    %96 = vector.broadcast %cst_33 : f32 to vector<128x128xf32>
    %97 = arith.maximumf %95, %96 : vector<128x128xf32>
    %cst_34 = arith.constant 0.000000e+00 : f32
    %98 = vector.broadcast %cst_34 : f32 to vector<128x128xf32>
    %99 = arith.subf %98, %32 : vector<128x128xf32>
    %100 = arith.subf %99, %94 : vector<128x128xf32>
    %cst_35 = arith.constant 0.000000e+00 : f32
    %101 = vector.broadcast %cst_35 : f32 to vector<128x128xf32>
    %102 = arith.maximumf %100, %101 : vector<128x128xf32>
    %103 = arith.subf %97, %102 : vector<128x128xf32>
    %c7 = arith.constant 7 : index
    %c0_36 = arith.constant 0 : index
    %c0_37 = arith.constant 0 : index
    %104 = vector.load %arg2[%c7, %c0_36, %c0_37] : memref<9x128x128xf32, #tpu.memory_space<vmem>>, vector<1x128x128xf32>
    %105 = vector.shape_cast %104 : vector<1x128x128xf32> to vector<128x128xf32>
    %106 = arith.subf %62, %105 : vector<128x128xf32>
    %cst_38 = arith.constant 0.000000e+00 : f32
    %107 = vector.broadcast %cst_38 : f32 to vector<128x128xf32>
    %108 = arith.maximumf %106, %107 : vector<128x128xf32>
    %cst_39 = arith.constant 0.000000e+00 : f32
    %109 = vector.broadcast %cst_39 : f32 to vector<128x128xf32>
    %110 = arith.subf %109, %62 : vector<128x128xf32>
    %111 = arith.subf %110, %105 : vector<128x128xf32>
    %cst_40 = arith.constant 0.000000e+00 : f32
    %112 = vector.broadcast %cst_40 : f32 to vector<128x128xf32>
    %113 = arith.maximumf %111, %112 : vector<128x128xf32>
    %114 = arith.subf %108, %113 : vector<128x128xf32>
    %c8 = arith.constant 8 : index
    %c0_41 = arith.constant 0 : index
    %c0_42 = arith.constant 0 : index
    %115 = vector.load %arg2[%c8, %c0_41, %c0_42] : memref<9x128x128xf32, #tpu.memory_space<vmem>>, vector<1x128x128xf32>
    %116 = vector.shape_cast %115 : vector<1x128x128xf32> to vector<128x128xf32>
    %117 = arith.subf %92, %116 : vector<128x128xf32>
    %cst_43 = arith.constant 0.000000e+00 : f32
    %118 = vector.broadcast %cst_43 : f32 to vector<128x128xf32>
    %119 = arith.maximumf %117, %118 : vector<128x128xf32>
    %cst_44 = arith.constant 0.000000e+00 : f32
    %120 = vector.broadcast %cst_44 : f32 to vector<128x128xf32>
    %121 = arith.subf %120, %92 : vector<128x128xf32>
    %122 = arith.subf %121, %116 : vector<128x128xf32>
    %cst_45 = arith.constant 0.000000e+00 : f32
    %123 = vector.broadcast %cst_45 : f32 to vector<128x128xf32>
    %124 = arith.maximumf %122, %123 : vector<128x128xf32>
    %125 = arith.subf %119, %124 : vector<128x128xf32>
    %c5_46 = arith.constant 5 : index
    %c0_47 = arith.constant 0 : index
    %c0_48 = arith.constant 0 : index
    %126 = vector.load %arg2[%c5_46, %c0_47, %c0_48] : memref<9x128x128xf32, #tpu.memory_space<vmem>>, vector<1x128x128xf32>
    %127 = vector.shape_cast %126 : vector<1x128x128xf32> to vector<128x128xf32>
    %128 = arith.truncf %127 : vector<128x128xf32> to vector<128x128xbf16>
    %129 = arith.extf %128 : vector<128x128xbf16> to vector<128x128xf32>
    %130 = arith.subf %127, %129 : vector<128x128xf32>
    %131 = arith.truncf %130 : vector<128x128xf32> to vector<128x128xbf16>
    %132 = arith.truncf %125 : vector<128x128xf32> to vector<128x128xbf16>
    %133 = arith.extf %132 : vector<128x128xbf16> to vector<128x128xf32>
    %134 = arith.subf %125, %133 : vector<128x128xf32>
    %135 = arith.truncf %134 : vector<128x128xf32> to vector<128x128xbf16>
    %cst_49 = arith.constant dense<0.000000e+00> : vector<128x128xf32>
    %136 = tpu.matmul %128, %132, %cst_49 {dimension_numbers = #tpu.dot_dimension_numbers<[1], [0], [0], [1], [0, 0, 1, 1], [], []>} : vector<128x128xbf16>, vector<128x128xbf16>, vector<128x128xf32> -> vector<128x128xf32>
    %cst_50 = arith.constant dense<0.000000e+00> : vector<128x128xf32>
    %137 = tpu.matmul %128, %135, %cst_50 {dimension_numbers = #tpu.dot_dimension_numbers<[1], [0], [0], [1], [0, 0, 1, 1], [], []>} : vector<128x128xbf16>, vector<128x128xbf16>, vector<128x128xf32> -> vector<128x128xf32>
    %138 = arith.addf %136, %137 : vector<128x128xf32>
    %cst_51 = arith.constant dense<0.000000e+00> : vector<128x128xf32>
    %139 = tpu.matmul %131, %132, %cst_51 {dimension_numbers = #tpu.dot_dimension_numbers<[1], [0], [0], [1], [0, 0, 1, 1], [], []>} : vector<128x128xbf16>, vector<128x128xbf16>, vector<128x128xf32> -> vector<128x128xf32>
    %140 = arith.addf %138, %139 : vector<128x128xf32>
    %c4_52 = arith.constant 4 : index
    %c0_53 = arith.constant 0 : index
    %c0_54 = arith.constant 0 : index
    %141 = vector.load %arg2[%c4_52, %c0_53, %c0_54] : memref<9x128x128xf32, #tpu.memory_space<vmem>>, vector<1x128x128xf32>
    %142 = vector.shape_cast %141 : vector<1x128x128xf32> to vector<128x128xf32>
    %143 = arith.truncf %140 : vector<128x128xf32> to vector<128x128xbf16>
    %144 = arith.extf %143 : vector<128x128xbf16> to vector<128x128xf32>
    %145 = arith.subf %140, %144 : vector<128x128xf32>
    %146 = arith.truncf %145 : vector<128x128xf32> to vector<128x128xbf16>
    %147 = arith.truncf %142 : vector<128x128xf32> to vector<128x128xbf16>
    %148 = arith.extf %147 : vector<128x128xbf16> to vector<128x128xf32>
    %149 = arith.subf %142, %148 : vector<128x128xf32>
    %150 = arith.truncf %149 : vector<128x128xf32> to vector<128x128xbf16>
    %cst_55 = arith.constant dense<0.000000e+00> : vector<128x128xf32>
    %151 = tpu.matmul %143, %147, %cst_55 {dimension_numbers = #tpu.dot_dimension_numbers<[1], [0], [0], [1], [0, 0, 1, 1], [], []>} : vector<128x128xbf16>, vector<128x128xbf16>, vector<128x128xf32> -> vector<128x128xf32>
    %cst_56 = arith.constant dense<0.000000e+00> : vector<128x128xf32>
    %152 = tpu.matmul %143, %150, %cst_56 {dimension_numbers = #tpu.dot_dimension_numbers<[1], [0], [0], [1], [0, 0, 1, 1], [], []>} : vector<128x128xbf16>, vector<128x128xbf16>, vector<128x128xf32> -> vector<128x128xf32>
    %153 = arith.addf %151, %152 : vector<128x128xf32>
    %cst_57 = arith.constant dense<0.000000e+00> : vector<128x128xf32>
    %154 = tpu.matmul %146, %147, %cst_57 {dimension_numbers = #tpu.dot_dimension_numbers<[1], [0], [0], [1], [0, 0, 1, 1], [], []>} : vector<128x128xbf16>, vector<128x128xbf16>, vector<128x128xf32> -> vector<128x128xf32>
    %155 = arith.addf %153, %154 : vector<128x128xf32>
    %156 = arith.addf %114, %155 : vector<128x128xf32>
    %c3_58 = arith.constant 3 : index
    %c0_59 = arith.constant 0 : index
    %c0_60 = arith.constant 0 : index
    %157 = vector.load %arg2[%c3_58, %c0_59, %c0_60] : memref<9x128x128xf32, #tpu.memory_space<vmem>>, vector<1x128x128xf32>
    %158 = vector.shape_cast %157 : vector<1x128x128xf32> to vector<128x128xf32>
    %159 = arith.truncf %158 : vector<128x128xf32> to vector<128x128xbf16>
    %160 = arith.extf %159 : vector<128x128xbf16> to vector<128x128xf32>
    %161 = arith.subf %158, %160 : vector<128x128xf32>
    %162 = arith.truncf %161 : vector<128x128xf32> to vector<128x128xbf16>
    %163 = arith.truncf %156 : vector<128x128xf32> to vector<128x128xbf16>
    %164 = arith.extf %163 : vector<128x128xbf16> to vector<128x128xf32>
    %165 = arith.subf %156, %164 : vector<128x128xf32>
    %166 = arith.truncf %165 : vector<128x128xf32> to vector<128x128xbf16>
    %cst_61 = arith.constant dense<0.000000e+00> : vector<128x128xf32>
    %167 = tpu.matmul %159, %163, %cst_61 {dimension_numbers = #tpu.dot_dimension_numbers<[1], [0], [0], [1], [0, 0, 1, 1], [], []>} : vector<128x128xbf16>, vector<128x128xbf16>, vector<128x128xf32> -> vector<128x128xf32>
    %cst_62 = arith.constant dense<0.000000e+00> : vector<128x128xf32>
    %168 = tpu.matmul %159, %166, %cst_62 {dimension_numbers = #tpu.dot_dimension_numbers<[1], [0], [0], [1], [0, 0, 1, 1], [], []>} : vector<128x128xbf16>, vector<128x128xbf16>, vector<128x128xf32> -> vector<128x128xf32>
    %169 = arith.addf %167, %168 : vector<128x128xf32>
    %cst_63 = arith.constant dense<0.000000e+00> : vector<128x128xf32>
    %170 = tpu.matmul %162, %163, %cst_63 {dimension_numbers = #tpu.dot_dimension_numbers<[1], [0], [0], [1], [0, 0, 1, 1], [], []>} : vector<128x128xbf16>, vector<128x128xbf16>, vector<128x128xf32> -> vector<128x128xf32>
    %171 = arith.addf %169, %170 : vector<128x128xf32>
    %c2_64 = arith.constant 2 : index
    %c0_65 = arith.constant 0 : index
    %c0_66 = arith.constant 0 : index
    %172 = vector.load %arg2[%c2_64, %c0_65, %c0_66] : memref<9x128x128xf32, #tpu.memory_space<vmem>>, vector<1x128x128xf32>
    %173 = vector.shape_cast %172 : vector<1x128x128xf32> to vector<128x128xf32>
    %174 = arith.truncf %171 : vector<128x128xf32> to vector<128x128xbf16>
    %175 = arith.extf %174 : vector<128x128xbf16> to vector<128x128xf32>
    %176 = arith.subf %171, %175 : vector<128x128xf32>
    %177 = arith.truncf %176 : vector<128x128xf32> to vector<128x128xbf16>
    %178 = arith.truncf %173 : vector<128x128xf32> to vector<128x128xbf16>
    %179 = arith.extf %178 : vector<128x128xbf16> to vector<128x128xf32>
    %180 = arith.subf %173, %179 : vector<128x128xf32>
    %181 = arith.truncf %180 : vector<128x128xf32> to vector<128x128xbf16>
    %cst_67 = arith.constant dense<0.000000e+00> : vector<128x128xf32>
    %182 = tpu.matmul %174, %178, %cst_67 {dimension_numbers = #tpu.dot_dimension_numbers<[1], [0], [0], [1], [0, 0, 1, 1], [], []>} : vector<128x128xbf16>, vector<128x128xbf16>, vector<128x128xf32> -> vector<128x128xf32>
    %cst_68 = arith.constant dense<0.000000e+00> : vector<128x128xf32>
    %183 = tpu.matmul %174, %181, %cst_68 {dimension_numbers = #tpu.dot_dimension_numbers<[1], [0], [0], [1], [0, 0, 1, 1], [], []>} : vector<128x128xbf16>, vector<128x128xbf16>, vector<128x128xf32> -> vector<128x128xf32>
    %184 = arith.addf %182, %183 : vector<128x128xf32>
    %cst_69 = arith.constant dense<0.000000e+00> : vector<128x128xf32>
    %185 = tpu.matmul %177, %178, %cst_69 {dimension_numbers = #tpu.dot_dimension_numbers<[1], [0], [0], [1], [0, 0, 1, 1], [], []>} : vector<128x128xbf16>, vector<128x128xbf16>, vector<128x128xf32> -> vector<128x128xf32>
    %186 = arith.addf %184, %185 : vector<128x128xf32>
    %187 = arith.addf %103, %186 : vector<128x128xf32>
    %c1_70 = arith.constant 1 : index
    %c0_71 = arith.constant 0 : index
    %c0_72 = arith.constant 0 : index
    %188 = vector.load %arg2[%c1_70, %c0_71, %c0_72] : memref<9x128x128xf32, #tpu.memory_space<vmem>>, vector<1x128x128xf32>
    %189 = vector.shape_cast %188 : vector<1x128x128xf32> to vector<128x128xf32>
    %190 = arith.truncf %189 : vector<128x128xf32> to vector<128x128xbf16>
    %191 = arith.extf %190 : vector<128x128xbf16> to vector<128x128xf32>
    %192 = arith.subf %189, %191 : vector<128x128xf32>
    %193 = arith.truncf %192 : vector<128x128xf32> to vector<128x128xbf16>
    %194 = arith.truncf %187 : vector<128x128xf32> to vector<128x128xbf16>
    %195 = arith.extf %194 : vector<128x128xbf16> to vector<128x128xf32>
    %196 = arith.subf %187, %195 : vector<128x128xf32>
    %197 = arith.truncf %196 : vector<128x128xf32> to vector<128x128xbf16>
    %cst_73 = arith.constant dense<0.000000e+00> : vector<128x128xf32>
    %198 = tpu.matmul %190, %194, %cst_73 {dimension_numbers = #tpu.dot_dimension_numbers<[1], [0], [0], [1], [0, 0, 1, 1], [], []>} : vector<128x128xbf16>, vector<128x128xbf16>, vector<128x128xf32> -> vector<128x128xf32>
    %cst_74 = arith.constant dense<0.000000e+00> : vector<128x128xf32>
    %199 = tpu.matmul %190, %197, %cst_74 {dimension_numbers = #tpu.dot_dimension_numbers<[1], [0], [0], [1], [0, 0, 1, 1], [], []>} : vector<128x128xbf16>, vector<128x128xbf16>, vector<128x128xf32> -> vector<128x128xf32>
    %200 = arith.addf %198, %199 : vector<128x128xf32>
    %cst_75 = arith.constant dense<0.000000e+00> : vector<128x128xf32>
    %201 = tpu.matmul %193, %194, %cst_75 {dimension_numbers = #tpu.dot_dimension_numbers<[1], [0], [0], [1], [0, 0, 1, 1], [], []>} : vector<128x128xbf16>, vector<128x128xbf16>, vector<128x128xf32> -> vector<128x128xf32>
    %202 = arith.addf %200, %201 : vector<128x128xf32>
    %c0_76 = arith.constant 0 : index
    %c0_77 = arith.constant 0 : index
    %c0_78 = arith.constant 0 : index
    %203 = vector.load %arg2[%c0_76, %c0_77, %c0_78] : memref<9x128x128xf32, #tpu.memory_space<vmem>>, vector<1x128x128xf32>
    %204 = vector.shape_cast %203 : vector<1x128x128xf32> to vector<128x128xf32>
    %205 = arith.truncf %202 : vector<128x128xf32> to vector<128x128xbf16>
    %206 = arith.extf %205 : vector<128x128xbf16> to vector<128x128xf32>
    %207 = arith.subf %202, %206 : vector<128x128xf32>
    %208 = arith.truncf %207 : vector<128x128xf32> to vector<128x128xbf16>
    %209 = arith.truncf %204 : vector<128x128xf32> to vector<128x128xbf16>
    %210 = arith.extf %209 : vector<128x128xbf16> to vector<128x128xf32>
    %211 = arith.subf %204, %210 : vector<128x128xf32>
    %212 = arith.truncf %211 : vector<128x128xf32> to vector<128x128xbf16>
    %cst_79 = arith.constant dense<0.000000e+00> : vector<128x128xf32>
    %213 = tpu.matmul %205, %209, %cst_79 {dimension_numbers = #tpu.dot_dimension_numbers<[1], [0], [0], [1], [0, 0, 1, 1], [], []>} : vector<128x128xbf16>, vector<128x128xbf16>, vector<128x128xf32> -> vector<128x128xf32>
    %cst_80 = arith.constant dense<0.000000e+00> : vector<128x128xf32>
    %214 = tpu.matmul %205, %212, %cst_80 {dimension_numbers = #tpu.dot_dimension_numbers<[1], [0], [0], [1], [0, 0, 1, 1], [], []>} : vector<128x128xbf16>, vector<128x128xbf16>, vector<128x128xf32> -> vector<128x128xf32>
    %215 = arith.addf %213, %214 : vector<128x128xf32>
    %cst_81 = arith.constant dense<0.000000e+00> : vector<128x128xf32>
    %216 = tpu.matmul %208, %209, %cst_81 {dimension_numbers = #tpu.dot_dimension_numbers<[1], [0], [0], [1], [0, 0, 1, 1], [], []>} : vector<128x128xbf16>, vector<128x128xbf16>, vector<128x128xf32> -> vector<128x128xf32>
    %217 = arith.addf %215, %216 : vector<128x128xf32>
    %218 = arith.index_cast %c0_i32 : i32 to index
    %c0_82 = arith.constant 0 : index
    %c0_83 = arith.constant 0 : index
    %219 = vector.load %arg3[%218, %c0_82, %c0_83] : memref<1x128x128xf32, #tpu.memory_space<vmem>>, vector<1x128x128xf32>
    %220 = vector.shape_cast %219 : vector<1x128x128xf32> to vector<128x128xf32>
    %221 = vector.shape_cast %217 : vector<128x128xf32> to vector<1x128x128xf32>
    tpu.vector_store %arg3[%218, %c0_82, %c0_83], %221 {strides = array<i32>} : memref<1x128x128xf32, #tpu.memory_space<vmem>>, vector<1x128x128xf32>,
    %c1_i32 = arith.constant 1 : i32
    return
  }
  func.func @transform_0(%arg0: i32) -> (i32, i32, i32) {
    %c0_i32 = arith.constant 0 : i32
    %c0_i32_0 = arith.constant 0 : i32
    %c0_i32_1 = arith.constant 0 : i32
    return %arg0, %c0_i32, %c0_i32_0 : i32, i32, i32
  }
  func.func @transform_1(%arg0: i32) -> (i32, i32, i32) {
    %c0_i32 = arith.constant 0 : i32
    %c0_i32_0 = arith.constant 0 : i32
    %c0_i32_1 = arith.constant 0 : i32
    %c0_i32_2 = arith.constant 0 : i32
    return %c0_i32, %c0_i32_0, %c0_i32_1 : i32, i32, i32
  }
  func.func @transform_2(%arg0: i32) -> (i32, i32, i32) {
    %c0_i32 = arith.constant 0 : i32
    %c0_i32_0 = arith.constant 0 : i32
    %c0_i32_1 = arith.constant 0 : i32
    return %arg0, %c0_i32, %c0_i32_0 : i32, i32, i32
  }
}

</mosaic_0001>

<bundles_post_ra>
// kernel: tile.18
= control target key start
LH: loop header
LB: loop body
LE: loop exit
PB: predicated region body
PF: predicated region fallthrough
CT: control target
= control target key end

     0   :  { %s1260_s0 = inlined_call_operand.vmem [shape: f32[64,64], index: 0, kind: input, shape index: {}]   ;;  %s1261_s1 = inlined_call_operand.vmem [shape: f32[2,64,2,64], index: 1, kind: output, shape index: {}]  }
   0x1   :  { %v4_v0 = vld [vmem:[%s1260_s0] ss:$0 sm:$0xff]  ;;  %v485_v1 = vld [vmem:[%s1260_s0 + $0x1] ss:$0 sm:$0xff]  ;;  %v488_v2 = vld [vmem:[%s1260_s0 + $0x2] ss:$0 sm:$0xff] }
   0x2   :  { %5 = vst [vmem:[%s1261_s1] sm:$0x3] %v4_v0  ;;  %484 = vst [vmem:[%s1261_s1 + $0x80] sm:$0x3] %v4_v0  ;;  %v491_v3 = vld [vmem:[%s1260_s0 + $0x3] ss:$0 sm:$0xff] }
   0x3   :  { %486 = vst [vmem:[%s1261_s1 + $0x2] sm:$0x3] %v485_v1  ;;  %487 = vst [vmem:[%s1261_s1 + $0x82] sm:$0x3] %v485_v1  ;;  %v494_v4 = vld [vmem:[%s1260_s0 + $0x4] ss:$0 sm:$0xff] }
   0x4   :  { %489 = vst [vmem:[%s1261_s1 + $0x4] sm:$0x3] %v488_v2  ;;  %490 = vst [vmem:[%s1261_s1 + $0x84] sm:$0x3] %v488_v2  ;;  %v497_v5 = vld [vmem:[%s1260_s0 + $0x5] ss:$0 sm:$0xff] }
   0x5   :  { %492 = vst [vmem:[%s1261_s1 + $0x6] sm:$0x3] %v491_v3  ;;  %493 = vst [vmem:[%s1261_s1 + $0x86] sm:$0x3] %v491_v3  ;;  %v500_v6 = vld [vmem:[%s1260_s0 + $0x6] ss:$0 sm:$0xff] }
   0x6   :  { %495 = vst [vmem:[%s1261_s1 + $0x8] sm:$0x3] %v494_v4  ;;  %496 = vst [vmem:[%s1261_s1 + $0x88] sm:$0x3] %v494_v4  ;;  %v503_v7 = vld [vmem:[%s1260_s0 + $0x7] ss:$0 sm:$0xff] }
   0x7   :  { %498 = vst [vmem:[%s1261_s1 + $0xa] sm:$0x3] %v497_v5  ;;  %499 = vst [vmem:[%s1261_s1 + $0x8a] sm:$0x3] %v497_v5  ;;  %v506_v8 = vld [vmem:[%s1260_s0 + $0x8] ss:$0 sm:$0xff] }
   0x8   :  { %501 = vst [vmem:[%s1261_s1 + $0xc] sm:$0x3] %v500_v6  ;;  %502 = vst [vmem:[%s1261_s1 + $0x8c] sm:$0x3] %v500_v6  ;;  %v509_v9 = vld [vmem:[%s1260_s0 + $0x9] ss:$0 sm:$0xff] }
   0x9   :  { %504 = vst [vmem:[%s1261_s1 + $0xe] sm:$0x3] %v503_v7  ;;  %505 = vst [vmem:[%s1261_s1 + $0x8e] sm:$0x3] %v503_v7  ;;  %v512_v10 = vld [vmem:[%s1260_s0 + $0xa] ss:$0 sm:$0xff] }
   0xa   :  { %507 = vst [vmem:[%s1261_s1 + $0x10] sm:$0x3] %v506_v8  ;;  %508 = vst [vmem:[%s1261_s1 + $0x90] sm:$0x3] %v506_v8  ;;  %v515_v11 = vld [vmem:[%s1260_s0 + $0xb] ss:$0 sm:$0xff] }
   0xb   :  { %510 = vst [vmem:[%s1261_s1 + $0x12] sm:$0x3] %v509_v9  ;;  %511 = vst [vmem:[%s1261_s1 + $0x92] sm:$0x3] %v509_v9  ;;  %v518_v12 = vld [vmem:[%s1260_s0 + $0xc] ss:$0 sm:$0xff] }
   0xc   :  { %513 = vst [vmem:[%s1261_s1 + $0x14] sm:$0x3] %v512_v10  ;;  %514 = vst [vmem:[%s1261_s1 + $0x94] sm:$0x3] %v512_v10  ;;  %v521_v13 = vld [vmem:[%s1260_s0 + $0xd] ss:$0 sm:$0xff] }
   0xd   :  { %516 = vst [vmem:[%s1261_s1 + $0x16] sm:$0x3] %v515_v11  ;;  %517 = vst [vmem:[%s1261_s1 + $0x96] sm:$0x3] %v515_v11  ;;  %v524_v14 = vld [vmem:[%s1260_s0 + $0xe] ss:$0 sm:$0xff] }
   0xe   :  { %519 = vst [vmem:[%s1261_s1 + $0x18] sm:$0x3] %v518_v12  ;;  %520 = vst [vmem:[%s1261_s1 + $0x98] sm:$0x3] %v518_v12  ;;  %v527_v15 = vld [vmem:[%s1260_s0 + $0xf] ss:$0 sm:$0xff] }
   0xf   :  { %522 = vst [vmem:[%s1261_s1 + $0x1a] sm:$0x3] %v521_v13  ;;  %523 = vst [vmem:[%s1261_s1 + $0x9a] sm:$0x3] %v521_v13  ;;  %v530_v16 = vld [vmem:[%s1260_s0 + $0x10] ss:$0 sm:$0xff] }
  0x10   :  { %525 = vst [vmem:[%s1261_s1 + $0x1c] sm:$0x3] %v524_v14  ;;  %526 = vst [vmem:[%s1261_s1 + $0x9c] sm:$0x3] %v524_v14  ;;  %v533_v17 = vld [vmem:[%s1260_s0 + $0x11] ss:$0 sm:$0xff] }
  0x11   :  { %528 = vst [vmem:[%s1261_s1 + $0x1e] sm:$0x3] %v527_v15  ;;  %529 = vst [vmem:[%s1261_s1 + $0x9e] sm:$0x3] %v527_v15  ;;  %v536_v18 = vld [vmem:[%s1260_s0 + $0x12] ss:$0 sm:$0xff] }
  0x12   :  { %531 = vst [vmem:[%s1261_s1 + $0x20] sm:$0x3] %v530_v16  ;;  %532 = vst [vmem:[%s1261_s1 + $0xa0] sm:$0x3] %v530_v16  ;;  %v539_v19 = vld [vmem:[%s1260_s0 + $0x13] ss:$0 sm:$0xff] }
  0x13   :  { %534 = vst [vmem:[%s1261_s1 + $0x22] sm:$0x3] %v533_v17  ;;  %535 = vst [vmem:[%s1261_s1 + $0xa2] sm:$0x3] %v533_v17  ;;  %v542_v20 = vld [vmem:[%s1260_s0 + $0x14] ss:$0 sm:$0xff] }
  0x14   :  { %537 = vst [vmem:[%s1261_s1 + $0x24] sm:$0x3] %v536_v18  ;;  %538 = vst [vmem:[%s1261_s1 + $0xa4] sm:$0x3] %v536_v18  ;;  %v545_v21 = vld [vmem:[%s1260_s0 + $0x15] ss:$0 sm:$0xff] }
  0x15   :  { %540 = vst [vmem:[%s1261_s1 + $0x26] sm:$0x3] %v539_v19  ;;  %541 = vst [vmem:[%s1261_s1 + $0xa6] sm:$0x3] %v539_v19  ;;  %v548_v22 = vld [vmem:[%s1260_s0 + $0x16] ss:$0 sm:$0xff] }
  0x16   :  { %543 = vst [vmem:[%s1261_s1 + $0x28] sm:$0x3] %v542_v20  ;;  %544 = vst [vmem:[%s1261_s1 + $0xa8] sm:$0x3] %v542_v20  ;;  %v551_v23 = vld [vmem:[%s1260_s0 + $0x17] ss:$0 sm:$0xff] }
  0x17   :  { %546 = vst [vmem:[%s1261_s1 + $0x2a] sm:$0x3] %v545_v21  ;;  %547 = vst [vmem:[%s1261_s1 + $0xaa] sm:$0x3] %v545_v21  ;;  %v554_v24 = vld [vmem:[%s1260_s0 + $0x18] ss:$0 sm:$0xff] }
  0x18   :  { %549 = vst [vmem:[%s1261_s1 + $0x2c] sm:$0x3] %v548_v22  ;;  %550 = vst [vmem:[%s1261_s1 + $0xac] sm:$0x3] %v548_v22  ;;  %v557_v25 = vld [vmem:[%s1260_s0 + $0x19] ss:$0 sm:$0xff] }
  0x19   :  { %552 = vst [vmem:[%s1261_s1 + $0x2e] sm:$0x3] %v551_v23  ;;  %553 = vst [vmem:[%s1261_s1 + $0xae] sm:$0x3] %v551_v23  ;;  %v560_v26 = vld [vmem:[%s1260_s0 + $0x1a] ss:$0 sm:$0xff] }
  0x1a   :  { %555 = vst [vmem:[%s1261_s1 + $0x30] sm:$0x3] %v554_v24  ;;  %556 = vst [vmem:[%s1261_s1 + $0xb0] sm:$0x3] %v554_v24  ;;  %v563_v27 = vld [vmem:[%s1260_s0 + $0x1b] ss:$0 sm:$0xff] }
  0x1b   :  { %558 = vst [vmem:[%s1261_s1 + $0x32] sm:$0x3] %v557_v25  ;;  %559 = vst [vmem:[%s1261_s1 + $0xb2] sm:$0x3] %v557_v25  ;;  %v566_v28 = vld [vmem:[%s1260_s0 + $0x1c] ss:$0 sm:$0xff] }
  0x1c   :  { %561 = vst [vmem:[%s1261_s1 + $0x34] sm:$0x3] %v560_v26  ;;  %562 = vst [vmem:[%s1261_s1 + $0xb4] sm:$0x3] %v560_v26  ;;  %v569_v29 = vld [vmem:[%s1260_s0 + $0x1d] ss:$0 sm:$0xff] }
  0x1d   :  { %564 = vst [vmem:[%s1261_s1 + $0x36] sm:$0x3] %v563_v27  ;;  %565 = vst [vmem:[%s1261_s1 + $0xb6] sm:$0x3] %v563_v27  ;;  %v572_v30 = vld [vmem:[%s1260_s0 + $0x1e] ss:$0 sm:$0xff] }
  0x1e   :  { %567 = vst [vmem:[%s1261_s1 + $0x38] sm:$0x3] %v566_v28  ;;  %568 = vst [vmem:[%s1261_s1 + $0xb8] sm:$0x3] %v566_v28  ;;  %v575_v31 = vld [vmem:[%s1260_s0 + $0x1f] ss:$0 sm:$0xff] }
  0x1f   :  { %570 = vst [vmem:[%s1261_s1 + $0x3a] sm:$0x3] %v569_v29  ;;  %571 = vst [vmem:[%s1261_s1 + $0xba] sm:$0x3] %v569_v29  ;;  %v578_v32 = vld [vmem:[%s1260_s0 + $0x20] ss:$0 sm:$0xff] }
  0x20   :  { %573 = vst [vmem:[%s1261_s1 + $0x3c] sm:$0x3] %v572_v30  ;;  %574 = vst [vmem:[%s1261_s1 + $0xbc] sm:$0x3] %v572_v30  ;;  %v581_v33 = vld [vmem:[%s1260_s0 + $0x21] ss:$0 sm:$0xff] }
  0x21   :  { %576 = vst [vmem:[%s1261_s1 + $0x3e] sm:$0x3] %v575_v31  ;;  %577 = vst [vmem:[%s1261_s1 + $0xbe] sm:$0x3] %v575_v31  ;;  %v584_v34 = vld [vmem:[%s1260_s0 + $0x22] ss:$0 sm:$0xff] }
  0x22   :  { %579 = vst [vmem:[%s1261_s1 + $0x40] sm:$0x3] %v578_v32  ;;  %580 = vst [vmem:[%s1261_s1 + $0xc0] sm:$0x3] %v578_v32  ;;  %v587_v35 = vld [vmem:[%s1260_s0 + $0x23] ss:$0 sm:$0xff] }
  0x23   :  { %582 = vst [vmem:[%s1261_s1 + $0x42] sm:$0x3] %v581_v33  ;;  %583 = vst [vmem:[%s1261_s1 + $0xc2] sm:$0x3] %v581_v33  ;;  %v590_v36 = vld [vmem:[%s1260_s0 + $0x24] ss:$0 sm:$0xff] }
  0x24   :  { %585 = vst [vmem:[%s1261_s1 + $0x44] sm:$0x3] %v584_v34  ;;  %586 = vst [vmem:[%s1261_s1 + $0xc4] sm:$0x3] %v584_v34  ;;  %v593_v37 = vld [vmem:[%s1260_s0 + $0x25] ss:$0 sm:$0xff] }
  0x25   :  { %588 = vst [vmem:[%s1261_s1 + $0x46] sm:$0x3] %v587_v35  ;;  %589 = vst [vmem:[%s1261_s1 + $0xc6] sm:$0x3] %v587_v35  ;;  %v596_v38 = vld [vmem:[%s1260_s0 + $0x26] ss:$0 sm:$0xff] }
  0x26   :  { %591 = vst [vmem:[%s1261_s1 + $0x48] sm:$0x3] %v590_v36  ;;  %592 = vst [vmem:[%s1261_s1 + $0xc8] sm:$0x3] %v590_v36  ;;  %v599_v39 = vld [vmem:[%s1260_s0 + $0x27] ss:$0 sm:$0xff] }
  0x27   :  { %594 = vst [vmem:[%s1261_s1 + $0x4a] sm:$0x3] %v593_v37  ;;  %595 = vst [vmem:[%s1261_s1 + $0xca] sm:$0x3] %v593_v37  ;;  %v602_v40 = vld [vmem:[%s1260_s0 + $0x28] ss:$0 sm:$0xff] }
  0x28   :  { %597 = vst [vmem:[%s1261_s1 + $0x4c] sm:$0x3] %v596_v38  ;;  %598 = vst [vmem:[%s1261_s1 + $0xcc] sm:$0x3] %v596_v38  ;;  %v605_v41 = vld [vmem:[%s1260_s0 + $0x29] ss:$0 sm:$0xff] }
  0x29   :  { %600 = vst [vmem:[%s1261_s1 + $0x4e] sm:$0x3] %v599_v39  ;;  %601 = vst [vmem:[%s1261_s1 + $0xce] sm:$0x3] %v599_v39  ;;  %v608_v42 = vld [vmem:[%s1260_s0 + $0x2a] ss:$0 sm:$0xff] }
  0x2a   :  { %603 = vst [vmem:[%s1261_s1 + $0x50] sm:$0x3] %v602_v40  ;;  %604 = vst [vmem:[%s1261_s1 + $0xd0] sm:$0x3] %v602_v40  ;;  %v611_v43 = vld [vmem:[%s1260_s0 + $0x2b] ss:$0 sm:$0xff] }
  0x2b   :  { %606 = vst [vmem:[%s1261_s1 + $0x52] sm:$0x3] %v605_v41  ;;  %607 = vst [vmem:[%s1261_s1 + $0xd2] sm:$0x3] %v605_v41  ;;  %v614_v44 = vld [vmem:[%s1260_s0 + $0x2c] ss:$0 sm:$0xff] }
  0x2c   :  { %609 = vst [vmem:[%s1261_s1 + $0x54] sm:$0x3] %v608_v42  ;;  %610 = vst [vmem:[%s1261_s1 + $0xd4] sm:$0x3] %v608_v42  ;;  %v617_v45 = vld [vmem:[%s1260_s0 + $0x2d] ss:$0 sm:$0xff] }
  0x2d   :  { %612 = vst [vmem:[%s1261_s1 + $0x56] sm:$0x3] %v611_v43  ;;  %613 = vst [vmem:[%s1261_s1 + $0xd6] sm:$0x3] %v611_v43  ;;  %v620_v46 = vld [vmem:[%s1260_s0 + $0x2e] ss:$0 sm:$0xff] }
  0x2e   :  { %615 = vst [vmem:[%s1261_s1 + $0x58] sm:$0x3] %v614_v44  ;;  %616 = vst [vmem:[%s1261_s1 + $0xd8] sm:$0x3] %v614_v44  ;;  %v623_v47 = vld [vmem:[%s1260_s0 + $0x2f] ss:$0 sm:$0xff] }
  0x2f   :  { %618 = vst [vmem:[%s1261_s1 + $0x5a] sm:$0x3] %v617_v45  ;;  %619 = vst [vmem:[%s1261_s1 + $0xda] sm:$0x3] %v617_v45  ;;  %v626_v48 = vld [vmem:[%s1260_s0 + $0x30] ss:$0 sm:$0xff] }
  0x30   :  { %621 = vst [vmem:[%s1261_s1 + $0x5c] sm:$0x3] %v620_v46  ;;  %622 = vst [vmem:[%s1261_s1 + $0xdc] sm:$0x3] %v620_v46  ;;  %v629_v49 = vld [vmem:[%s1260_s0 + $0x31] ss:$0 sm:$0xff] }
  0x31   :  { %624 = vst [vmem:[%s1261_s1 + $0x5e] sm:$0x3] %v623_v47  ;;  %625 = vst [vmem:[%s1261_s1 + $0xde] sm:$0x3] %v623_v47  ;;  %v632_v50 = vld [vmem:[%s1260_s0 + $0x32] ss:$0 sm:$0xff] }
  0x32   :  { %627 = vst [vmem:[%s1261_s1 + $0x60] sm:$0x3] %v626_v48  ;;  %628 = vst [vmem:[%s1261_s1 + $0xe0] sm:$0x3] %v626_v48  ;;  %v635_v51 = vld [vmem:[%s1260_s0 + $0x33] ss:$0 sm:$0xff] }
  0x33   :  { %630 = vst [vmem:[%s1261_s1 + $0x62] sm:$0x3] %v629_v49  ;;  %631 = vst [vmem:[%s1261_s1 + $0xe2] sm:$0x3] %v629_v49  ;;  %v638_v52 = vld [vmem:[%s1260_s0 + $0x34] ss:$0 sm:$0xff] }
  0x34   :  { %633 = vst [vmem:[%s1261_s1 + $0x64] sm:$0x3] %v632_v50  ;;  %634 = vst [vmem:[%s1261_s1 + $0xe4] sm:$0x3] %v632_v50  ;;  %v641_v53 = vld [vmem:[%s1260_s0 + $0x35] ss:$0 sm:$0xff] }
  0x35   :  { %636 = vst [vmem:[%s1261_s1 + $0x66] sm:$0x3] %v635_v51  ;;  %637 = vst [vmem:[%s1261_s1 + $0xe6] sm:$0x3] %v635_v51  ;;  %v644_v54 = vld [vmem:[%s1260_s0 + $0x36] ss:$0 sm:$0xff] }
  0x36   :  { %639 = vst [vmem:[%s1261_s1 + $0x68] sm:$0x3] %v638_v52  ;;  %640 = vst [vmem:[%s1261_s1 + $0xe8] sm:$0x3] %v638_v52  ;;  %v647_v55 = vld [vmem:[%s1260_s0 + $0x37] ss:$0 sm:$0xff] }
  0x37   :  { %642 = vst [vmem:[%s1261_s1 + $0x6a] sm:$0x3] %v641_v53  ;;  %643 = vst [vmem:[%s1261_s1 + $0xea] sm:$0x3] %v641_v53  ;;  %v650_v56 = vld [vmem:[%s1260_s0 + $0x38] ss:$0 sm:$0xff] }
  0x38   :  { %645 = vst [vmem:[%s1261_s1 + $0x6c] sm:$0x3] %v644_v54  ;;  %646 = vst [vmem:[%s1261_s1 + $0xec] sm:$0x3] %v644_v54  ;;  %v653_v57 = vld [vmem:[%s1260_s0 + $0x39] ss:$0 sm:$0xff] }
  0x39   :  { %648 = vst [vmem:[%s1261_s1 + $0x6e] sm:$0x3] %v647_v55  ;;  %649 = vst [vmem:[%s1261_s1 + $0xee] sm:$0x3] %v647_v55  ;;  %v656_v58 = vld [vmem:[%s1260_s0 + $0x3a] ss:$0 sm:$0xff] }
  0x3a   :  { %651 = vst [vmem:[%s1261_s1 + $0x70] sm:$0x3] %v650_v56  ;;  %652 = vst [vmem:[%s1261_s1 + $0xf0] sm:$0x3] %v650_v56  ;;  %v659_v59 = vld [vmem:[%s1260_s0 + $0x3b] ss:$0 sm:$0xff] }
  0x3b   :  { %654 = vst [vmem:[%s1261_s1 + $0x72] sm:$0x3] %v653_v57  ;;  %655 = vst [vmem:[%s1261_s1 + $0xf2] sm:$0x3] %v653_v57  ;;  %v662_v60 = vld [vmem:[%s1260_s0 + $0x3c] ss:$0 sm:$0xff] }
  0x3c   :  { %657 = vst [vmem:[%s1261_s1 + $0x74] sm:$0x3] %v656_v58  ;;  %658 = vst [vmem:[%s1261_s1 + $0xf4] sm:$0x3] %v656_v58  ;;  %v665_v61 = vld [vmem:[%s1260_s0 + $0x3d] ss:$0 sm:$0xff] }
  0x3d   :  { %660 = vst [vmem:[%s1261_s1 + $0x76] sm:$0x3] %v659_v59  ;;  %661 = vst [vmem:[%s1261_s1 + $0xf6] sm:$0x3] %v659_v59  ;;  %v668_v62 = vld [vmem:[%s1260_s0 + $0x3e] ss:$0 sm:$0xff] }
  0x3e   :  { %663 = vst [vmem:[%s1261_s1 + $0x78] sm:$0x3] %v662_v60  ;;  %664 = vst [vmem:[%s1261_s1 + $0xf8] sm:$0x3] %v662_v60  ;;  %v671_v63 = vld [vmem:[%s1260_s0 + $0x3f] ss:$0 sm:$0xff] }
  0x3f   :  { %666 = vst [vmem:[%s1261_s1 + $0x7a] sm:$0x3] %v665_v61  ;;  %667 = vst [vmem:[%s1261_s1 + $0xfa] sm:$0x3] %v665_v61 }
  0x40   :  { %669 = vst [vmem:[%s1261_s1 + $0x7c] sm:$0x3] %v668_v62  ;;  %670 = vst [vmem:[%s1261_s1 + $0xfc] sm:$0x3] %v668_v62 }
  0x41   :  { %672 = vst [vmem:[%s1261_s1 + $0x7e] sm:$0x3] %v671_v63  ;;  %673 = vst [vmem:[%s1261_s1 + $0xfe] sm:$0x3] %v671_v63 }

// kernel: tile.27
= control target key start
LH: loop header
LB: loop body
LE: loop exit
PB: predicated region body
PF: predicated region fallthrough
CT: control target
= control target key end

     0   :  { %vm642_vm0 = vcmask 1047556   ;;  %s1240_s10 = smov 64   ;;  %vm644_vm1 = vcmask 523264   ;;  %vm789_vm2 = vcmask 1048064   ;;  %s1811_s0 = inlined_call_operand.vmem [shape: f32[2,64,2,64], index: 0, kind: input, shape index: {}]   ;;  %s1812_s1 = inlined_call_operand.vmem [shape: f32[1,128,128], index: 1, kind: output, shape index: {}]  }
   0x1   :  { %v1202_v0 = vld [vmem:[%s1811_s0 + $0xe] sm:$0x3]  ;;  %v1203_v1 = vld [vmem:[%s1811_s0 + $0xc] sm:$0x3]  ;;  %v1204_v2 = vld [vmem:[%s1811_s0 + $0xa] sm:$0x3] }
   0x2   :  { %608 = vst [vmem:[#allocation0 + $0x38] sm:$0x3] %v1202_v0  ;;  %613 = vst [vmem:[#allocation0 + $0x30] sm:$0x3] %v1203_v1  ;;  %v1205_v3 = vld [vmem:[%s1811_s0 + $0x8] sm:$0x3] }
   0x3   :  { %618 = vst [vmem:[#allocation0 + $0x28] sm:$0x3] %v1204_v2  ;;  %v1206_v4 = vld [vmem:[%s1811_s0 + $0x6] sm:$0x3]  ;;  %v1207_v5 = vld [vmem:[%s1811_s0 + $0x4] sm:$0x3] }
   0x4   :  { %623 = vst [vmem:[#allocation0 + $0x20] sm:$0x3] %v1205_v3  ;;  %628 = vst [vmem:[#allocation0 + $0x18] sm:$0x3] %v1206_v4  ;;  %v1208_v6 = vld [vmem:[%s1811_s0 + $0x2] sm:$0x3] }
   0x5   :  { %633 = vst [vmem:[#allocation0 + $0x10] sm:$0x3] %v1207_v5  ;;  %v638_v7 = vld [vmem:[%s1811_s0] sm:$0x3]  ;;  %637 = vst [vmem:[#allocation0 + $0x8] sm:$0x3] %v1208_v6 }
   0x6   :  { %639 = vst [vmem:[#allocation0] sm:$0x3] %v638_v7  ;;  %v1138_v8 = vld [vmem:[%s1811_s0 + $0x8e] sm:$0x3]  ;;  %v1139_v9 = vld [vmem:[%s1811_s0 + $0x8c] sm:$0x3] }
   0x7   :  { %v1140_v10 = vld [vmem:[%s1811_s0 + $0x8a] sm:$0x3]  ;;  %288 = vst [vmem:[#allocation0 + $0x238] sm:$0x3] %v1138_v8  ;;  %293 = vst [vmem:[#allocation0 + $0x230] sm:$0x3] %v1139_v9 }
   0x8   :  { %298 = vst [vmem:[#allocation0 + $0x228] sm:$0x3] %v1140_v10  ;;  %v1141_v11 = vld [vmem:[%s1811_s0 + $0x88] sm:$0x3]  ;;  %v1142_v12 = vld [vmem:[%s1811_s0 + $0x86] sm:$0x3] }
   0x9   :  { %v1143_v13 = vld [vmem:[%s1811_s0 + $0x84] sm:$0x3]  ;;  %303 = vst [vmem:[#allocation0 + $0x220] sm:$0x3] %v1141_v11  ;;  %308 = vst [vmem:[#allocation0 + $0x218] sm:$0x3] %v1142_v12 }
   0xa   :  { %313 = vst [vmem:[#allocation0 + $0x210] sm:$0x3] %v1143_v13  ;;  %v1144_v14 = vld [vmem:[%s1811_s0 + $0x82] sm:$0x3]  ;;  %v1145_v15 = vld [vmem:[%s1811_s0 + $0x80] sm:$0x3] }
   0xb   :  { %v1170_v16 = vld [vmem:[%s1811_s0 + $0x4e] sm:$0x3]  ;;  %318 = vst [vmem:[#allocation0 + $0x208] sm:$0x3] %v1144_v14  ;;  %323 = vst [vmem:[#allocation0 + $0x200] sm:$0x3] %v1145_v15 }
   0xc   :  { %448 = vst [vmem:[#allocation0 + $0x138] sm:$0x3] %v1170_v16  ;;  %v1171_v17 = vld [vmem:[%s1811_s0 + $0x4c] sm:$0x3]  ;;  %v1172_v18 = vld [vmem:[%s1811_s0 + $0x4a] sm:$0x3] }
   0xd   :  { %v1173_v19 = vld [vmem:[%s1811_s0 + $0x48] sm:$0x3]  ;;  %453 = vst [vmem:[#allocation0 + $0x130] sm:$0x3] %v1171_v17  ;;  %458 = vst [vmem:[#allocation0 + $0x128] sm:$0x3] %v1172_v18 }
   0xe   :  { %463 = vst [vmem:[#allocation0 + $0x120] sm:$0x3] %v1173_v19  ;;  %v1174_v20 = vld [vmem:[%s1811_s0 + $0x46] sm:$0x3]  ;;  %v1175_v21 = vld [vmem:[%s1811_s0 + $0x44] sm:$0x3] }
   0xf   :  { %v1176_v22 = vld [vmem:[%s1811_s0 + $0x42] sm:$0x3]  ;;  %468 = vst [vmem:[#allocation0 + $0x118] sm:$0x3] %v1174_v20  ;;  %473 = vst [vmem:[#allocation0 + $0x110] sm:$0x3] %v1175_v21 }
  0x10   :  { %478 = vst [vmem:[#allocation0 + $0x108] sm:$0x3] %v1176_v22  ;;  %v1177_v23 = vld [vmem:[%s1811_s0 + $0x40] sm:$0x3]  ;;  %v1106_v24 = vld [vmem:[%s1811_s0 + $0xce] sm:$0x3] }
  0x11   :  { %v1107_v25 = vld [vmem:[%s1811_s0 + $0xcc] sm:$0x3]  ;;  %v784_v26 = vld [vmem:[#allocation0 + $0x1] ss:$8 sm:$0xf0]  }
  0x12   :  { %483 = vst [vmem:[#allocation0 + $0x100] sm:$0x3] %v1177_v23  ;;  %128 = vst [vmem:[#allocation0 + $0x338] sm:$0x3] %v1106_v24  ;;  %v1108_v27 = vld [vmem:[%s1811_s0 + $0xca] sm:$0x3] }
  0x13   :  { %133 = vst [vmem:[#allocation0 + $0x330] sm:$0x3] %v1107_v25  ;;  %v782_v28 = vld [vmem:[#allocation0 + $0x1] ss:$8 sm:$0xf]  }
  0x14   :  { %138 = vst [vmem:[#allocation0 + $0x328] sm:$0x3] %v1108_v27  ;;  %v1109_v29 = vld [vmem:[%s1811_s0 + $0xc8] sm:$0x3]  ;;  %v786_v30 = vsel %vm642_vm0, %v784_v26, %v782_v28  ;;  %v1110_v31 = vld [vmem:[%s1811_s0 + $0xc6] sm:$0x3] }
  0x15   :  { %143 = vst [vmem:[#allocation0 + $0x320] sm:$0x3] %v1109_v29  ;;  %v1111_v32 = vld [vmem:[%s1811_s0 + $0xc4] sm:$0x3]  ;;  %v1112_v33 = vld [vmem:[%s1811_s0 + $0xc2] sm:$0x3]  ;;  %787 = vrot.lane.b32.xlu0 %v786_v30, %s1240_s10 }
  0x16   :  { %v805_v34 = vld [vmem:[#allocation0 + $0x201] ss:$8 sm:$0xf0]   ;;  %148 = vst [vmem:[#allocation0 + $0x318] sm:$0x3] %v1110_v31 }
  0x17   :  { %153 = vst [vmem:[#allocation0 + $0x310] sm:$0x3] %v1111_v32  ;;  %158 = vst [vmem:[#allocation0 + $0x308] sm:$0x3] %v1112_v33  ;;  %v1113_v35 = vld [vmem:[%s1811_s0 + $0xc0] sm:$0x3] }
  0x18   :  { %v803_v36 = vld [vmem:[#allocation0 + $0x201] ss:$8 sm:$0xf]   ;;  %163 = vst [vmem:[#allocation0 + $0x300] sm:$0x3] %v1113_v35 }
  0x19   :  { %v1194_v37 = vld [vmem:[%s1811_s0 + $0x1e] sm:$0x3]  ;;  %v807_v38 = vsel %vm642_vm0, %v805_v34, %v803_v36  ;;  %v794_v39 = vld [vmem:[#allocation0 + $0x101] ss:$8 sm:$0xf0]  }
  0x1a   :  { %568 = vst [vmem:[#allocation0 + $0x78] sm:$0x3] %v1194_v37  ;;  %v1195_v40 = vld [vmem:[%s1811_s0 + $0x1c] sm:$0x3]  ;;  %808 = vrot.lane.b32.xlu1 %v807_v38, %s1240_s10  ;;  %v1196_v41 = vld [vmem:[%s1811_s0 + $0x1a] sm:$0x3] }
  0x1b   :  { %573 = vst [vmem:[#allocation0 + $0x70] sm:$0x3] %v1195_v40  ;;  %v1197_v42 = vld [vmem:[%s1811_s0 + $0x18] sm:$0x3]  ;;  %v1198_v43 = vld [vmem:[%s1811_s0 + $0x16] sm:$0x3] }
  0x1c   :  { %v792_v44 = vld [vmem:[#allocation0 + $0x101] ss:$8 sm:$0xf]   ;;  %578 = vst [vmem:[#allocation0 + $0x68] sm:$0x3] %v1196_v41 }
  0x1d   :  { %583 = vst [vmem:[#allocation0 + $0x60] sm:$0x3] %v1197_v42  ;;  %588 = vst [vmem:[#allocation0 + $0x58] sm:$0x3] %v1198_v43  ;;  %v1199_v45 = vld [vmem:[%s1811_s0 + $0x14] sm:$0x3]  ;;  %v796_v46 = vsel %vm642_vm0, %v794_v39, %v792_v44 }
  0x1e   :  { %593 = vst [vmem:[#allocation0 + $0x50] sm:$0x3] %v1199_v45  ;;  %v1200_v47 = vld [vmem:[%s1811_s0 + $0x12] sm:$0x3]  ;;  %v1201_v48 = vld [vmem:[%s1811_s0 + $0x10] sm:$0x3]  ;;  %797 = vrot.lane.b32.xlu0 %v796_v46, %s1240_s10 }
  0x1f   :  { %v1162_v49 = vld [vmem:[%s1811_s0 + $0x5e] sm:$0x3]  ;;  %v816_v50 = vld [vmem:[#allocation0 + $0x301] ss:$8 sm:$0xf0]  }
  0x20   :  { %598 = vst [vmem:[#allocation0 + $0x48] sm:$0x3] %v1200_v47  ;;  %603 = vst [vmem:[#allocation0 + $0x40] sm:$0x3] %v1201_v48  ;;  %v1163_v51 = vld [vmem:[%s1811_s0 + $0x5c] sm:$0x3] }
  0x21   :  { %408 = vst [vmem:[#allocation0 + $0x178] sm:$0x3] %v1162_v49  ;;  %413 = vst [vmem:[#allocation0 + $0x170] sm:$0x3] %v1163_v51  ;;  %v1164_v52 = vld [vmem:[%s1811_s0 + $0x5a] sm:$0x3] }
  0x22   :  { %v1165_v53 = vld [vmem:[%s1811_s0 + $0x58] sm:$0x3]  ;;  %v1166_v54 = vld [vmem:[%s1811_s0 + $0x56] sm:$0x3]  ;;  %418 = vst [vmem:[#allocation0 + $0x168] sm:$0x3] %v1164_v52 }
  0x23   :  { %v814_v55 = vld [vmem:[#allocation0 + $0x301] ss:$8 sm:$0xf]   ;;  %423 = vst [vmem:[#allocation0 + $0x160] sm:$0x3] %v1165_v53 }
  0x24   :  { %428 = vst [vmem:[#allocation0 + $0x158] sm:$0x3] %v1166_v54  ;;  %v1167_v56 = vld [vmem:[%s1811_s0 + $0x54] sm:$0x3]  ;;  %v818_v57 = vsel %vm642_vm0, %v816_v50, %v814_v55  ;;  %v1168_v58 = vld [vmem:[%s1811_s0 + $0x52] sm:$0x3] }
  0x25   :  { %433 = vst [vmem:[#allocation0 + $0x150] sm:$0x3] %v1167_v56  ;;  %v1169_v59 = vld [vmem:[%s1811_s0 + $0x50] sm:$0x3]  ;;  %v1130_v60 = vld [vmem:[%s1811_s0 + $0x9e] sm:$0x3]  ;;  %819 = vrot.lane.b32.xlu1 %v818_v57, %s1240_s10 }
  0x26   :  { %438 = vst [vmem:[#allocation0 + $0x148] sm:$0x3] %v1168_v58  ;;  %443 = vst [vmem:[#allocation0 + $0x140] sm:$0x3] %v1169_v59  ;;  %v1131_v61 = vld [vmem:[%s1811_s0 + $0x9c] sm:$0x3] }
  0x27   :  { %248 = vst [vmem:[#allocation0 + $0x278] sm:$0x3] %v1130_v60  ;;  %v1132_v62 = vld [vmem:[%s1811_s0 + $0x9a] sm:$0x3]  ;;  %v1133_v63 = vld [vmem:[%s1811_s0 + $0x98] sm:$0x3] }
  0x28   :  { %v827_v0 = vld [vmem:[#allocation0 + $0x41] ss:$8 sm:$0xf0]   ;;  %253 = vst [vmem:[#allocation0 + $0x270] sm:$0x3] %v1131_v61 }
  0x29   :  { %258 = vst [vmem:[#allocation0 + $0x268] sm:$0x3] %v1132_v62  ;;  %263 = vst [vmem:[#allocation0 + $0x260] sm:$0x3] %v1133_v63  ;;  %v1134_v1 = vld [vmem:[%s1811_s0 + $0x96] sm:$0x3] }
  0x2a   :  { %268 = vst [vmem:[#allocation0 + $0x258] sm:$0x3] %v1134_v1  ;;  %v1135_v2 = vld [vmem:[%s1811_s0 + $0x94] sm:$0x3]  ;;  %v1136_v3 = vld [vmem:[%s1811_s0 + $0x92] sm:$0x3] }
  0x2b   :  { %v1137_v4 = vld [vmem:[%s1811_s0 + $0x90] sm:$0x3]  ;;  %273 = vst [vmem:[#allocation0 + $0x250] sm:$0x3] %v1135_v2  ;;  %278 = vst [vmem:[#allocation0 + $0x248] sm:$0x3] %v1136_v3 }
  0x2c   :  { %v825_v5 = vld [vmem:[#allocation0 + $0x41] ss:$8 sm:$0xf]   ;;  %283 = vst [vmem:[#allocation0 + $0x240] sm:$0x3] %v1137_v4 }
  0x2d   :  { %v1098_v6 = vld [vmem:[%s1811_s0 + $0xde] sm:$0x3]  ;;  %v829_v7 = vsel %vm642_vm0, %v827_v0, %v825_v5  ;;  %v1099_v8 = vld [vmem:[%s1811_s0 + $0xdc] sm:$0x3]  ;;  %v1100_v9 = vld [vmem:[%s1811_s0 + $0xda] sm:$0x3] }
  0x2e   :  { %88 = vst [vmem:[#allocation0 + $0x378] sm:$0x3] %v1098_v6  ;;  %v1101_v10 = vld [vmem:[%s1811_s0 + $0xd8] sm:$0x3]  ;;  %830 = vrot.lane.b32.xlu0 %v829_v7, %s1240_s10  ;;  %93 = vst [vmem:[#allocation0 + $0x370] sm:$0x3] %v1099_v8 }
  0x2f   :  { %v838_v11 = vld [vmem:[#allocation0 + $0x141] ss:$8 sm:$0xf0]   ;;  %98 = vst [vmem:[#allocation0 + $0x368] sm:$0x3] %v1100_v9 }
  0x30   :  { %103 = vst [vmem:[#allocation0 + $0x360] sm:$0x3] %v1101_v10  ;;  %v1102_v12 = vld [vmem:[%s1811_s0 + $0xd6] sm:$0x3]  ;;  %v1103_v13 = vld [vmem:[%s1811_s0 + $0xd4] sm:$0x3] }
  0x31   :  { %108 = vst [vmem:[#allocation0 + $0x358] sm:$0x3] %v1102_v12  ;;  %v1104_v14 = vld [vmem:[%s1811_s0 + $0xd2] sm:$0x3]  ;;  %v1105_v15 = vld [vmem:[%s1811_s0 + $0xd0] sm:$0x3] }
  0x32   :  { %v836_v16 = vld [vmem:[#allocation0 + $0x141] ss:$8 sm:$0xf]   ;;  %113 = vst [vmem:[#allocation0 + $0x350] sm:$0x3] %v1103_v13 }
  0x33   :  { %118 = vst [vmem:[#allocation0 + $0x348] sm:$0x3] %v1104_v14  ;;  %123 = vst [vmem:[#allocation0 + $0x340] sm:$0x3] %v1105_v15  ;;  %v1186_v17 = vld [vmem:[%s1811_s0 + $0x2e] sm:$0x3]  ;;  %v840_v18 = vsel %vm642_vm0, %v838_v11, %v836_v16 }
  0x34   :  { %v849_v19 = vld [vmem:[#allocation0 + $0x241] ss:$8 sm:$0xf0]   ;;  %528 = vst [vmem:[#allocation0 + $0xb8] sm:$0x3] %v1186_v17  ;;  %841 = vrot.lane.b32.xlu1 %v840_v18, %s1240_s10 }
  0x35   :  { %v1187_v20 = vld [vmem:[%s1811_s0 + $0x2c] sm:$0x3]  ;;  %v1188_v21 = vld [vmem:[%s1811_s0 + $0x2a] sm:$0x3]  ;;  %v1189_v22 = vld [vmem:[%s1811_s0 + $0x28] sm:$0x3] }
  0x36   :  { %533 = vst [vmem:[#allocation0 + $0xb0] sm:$0x3] %v1187_v20  ;;  %v1190_v23 = vld [vmem:[%s1811_s0 + $0x26] sm:$0x3]  ;;  %538 = vst [vmem:[#allocation0 + $0xa8] sm:$0x3] %v1188_v21 }
  0x37   :  { %v847_v24 = vld [vmem:[#allocation0 + $0x241] ss:$8 sm:$0xf]   ;;  %543 = vst [vmem:[#allocation0 + $0xa0] sm:$0x3] %v1189_v22 }
  0x38   :  { %548 = vst [vmem:[#allocation0 + $0x98] sm:$0x3] %v1190_v23  ;;  %v1191_v25 = vld [vmem:[%s1811_s0 + $0x24] sm:$0x3]  ;;  %v851_v26 = vsel %vm642_vm0, %v849_v19, %v847_v24  ;;  %v1192_v27 = vld [vmem:[%s1811_s0 + $0x22] sm:$0x3] }
  0x39   :  { %553 = vst [vmem:[#allocation0 + $0x90] sm:$0x3] %v1191_v25  ;;  %v1193_v28 = vld [vmem:[%s1811_s0 + $0x20] sm:$0x3]  ;;  %v1154_v29 = vld [vmem:[%s1811_s0 + $0x6e] sm:$0x3]  ;;  %852 = vrot.lane.b32.xlu0 %v851_v26, %s1240_s10 }
  0x3a   :  { %v860_v30 = vld [vmem:[#allocation0 + $0x341] ss:$8 sm:$0xf0]   ;;  %558 = vst [vmem:[#allocation0 + $0x88] sm:$0x3] %v1192_v27 }
  0x3b   :  { %563 = vst [vmem:[#allocation0 + $0x80] sm:$0x3] %v1193_v28  ;;  %368 = vst [vmem:[#allocation0 + $0x1b8] sm:$0x3] %v1154_v29  ;;  %v1155_v31 = vld [vmem:[%s1811_s0 + $0x6c] sm:$0x3] }
  0x3c   :  { %373 = vst [vmem:[#allocation0 + $0x1b0] sm:$0x3] %v1155_v31  ;;  %v1156_v32 = vld [vmem:[%s1811_s0 + $0x6a] sm:$0x3]  ;;  %v1157_v33 = vld [vmem:[%s1811_s0 + $0x68] sm:$0x3] }
  0x3d   :  { %v1158_v34 = vld [vmem:[%s1811_s0 + $0x66] sm:$0x3]  ;;  %v858_v35 = vld [vmem:[#allocation0 + $0x341] ss:$8 sm:$0xf]  }
  0x3e   :  { %378 = vst [vmem:[#allocation0 + $0x1a8] sm:$0x3] %v1156_v32  ;;  %383 = vst [vmem:[#allocation0 + $0x1a0] sm:$0x3] %v1157_v33  ;;  %v1159_v36 = vld [vmem:[%s1811_s0 + $0x64] sm:$0x3]  ;;  %v862_v37 = vsel %vm642_vm0, %v860_v30, %v858_v35 }
  0x3f   :  { %388 = vst [vmem:[#allocation0 + $0x198] sm:$0x3] %v1158_v34  ;;  %393 = vst [vmem:[#allocation0 + $0x190] sm:$0x3] %v1159_v36  ;;  %v1160_v38 = vld [vmem:[%s1811_s0 + $0x62] sm:$0x3]  ;;  %863 = vrot.lane.b32.xlu1 %v862_v37, %s1240_s10 }
  0x40   :  { %v1161_v39 = vld [vmem:[%s1811_s0 + $0x60] sm:$0x3]  ;;  %v1122_v40 = vld [vmem:[%s1811_s0 + $0xae] sm:$0x3]  ;;  %398 = vst [vmem:[#allocation0 + $0x188] sm:$0x3] %v1160_v38 }
  0x41   :  { %403 = vst [vmem:[#allocation0 + $0x180] sm:$0x3] %v1161_v39  ;;  %208 = vst [vmem:[#allocation0 + $0x2b8] sm:$0x3] %v1122_v40  ;;  %v1123_v41 = vld [vmem:[%s1811_s0 + $0xac] sm:$0x3] }
  0x42   :  { %v1124_v42 = vld [vmem:[%s1811_s0 + $0xaa] sm:$0x3]  ;;  %v1125_v43 = vld [vmem:[%s1811_s0 + $0xa8] sm:$0x3]  ;;  %213 = vst [vmem:[#allocation0 + $0x2b0] sm:$0x3] %v1123_v41 }
  0x43   :  { %v871_v44 = vld [vmem:[#allocation0 + $0x81] ss:$8 sm:$0xf0]   ;;  %218 = vst [vmem:[#allocation0 + $0x2a8] sm:$0x3] %v1124_v42 }
  0x44   :  { %223 = vst [vmem:[#allocation0 + $0x2a0] sm:$0x3] %v1125_v43  ;;  %v1126_v45 = vld [vmem:[%s1811_s0 + $0xa6] sm:$0x3]  ;;  %v1127_v46 = vld [vmem:[%s1811_s0 + $0xa4] sm:$0x3] }
  0x45   :  { %228 = vst [vmem:[#allocation0 + $0x298] sm:$0x3] %v1126_v45  ;;  %v1128_v47 = vld [vmem:[%s1811_s0 + $0xa2] sm:$0x3]  ;;  %v1129_v48 = vld [vmem:[%s1811_s0 + $0xa0] sm:$0x3] }
  0x46   :  { %v869_v49 = vld [vmem:[#allocation0 + $0x81] ss:$8 sm:$0xf]   ;;  %233 = vst [vmem:[#allocation0 + $0x290] sm:$0x3] %v1127_v46 }
  0x47   :  { %238 = vst [vmem:[#allocation0 + $0x288] sm:$0x3] %v1128_v47  ;;  %243 = vst [vmem:[#allocation0 + $0x280] sm:$0x3] %v1129_v48  ;;  %v1090_v50 = vld [vmem:[%s1811_s0 + $0xee] sm:$0x3]  ;;  %v873_v51 = vsel %vm642_vm0, %v871_v44, %v869_v49 }
  0x48   :  { %48 = vst [vmem:[#allocation0 + $0x3b8] sm:$0x3] %v1090_v50  ;;  %v1091_v52 = vld [vmem:[%s1811_s0 + $0xec] sm:$0x3]  ;;  %v1092_v53 = vld [vmem:[%s1811_s0 + $0xea] sm:$0x3]  ;;  %874 = vrot.lane.b32.xlu0 %v873_v51, %s1240_s10 }
  0x49   :  { %v1093_v54 = vld [vmem:[%s1811_s0 + $0xe8] sm:$0x3]  ;;  %53 = vst [vmem:[#allocation0 + $0x3b0] sm:$0x3] %v1091_v52  ;;  %58 = vst [vmem:[#allocation0 + $0x3a8] sm:$0x3] %v1092_v53 }
  0x4a   :  { %v882_v55 = vld [vmem:[#allocation0 + $0x181] ss:$8 sm:$0xf0]   ;;  %63 = vst [vmem:[#allocation0 + $0x3a0] sm:$0x3] %v1093_v54 }
  0x4b   :  { %v1094_v56 = vld [vmem:[%s1811_s0 + $0xe6] sm:$0x3]  ;;  %v1095_v57 = vld [vmem:[%s1811_s0 + $0xe4] sm:$0x3]  ;;  %v1096_v58 = vld [vmem:[%s1811_s0 + $0xe2] sm:$0x3] }
  0x4c   :  { %68 = vst [vmem:[#allocation0 + $0x398] sm:$0x3] %v1094_v56  ;;  %v1097_v59 = vld [vmem:[%s1811_s0 + $0xe0] sm:$0x3]  ;;  %73 = vst [vmem:[#allocation0 + $0x390] sm:$0x3] %v1095_v57 }
  0x4d   :  { %v880_v60 = vld [vmem:[#allocation0 + $0x181] ss:$8 sm:$0xf]   ;;  %78 = vst [vmem:[#allocation0 + $0x388] sm:$0x3] %v1096_v58 }
  0x4e   :  { %83 = vst [vmem:[#allocation0 + $0x380] sm:$0x3] %v1097_v59  ;;  %v1178_v61 = vld [vmem:[%s1811_s0 + $0x3e] sm:$0x3]  ;;  %v884_v62 = vsel %vm642_vm0, %v882_v55, %v880_v60  ;;  %v1179_v0 = vld [vmem:[%s1811_s0 + $0x3c] sm:$0x3] }
  0x4f   :  { %v893_v63 = vld [vmem:[#allocation0 + $0x281] ss:$8 sm:$0xf0]   ;;  %488 = vst [vmem:[#allocation0 + $0xf8] sm:$0x3] %v1178_v61  ;;  %885 = vrot.lane.b32.xlu1 %v884_v62, %s1240_s10 }
  0x50   :  { %493 = vst [vmem:[#allocation0 + $0xf0] sm:$0x3] %v1179_v0  ;;  %v1180_v1 = vld [vmem:[%s1811_s0 + $0x3a] sm:$0x3]  ;;  %v1181_v2 = vld [vmem:[%s1811_s0 + $0x38] sm:$0x3] }
  0x51   :  { %v1182_v3 = vld [vmem:[%s1811_s0 + $0x36] sm:$0x3]  ;;  %v891_v4 = vld [vmem:[#allocation0 + $0x281] ss:$8 sm:$0xf]  }
  0x52   :  { %498 = vst [vmem:[#allocation0 + $0xe8] sm:$0x3] %v1180_v1  ;;  %503 = vst [vmem:[#allocation0 + $0xe0] sm:$0x3] %v1181_v2  ;;  %v1183_v5 = vld [vmem:[%s1811_s0 + $0x34] sm:$0x3]  ;;  %v895_v6 = vsel %vm642_vm0, %v893_v63, %v891_v4 }
  0x53   :  { %508 = vst [vmem:[#allocation0 + $0xd8] sm:$0x3] %v1182_v3  ;;  %513 = vst [vmem:[#allocation0 + $0xd0] sm:$0x3] %v1183_v5  ;;  %v1184_v7 = vld [vmem:[%s1811_s0 + $0x32] sm:$0x3]  ;;  %896 = vrot.lane.b32.xlu0 %v895_v6, %s1240_s10 }
  0x54   :  { %v1185_v8 = vld [vmem:[%s1811_s0 + $0x30] sm:$0x3]  ;;  %v1146_v9 = vld [vmem:[%s1811_s0 + $0x7e] sm:$0x3]  ;;  %518 = vst [vmem:[#allocation0 + $0xc8] sm:$0x3] %v1184_v7 }
  0x55   :  { %v904_v10 = vld [vmem:[#allocation0 + $0x381] ss:$8 sm:$0xf0]   ;;  %523 = vst [vmem:[#allocation0 + $0xc0] sm:$0x3] %v1185_v8 }
  0x56   :  { %328 = vst [vmem:[#allocation0 + $0x1f8] sm:$0x3] %v1146_v9  ;;  %v1147_v11 = vld [vmem:[%s1811_s0 + $0x7c] sm:$0x3]  ;;  %v1148_v12 = vld [vmem:[%s1811_s0 + $0x7a] sm:$0x3] }
  0x57   :  { %333 = vst [vmem:[#allocation0 + $0x1f0] sm:$0x3] %v1147_v11  ;;  %v1149_v13 = vld [vmem:[%s1811_s0 + $0x78] sm:$0x3]  ;;  %v1150_v14 = vld [vmem:[%s1811_s0 + $0x76] sm:$0x3] }
  0x58   :  { %v902_v15 = vld [vmem:[#allocation0 + $0x381] ss:$8 sm:$0xf]   ;;  %338 = vst [vmem:[#allocation0 + $0x1e8] sm:$0x3] %v1148_v12 }
  0x59   :  { %343 = vst [vmem:[#allocation0 + $0x1e0] sm:$0x3] %v1149_v13  ;;  %348 = vst [vmem:[#allocation0 + $0x1d8] sm:$0x3] %v1150_v14  ;;  %v1151_v16 = vld [vmem:[%s1811_s0 + $0x74] sm:$0x3]  ;;  %v906_v17 = vsel %vm642_vm0, %v904_v10, %v902_v15 }
  0x5a   :  { %353 = vst [vmem:[#allocation0 + $0x1d0] sm:$0x3] %v1151_v16  ;;  %v1152_v18 = vld [vmem:[%s1811_s0 + $0x72] sm:$0x3]  ;;  %v1153_v19 = vld [vmem:[%s1811_s0 + $0x70] sm:$0x3]  ;;  %907 = vrot.lane.b32.xlu1 %v906_v17, %s1240_s10 }
  0x5b   :  { %v1114_v20 = vld [vmem:[%s1811_s0 + $0xbe] sm:$0x3]  ;;  %358 = vst [vmem:[#allocation0 + $0x1c8] sm:$0x3] %v1152_v18  ;;  %363 = vst [vmem:[#allocation0 + $0x1c0] sm:$0x3] %v1153_v19 }
  0x5c   :  { %168 = vst [vmem:[#allocation0 + $0x2f8] sm:$0x3] %v1114_v20  ;;  %v1115_v21 = vld [vmem:[%s1811_s0 + $0xbc] sm:$0x3]  ;;  %v1116_v22 = vld [vmem:[%s1811_s0 + $0xba] sm:$0x3] }
  0x5d   :  { %v1117_v23 = vld [vmem:[%s1811_s0 + $0xb8] sm:$0x3]  ;;  %173 = vst [vmem:[#allocation0 + $0x2f0] sm:$0x3] %v1115_v21  ;;  %178 = vst [vmem:[#allocation0 + $0x2e8] sm:$0x3] %v1116_v22 }
  0x5e   :  { %v915_v24 = vld [vmem:[#allocation0 + $0xc1] ss:$8 sm:$0xf0]   ;;  %183 = vst [vmem:[#allocation0 + $0x2e0] sm:$0x3] %v1117_v23 }
  0x5f   :  { %v1118_v25 = vld [vmem:[%s1811_s0 + $0xb6] sm:$0x3]  ;;  %v1119_v26 = vld [vmem:[%s1811_s0 + $0xb4] sm:$0x3]  ;;  %v1120_v27 = vld [vmem:[%s1811_s0 + $0xb2] sm:$0x3] }
  0x60   :  { %188 = vst [vmem:[#allocation0 + $0x2d8] sm:$0x3] %v1118_v25  ;;  %v1121_v28 = vld [vmem:[%s1811_s0 + $0xb0] sm:$0x3]  ;;  %193 = vst [vmem:[#allocation0 + $0x2d0] sm:$0x3] %v1119_v26 }
  0x61   :  { %v913_v29 = vld [vmem:[#allocation0 + $0xc1] ss:$8 sm:$0xf]   ;;  %198 = vst [vmem:[#allocation0 + $0x2c8] sm:$0x3] %v1120_v27 }
  0x62   :  { %203 = vst [vmem:[#allocation0 + $0x2c0] sm:$0x3] %v1121_v28  ;;  %v1082_v30 = vld [vmem:[%s1811_s0 + $0xfe] sm:$0x3]  ;;  %v917_v31 = vsel %vm642_vm0, %v915_v24, %v913_v29  ;;  %v1083_v32 = vld [vmem:[%s1811_s0 + $0xfc] sm:$0x3] }
  0x63   :  { %8 = vst [vmem:[#allocation0 + $0x3f8] sm:$0x3] %v1082_v30  ;;  %v1084_v33 = vld [vmem:[%s1811_s0 + $0xfa] sm:$0x3]  ;;  %v1085_v34 = vld [vmem:[%s1811_s0 + $0xf8] sm:$0x3]  ;;  %918 = vrot.lane.b32.xlu0 %v917_v31, %s1240_s10 }
  0x64   :  { %v926_v35 = vld [vmem:[#allocation0 + $0x1c1] ss:$8 sm:$0xf0]   ;;  %13 = vst [vmem:[#allocation0 + $0x3f0] sm:$0x3] %v1083_v32 }
  0x65   :  { %18 = vst [vmem:[#allocation0 + $0x3e8] sm:$0x3] %v1084_v33  ;;  %23 = vst [vmem:[#allocation0 + $0x3e0] sm:$0x3] %v1085_v34  ;;  %v1086_v36 = vld [vmem:[%s1811_s0 + $0xf6] sm:$0x3] }
  0x66   :  { %28 = vst [vmem:[#allocation0 + $0x3d8] sm:$0x3] %v1086_v36  ;;  %v1087_v37 = vld [vmem:[%s1811_s0 + $0xf4] sm:$0x3]  ;;  %v1088_v38 = vld [vmem:[%s1811_s0 + $0xf2] sm:$0x3] }
  0x67   :  { %v1089_v39 = vld [vmem:[%s1811_s0 + $0xf0] sm:$0x3]  ;;  %33 = vst [vmem:[#allocation0 + $0x3d0] sm:$0x3] %v1087_v37  ;;  %38 = vst [vmem:[#allocation0 + $0x3c8] sm:$0x3] %v1088_v38 }
  0x68   :  { %v924_v40 = vld [vmem:[#allocation0 + $0x1c1] ss:$8 sm:$0xf]   ;;  %43 = vst [vmem:[#allocation0 + $0x3c0] sm:$0x3] %v1089_v39 }
  0x69   :  { %v640_v41 = vld [vmem:[#allocation0] ss:$8 sm:$0xf]   ;;  %v928_v42 = vsel %vm642_vm0, %v926_v35, %v924_v40  ;;  %v937_v43 = vld [vmem:[#allocation0 + $0x2c1] ss:$8 sm:$0xf0]  }
  0x6a   :  { %v641_v44 = vld [vmem:[#allocation0] ss:$8 sm:$0xf0]   ;;  %929 = vrot.lane.b32.xlu1 %v928_v42, %s1240_s10  ;;  %v935_v48 = vld [vmem:[#allocation0 + $0x2c1] ss:$8 sm:$0xf]  }
  0x6b   :  { %v643_v45 = vsel %vm642_vm0, %v641_v44, %v640_v41  ;;  %v710_v46 = vld [vmem:[#allocation0 + $0x200] ss:$8 sm:$0xf]   ;;  %v939_v51 = vsel %vm642_vm0, %v937_v43, %v935_v48 }
  0x6c   :  { %v712_v47 = vld [vmem:[#allocation0 + $0x200] ss:$8 sm:$0xf0]   ;;  %645 = vst.msk [vmem:[%s1812_s1] sm:$0xff] %vm644_vm1, %v643_v45   ;;  %940 = vrot.lane.b32.xlu0 %v939_v51, %s1240_s10 }
  0x6d   :  { %v714_v49 = vsel %vm642_vm0, %v712_v47, %v710_v46  ;;  %v674_v50 = vld [vmem:[#allocation0 + $0x100] ss:$8 sm:$0xf]   ;;  %v948_v54 = vld [vmem:[#allocation0 + $0x3c1] ss:$8 sm:$0xf0]  }
  0x6e   :  { %1216 = vst.msk [vmem:[%s1812_s1 + $0x40] sm:$0xff] %vm644_vm1, %v714_v49   ;;  %v676_v52 = vld [vmem:[#allocation0 + $0x100] ss:$8 sm:$0xf0]  }
  0x6f   :  { %v746_v53 = vld [vmem:[#allocation0 + $0x300] ss:$8 sm:$0xf]   ;;  %v678_v55 = vsel %vm642_vm0, %v676_v52, %v674_v50  ;;  %v946_v60 = vld [vmem:[#allocation0 + $0x3c1] ss:$8 sm:$0xf]  }
  0x70   :  { %v748_v56 = vld [vmem:[#allocation0 + $0x300] ss:$8 sm:$0xf0]   ;;  %1212 = vst.msk [vmem:[%s1812_s1 + $0x20] sm:$0xff] %vm644_vm1, %v678_v55   ;;  %v950_v63 = vsel %vm642_vm0, %v948_v54, %v946_v60 }
  0x71   :  { %v750_v57 = vsel %vm642_vm0, %v748_v56, %v746_v53  ;;  %v647_v58 = vld [vmem:[#allocation0 + $0x40] ss:$8 sm:$0xf]   ;;  %951 = vrot.lane.b32.xlu1 %v950_v63, %s1240_s10 }
  0x72   :  { %v649_v59 = vld [vmem:[#allocation0 + $0x40] ss:$8 sm:$0xf0]   ;;  %1220 = vst.msk [vmem:[%s1812_s1 + $0x60] sm:$0xff] %vm644_vm1, %v750_v57  }
  0x73   :  { %v651_v61 = vsel %vm642_vm0, %v649_v59, %v647_v58  ;;  %v683_v62 = vld [vmem:[#allocation0 + $0x140] ss:$8 sm:$0xf]  }
  0x74   :  { %1209 = vst.msk [vmem:[%s1812_s1 + $0x8] sm:$0xff] %vm644_vm1, %v651_v61   ;;  %v685_v0 = vld [vmem:[#allocation0 + $0x140] ss:$8 sm:$0xf0]  }
  0x75   :  { %v719_v1 = vld [vmem:[#allocation0 + $0x240] ss:$8 sm:$0xf]   ;;  %v687_v2 = vsel %vm642_vm0, %v685_v0, %v683_v62 }
  0x76   :  { %v721_v3 = vld [vmem:[#allocation0 + $0x240] ss:$8 sm:$0xf0]   ;;  %1213 = vst.msk [vmem:[%s1812_s1 + $0x28] sm:$0xff] %vm644_vm1, %v687_v2  }
  0x77   :  { %v755_v4 = vld [vmem:[#allocation0 + $0x340] ss:$8 sm:$0xf]   ;;  %v723_v5 = vsel %vm642_vm0, %v721_v3, %v719_v1 }
  0x78   :  { %v757_v6 = vld [vmem:[#allocation0 + $0x340] ss:$8 sm:$0xf0]   ;;  %1217 = vst.msk [vmem:[%s1812_s1 + $0x48] sm:$0xff] %vm644_vm1, %v723_v5  }
  0x79   :  { %v656_v7 = vld [vmem:[#allocation0 + $0x80] ss:$8 sm:$0xf]   ;;  %v759_v8 = vsel %vm642_vm0, %v757_v6, %v755_v4 }
  0x7a   :  { %v658_v9 = vld [vmem:[#allocation0 + $0x80] ss:$8 sm:$0xf0]   ;;  %1221 = vst.msk [vmem:[%s1812_s1 + $0x68] sm:$0xff] %vm644_vm1, %v759_v8  }
  0x7b   :  { %v692_v10 = vld [vmem:[#allocation0 + $0x180] ss:$8 sm:$0xf]   ;;  %v660_v11 = vsel %vm642_vm0, %v658_v9, %v656_v7 }
  0x7c   :  { %v694_v12 = vld [vmem:[#allocation0 + $0x180] ss:$8 sm:$0xf0]   ;;  %1210 = vst.msk [vmem:[%s1812_s1 + $0x10] sm:$0xff] %vm644_vm1, %v660_v11  }
  0x7d   :  { %v728_v13 = vld [vmem:[#allocation0 + $0x280] ss:$8 sm:$0xf]   ;;  %v696_v14 = vsel %vm642_vm0, %v694_v12, %v692_v10 }
  0x7e   :  { %v730_v15 = vld [vmem:[#allocation0 + $0x280] ss:$8 sm:$0xf0]   ;;  %1214 = vst.msk [vmem:[%s1812_s1 + $0x30] sm:$0xff] %vm644_vm1, %v696_v14  }
  0x7f   :  { %v764_v16 = vld [vmem:[#allocation0 + $0x380] ss:$8 sm:$0xf]   ;;  %v732_v17 = vsel %vm642_vm0, %v730_v15, %v728_v13 }
  0x80   :  { %v766_v18 = vld [vmem:[#allocation0 + $0x380] ss:$8 sm:$0xf0]   ;;  %1218 = vst.msk [vmem:[%s1812_s1 + $0x50] sm:$0xff] %vm644_vm1, %v732_v17  }
  0x81   :  { %v665_v19 = vld [vmem:[#allocation0 + $0xc0] ss:$8 sm:$0xf]   ;;  %v768_v20 = vsel %vm642_vm0, %v766_v18, %v764_v16 }
  0x82   :  { %v667_v21 = vld [vmem:[#allocation0 + $0xc0] ss:$8 sm:$0xf0]   ;;  %1222 = vst.msk [vmem:[%s1812_s1 + $0x70] sm:$0xff] %vm644_vm1, %v768_v20  }
  0x83   :  { %v701_v22 = vld [vmem:[#allocation0 + $0x1c0] ss:$8 sm:$0xf]   ;;  %v669_v23 = vsel %vm642_vm0, %v667_v21, %v665_v19 }
  0x84   :  { %v703_v24 = vld [vmem:[#allocation0 + $0x1c0] ss:$8 sm:$0xf0]   ;;  %1211 = vst.msk [vmem:[%s1812_s1 + $0x18] sm:$0xff] %vm644_vm1, %v669_v23  }
  0x85   :  { %v737_v25 = vld [vmem:[#allocation0 + $0x2c0] ss:$8 sm:$0xf]   ;;  %v705_v26 = vsel %vm642_vm0, %v703_v24, %v701_v22 }
  0x86   :  { %v739_v27 = vld [vmem:[#allocation0 + $0x2c0] ss:$8 sm:$0xf0]   ;;  %1215 = vst.msk [vmem:[%s1812_s1 + $0x38] sm:$0xff] %vm644_vm1, %v705_v26  }
  0x87   :  { %v773_v28 = vld [vmem:[#allocation0 + $0x3c0] ss:$8 sm:$0xf]   ;;  %v741_v29 = vsel %vm642_vm0, %v739_v27, %v737_v25  ;;  %v788_v32 = vpop.permute.xlu0 %787  }
  0x88   :  { %v775_v30 = vld [vmem:[#allocation0 + $0x3c0] ss:$8 sm:$0xf0]   ;;  %1219 = vst.msk [vmem:[%s1812_s1 + $0x58] sm:$0xff] %vm644_vm1, %v741_v29  }
  0x89   :  { %v777_v31 = vsel %vm642_vm0, %v775_v30, %v773_v28  ;;  %790 = vst.msk [vmem:[%s1812_s1] sm:$0xff] %vm789_vm2, %v788_v32  }
  0x8a   :  { %1223 = vst.msk [vmem:[%s1812_s1 + $0x78] sm:$0xff] %vm644_vm1, %v777_v31  }
  0x8c   :  { %v809_v33 = vpop.permute.xlu1 %808  }
  0x8d   :  { %1225 = vst.msk [vmem:[%s1812_s1 + $0x40] sm:$0xff] %vm789_vm2, %v809_v33  }
  0x90   :  { %v798_v34 = vpop.permute.xlu0 %797  }
  0x91   :  { %1224 = vst.msk [vmem:[%s1812_s1 + $0x20] sm:$0xff] %vm789_vm2, %v798_v34  }
  0x97   :  { %v820_v35 = vpop.permute.xlu1 %819  }
  0x98   :  { %1226 = vst.msk [vmem:[%s1812_s1 + $0x60] sm:$0xff] %vm789_vm2, %v820_v35  }
  0xa0   :  { %v831_v36 = vpop.permute.xlu0 %830  }
  0xa1   :  { %1227 = vst.msk [vmem:[%s1812_s1 + $0x8] sm:$0xff] %vm789_vm2, %v831_v36  }
  0xa6   :  { %v842_v37 = vpop.permute.xlu1 %841  }
  0xa7   :  { %1228 = vst.msk [vmem:[%s1812_s1 + $0x28] sm:$0xff] %vm789_vm2, %v842_v37  }
  0xab   :  { %v853_v38 = vpop.permute.xlu0 %852  }
  0xac   :  { %1229 = vst.msk [vmem:[%s1812_s1 + $0x48] sm:$0xff] %vm789_vm2, %v853_v38  }
  0xb1   :  { %v864_v39 = vpop.permute.xlu1 %863  }
  0xb2   :  { %1230 = vst.msk [vmem:[%s1812_s1 + $0x68] sm:$0xff] %vm789_vm2, %v864_v39  }
  0xba   :  { %v875_v40 = vpop.permute.xlu0 %874  }
  0xbb   :  { %1231 = vst.msk [vmem:[%s1812_s1 + $0x10] sm:$0xff] %vm789_vm2, %v875_v40  }
  0xc1   :  { %v886_v41 = vpop.permute.xlu1 %885  }
  0xc2   :  { %1232 = vst.msk [vmem:[%s1812_s1 + $0x30] sm:$0xff] %vm789_vm2, %v886_v41  }
  0xc5   :  { %v897_v42 = vpop.permute.xlu0 %896  }
  0xc6   :  { %1233 = vst.msk [vmem:[%s1812_s1 + $0x50] sm:$0xff] %vm789_vm2, %v897_v42  }
  0xcc   :  { %v908_v43 = vpop.permute.xlu1 %907  }
  0xcd   :  { %1234 = vst.msk [vmem:[%s1812_s1 + $0x70] sm:$0xff] %vm789_vm2, %v908_v43  }
  0xd5   :  { %v919_v44 = vpop.permute.xlu0 %918  }
  0xd6   :  { %1235 = vst.msk [vmem:[%s1812_s1 + $0x18] sm:$0xff] %vm789_vm2, %v919_v44  }
  0xdc   :  { %v930_v45 = vpop.permute.xlu1 %929  }
  0xdd   :  { %1236 = vst.msk [vmem:[%s1812_s1 + $0x38] sm:$0xff] %vm789_vm2, %v930_v45  }
  0xde   :  { %v941_v46 = vpop.permute.xlu0 %940  }
  0xdf   :  { %1237 = vst.msk [vmem:[%s1812_s1 + $0x58] sm:$0xff] %vm789_vm2, %v941_v46  }
  0xe3   :  { %v952_v47 = vpop.permute.xlu1 %951  }
  0xe4   :  { %1238 = vst.msk [vmem:[%s1812_s1 + $0x78] sm:$0xff] %vm789_vm2, %v952_v47  }

// kernel: proxlayer_forward.1
= control target key start
LH: loop header
LB: loop body
LE: loop exit
PB: predicated region body
PF: predicated region fallthrough
CT: control target
= control target key end

     0   :  { %s9721_s0 = inlined_call_operand.vmem [shape: f32[1,128,128], index: 0, kind: input, shape index: {}]   ;;  %s9722_s1 = inlined_call_operand.vmem [shape: f32[9,128,128], index: 1, kind: input, shape index: {}]   ;;  %s9723_s2 = inlined_call_operand.vmem [shape: f32[1,128,128], index: 2, kind: output, shape index: {}]  }
   0x1   :  { %v12_v0 = vld [vmem:[%s9721_s0] sm:$0xff]  ;;  %v13_v1 = vld [vmem:[%s9721_s0 + $0x8] sm:$0xff]  ;;  %v14_v2 = vld [vmem:[%s9721_s0 + $0x10] sm:$0xff] }
   0x2   :  { %v7332_v3 = vpack.c.bf16 %v13_v1, %v12_v0  ;;  %v15_v4 = vld [vmem:[%s9721_s0 + $0x18] sm:$0xff]  ;;  %v16_v5 = vld [vmem:[%s9721_s0 + $0x20] sm:$0xff]  ;;  %v17_v6 = vld [vmem:[%s9721_s0 + $0x28] sm:$0xff] }
   0x3   :  { %v7343_v7 = vpack.c.bf16 %v15_v4, %v14_v2  ;;  %v7345_v8 = vpack.c.bf16 %v17_v6, %v16_v5  ;;  %v18_v9 = vld [vmem:[%s9721_s0 + $0x30] sm:$0xff]  ;;  %v19_v10 = vld [vmem:[%s9721_s0 + $0x38] sm:$0xff]  ;;  %v20_v18 = vld [vmem:[%s9721_s0 + $0x40] sm:$0xff] }
   0x4   :  { %v100_v11 = vunpack.c.l.bf16 %v7332_v3  ;;  %v101_v12 = vunpack.c.h.bf16 %v7332_v3  ;;  %v7355_v13 = vpack.c.bf16 %v19_v10, %v18_v9  ;;  %v21_v19 = vld [vmem:[%s9721_s0 + $0x48] sm:$0xff]  ;;  %v22_v30 = vld [vmem:[%s9721_s0 + $0x50] sm:$0xff]  ;;  %v23_v31 = vld [vmem:[%s9721_s0 + $0x58] sm:$0xff] }
   0x5   :  { %v102_v14 = vunpack.c.l.bf16 %v7343_v7  ;;  %v103_v15 = vunpack.c.h.bf16 %v7343_v7  ;;  %v104_v16 = vunpack.c.l.bf16 %v7345_v8  ;;  %v105_v17 = vunpack.c.h.bf16 %v7345_v8  ;;  %v28_v36 = vld [vmem:[%s9722_s1] sm:$0xff]  ;;  %v29_v37 = vld [vmem:[%s9722_s1 + $0x8] sm:$0xff]  ;;  %v26_v50 = vld [vmem:[%s9721_s0 + $0x70] sm:$0xff] }
   0x6   :  { %v116_v20 = vsub.f32 %v12_v0, %v100_v11  ;;  %v117_v21 = vsub.f32 %v13_v1, %v101_v12  ;;  %v106_v24 = vunpack.c.l.bf16 %v7355_v13  ;;  %v107_v25 = vunpack.c.h.bf16 %v7355_v13  ;;  %v24_v41 = vld [vmem:[%s9721_s0 + $0x60] sm:$0xff]  ;;  %v25_v42 = vld [vmem:[%s9721_s0 + $0x68] sm:$0xff]  ;;  %v27_v51 = vld [vmem:[%s9721_s0 + $0x78] sm:$0xff] }
   0x7   :  { %v118_v22 = vsub.f32 %v14_v2, %v102_v14  ;;  %v119_v23 = vsub.f32 %v15_v4, %v103_v15  ;;  %v120_v27 = vsub.f32 %v16_v5, %v104_v16  ;;  %v121_v28 = vsub.f32 %v17_v6, %v105_v17  ;;  %v5068_v63 = vld [vmem:[%s9722_s1 + $0x80] sm:$0xff]  ;;  %v5069_v0 = vld [vmem:[%s9722_s1 + $0x88] sm:$0xff]  ;;  %v5070_v4 = vld [vmem:[%s9722_s1 + $0x90] sm:$0xff] }
   0x8   :  { %v132_v26 = vpack.c.bf16 %v117_v21, %v116_v20  ;;  %v7369_v29 = vpack.c.bf16 %v21_v19, %v20_v18  ;;  %v122_v33 = vsub.f32 %v18_v9, %v106_v24  ;;  %v123_v34 = vsub.f32 %v19_v10, %v107_v25  ;;  %v5071_v5 = vld [vmem:[%s9722_s1 + $0x98] sm:$0xff]  ;;  %v5072_v12 = vld [vmem:[%s9722_s1 + $0xa0] sm:$0xff]  ;;  %v5073_v14 = vld [vmem:[%s9722_s1 + $0xa8] sm:$0xff] }
   0x9   :  { %v133_v32 = vpack.c.bf16 %v119_v23, %v118_v22  ;;  %v7377_v35 = vpack.c.bf16 %v23_v31, %v22_v30  ;;  %v134_v38 = vpack.c.bf16 %v121_v28, %v120_v27  ;;  %v7393_v43 = vpack.c.bf16 %v29_v37, %v28_v36  ;;  %v5074_v16 = vld [vmem:[%s9722_s1 + $0xb0] sm:$0xff]  ;;  %v5075_v17 = vld [vmem:[%s9722_s1 + $0xb8] sm:$0xff]  ;;  %v5077_v27 = vld [vmem:[%s9722_s1 + $0xc8] sm:$0xff] }
   0xa   :  { %5772 = vmatprep.subr.bf16.mxu0 %v132_v26  ;;  %v108_v39 = vunpack.c.l.bf16 %v7369_v29  ;;  %v109_v40 = vunpack.c.h.bf16 %v7369_v29  ;;  %v135_v44 = vpack.c.bf16 %v123_v34, %v122_v33  ;;  %v7396_v46 = vpack.c.bf16 %v25_v42, %v24_v41 }
   0xb   :  { %5773 = vmatpush3.bf16.msra.mxu0 %v132_v26  ;;  %9906 = vst [vmem:[#allocation2_spill] sm:$0xff] %v7393_v43  ;;  %v110_v45 = vunpack.c.l.bf16 %v7377_v35  ;;  %v111_v49 = vunpack.c.h.bf16 %v7377_v35  ;;  %5788 = vmatprep.mubr.bf16.mxu0 %v7393_v43  ;;  %v52_v52 = vunpack.c.l.bf16 %v7393_v43  ;;  %v53_v53 = vunpack.c.h.bf16 %v7393_v43  ;;  %v5076_v26 = vld [vmem:[%s9722_s1 + $0xc0] sm:$0xff] }
   0xc   :  { %5774 = vmatprep.subr.bf16.mxu0 %v133_v32  ;;  %v124_v47 = vsub.f32 %v20_v18, %v108_v39  ;;  %v125_v48 = vsub.f32 %v21_v19, %v109_v40  ;;  %v112_v55 = vunpack.c.l.bf16 %v7396_v46  ;;  %v7409_v56 = vpack.c.bf16 %v27_v51, %v26_v50 }
   0xd   :  { %v68_v54 = vsub.f32 %v28_v36, %v52_v52  ;;  %v69_v57 = vsub.f32 %v29_v37, %v53_v53  ;;  %v126_v59 = vsub.f32 %v22_v30, %v110_v45  ;;  %v127_v60 = vsub.f32 %v23_v31, %v111_v49  ;;  %v7478_v49 = vld [vmem:[%s9722_s1 + $0x10] sm:$0xff]  ;;  %v7494_v52 = vld [vmem:[%s9722_s1 + $0x28] sm:$0xff] }
   0xe   :  { %v136_v58 = vpack.c.bf16 %v125_v48, %v124_v47  ;;  %v113_v61 = vunpack.c.h.bf16 %v7396_v46  ;;  %v114_v1 = vunpack.c.l.bf16 %v7409_v56  ;;  %v115_v2 = vunpack.c.h.bf16 %v7409_v56  ;;  %v5078_v47 = vld [vmem:[%s9722_s1 + $0xd0] sm:$0xff]  ;;  %v5079_v48 = vld [vmem:[%s9722_s1 + $0xd8] sm:$0xff] }
   0xf   :  { %5775 = vmatpush3.bf16.msra.mxu0 %v133_v32  ;;  %v7412_v62 = vpack.c.bf16 %v69_v57, %v68_v54  ;;  %v137_v6 = vpack.c.bf16 %v127_v60, %v126_v59  ;;  %v128_v9 = vsub.f32 %v24_v41, %v112_v55  ;;  %v7428_v11 = vpack.c.bf16 %v5069_v0, %v5068_v63  ;;  %v5080_v60 = vld [vmem:[%s9722_s1 + $0xe0] sm:$0xff] }
  0x10   :  { %5776 = vmatprep.subr.bf16.mxu0 %v134_v38  ;;  %v129_v10 = vsub.f32 %v25_v42, %v113_v61  ;;  %v7436_v15 = vpack.c.bf16 %v5071_v5, %v5070_v4  ;;  %v130_v18 = vsub.f32 %v26_v50, %v114_v1  ;;  %v131_v19 = vsub.f32 %v27_v51, %v115_v2  ;;  %v7484_v50 = vld [vmem:[%s9722_s1 + $0x18] sm:$0xff]  ;;  %v7489_v51 = vld [vmem:[%s9722_s1 + $0x20] sm:$0xff]  ;;  %v5081_v61 = vld [vmem:[%s9722_s1 + $0xe8] sm:$0xff] }
  0x11   :  { %9907 = vst [vmem:[#allocation3_spill] sm:$0xff] %v7412_v62  ;;  %9908 = vst [vmem:[#allocation4_spill] sm:$0xff] %v7428_v11  ;;  %v520_v20 = vunpack.c.l.bf16 %v7428_v11  ;;  %v521_v21 = vunpack.c.h.bf16 %v7428_v11  ;;  %v7448_v25 = vpack.c.bf16 %v5073_v14, %v5072_v12  ;;  %v7456_v31 = vpack.c.bf16 %v5075_v17, %v5074_v16 }
  0x12   :  { %9909 = vst [vmem:[#allocation5_spill] sm:$0xff] %v7436_v15  ;;  %v138_v22 = vpack.c.bf16 %v129_v10, %v128_v9  ;;  %v522_v23 = vunpack.c.l.bf16 %v7436_v15  ;;  %v523_v24 = vunpack.c.h.bf16 %v7436_v15  ;;  %v139_v37 = vpack.c.bf16 %v131_v19, %v130_v18  ;;  %v7533_v10 = vld [vmem:[%s9722_s1 + $0x30] sm:$0xff]  ;;  %v7548_v18 = vld [vmem:[%s9722_s1 + $0x40] sm:$0xff]  ;;  %v7553_v19 = vld [vmem:[%s9722_s1 + $0x48] sm:$0xff] }
  0x13   :  { %5777 = vmatpush3.bf16.msra.mxu0 %v134_v38  ;;  %9910 = vst [vmem:[#allocation6_spill] sm:$0xff] %v7448_v25  ;;  %v536_v28 = vsub.f32 %v5068_v63, %v520_v20  ;;  %v537_v30 = vsub.f32 %v5069_v0, %v521_v21  ;;  %9911 = vst [vmem:[#allocation7_spill] sm:$0xff] %v7456_v31  ;;  %v524_v34 = vunpack.c.l.bf16 %v7448_v25  ;;  %v525_v36 = vunpack.c.h.bf16 %v7448_v25 }
  0x14   :  { %5778 = vmatprep.subr.bf16.mxu0 %v135_v44  ;;  %v538_v32 = vsub.f32 %v5070_v4, %v522_v23  ;;  %v539_v33 = vsub.f32 %v5071_v5, %v523_v24  ;;  %v526_v39 = vunpack.c.l.bf16 %v7456_v31  ;;  %v7463_v40 = vpack.c.bf16 %v5077_v27, %v5076_v26 }
  0x15   :  { %v7460_v38 = vpack.c.bf16 %v537_v30, %v536_v28  ;;  %v540_v42 = vsub.f32 %v5072_v12, %v524_v34  ;;  %v527_v45 = vunpack.c.h.bf16 %v7456_v31  ;;  %v7501_v59 = vpack.c.bf16 %v5079_v48, %v5078_v47  ;;  %v7538_v12 = vld [vmem:[%s9722_s1 + $0x38] sm:$0xff]  ;;  %v7577_v28 = vld [vmem:[%s9722_s1 + $0x50] sm:$0xff]  ;;  %v7595_v34 = vld [vmem:[%s9722_s1 + $0x68] sm:$0xff] }
  0x16   :  { %9913 = vst [vmem:[#allocation9_spill] sm:$0xff] %v7463_v40  ;;  %v7465_v41 = vpack.c.bf16 %v539_v33, %v538_v32  ;;  %v528_v54 = vunpack.c.l.bf16 %v7463_v40  ;;  %v529_v55 = vunpack.c.h.bf16 %v7463_v40  ;;  %v542_v57 = vsub.f32 %v5074_v16, %v526_v39  ;;  %v7582_v30 = vld [vmem:[%s9722_s1 + $0x58] sm:$0xff]  ;;  %v7590_v33 = vld [vmem:[%s9722_s1 + $0x60] sm:$0xff]  ;;  %v7617_v39 = vld [vmem:[%s9722_s1 + $0x70] sm:$0xff] }
  0x17   :  { %5779 = vmatpush3.bf16.msra.mxu0 %v135_v44  ;;  %9912 = vst [vmem:[#allocation8_spill] sm:$0xff] %v7460_v38  ;;  %v541_v44 = vsub.f32 %v5073_v14, %v525_v36  ;;  %5868 = vmatprep.subr.bf16.mxu1 %v7460_v38  ;;  %9916 = vst [vmem:[#allocation12_spill] sm:$0xff] %v7501_v59  ;;  %v7511_v63 = vpack.c.bf16 %v7484_v50, %v7478_v49  ;;  %v531_v9 = vunpack.c.h.bf16 %v7501_v59 }
  0x18   :  { %5780 = vmatprep.subr.bf16.mxu0 %v136_v58  ;;  %9914 = vst [vmem:[#allocation10_spill] sm:$0xff] %v7465_v41  ;;  %5869 = vmatpush3.bf16.msra.mxu1 %v7460_v38  ;;  %v7515_v0 = vpack.c.bf16 %v7494_v52, %v7489_v51  ;;  %v544_v1 = vsub.f32 %v5076_v26, %v528_v54 }
  0x19   :  { %5870 = vmatprep.subr.bf16.mxu1 %v7465_v41  ;;  %v7497_v53 = vpack.c.bf16 %v541_v44, %v540_v42  ;;  %9917 = vst [vmem:[#allocation13_spill] sm:$0xff] %v7511_v63  ;;  %v545_v2 = vsub.f32 %v5077_v27, %v529_v55  ;;  %v7519_v4 = vpack.c.bf16 %v5081_v61, %v5080_v60  ;;  %v7622_v42 = vld [vmem:[%s9722_s1 + $0x78] sm:$0xff] }
  0x1a   :  { %9918 = vst [vmem:[#allocation14_spill] sm:$0xff] %v7515_v0  ;;  %v547_v21 = vsub.f32 %v5079_v48, %v531_v9  ;;  %v7564_v23 = vpack.c.bf16 %v7553_v19, %v7548_v18  ;;  %v7600_v36 = vpack.c.bf16 %v7582_v30, %v7577_v28  ;;  %v7627_v44 = vpack.c.bf16 %v7622_v42, %v7617_v39 }
  0x1b   :  { %5781 = vmatpush3.bf16.msra.mxu0 %v136_v58  ;;  %9915 = vst [vmem:[#allocation11_spill] sm:$0xff] %v7497_v53  ;;  %v543_v58 = vsub.f32 %v5075_v17, %v527_v45  ;;  %9919 = vst [vmem:[#allocation15_spill] sm:$0xff] %v7519_v4  ;;  %v7540_v14 = vpack.c.bf16 %v545_v2, %v544_v1  ;;  %v532_v16 = vunpack.c.l.bf16 %v7519_v4  ;;  %v533_v17 = vunpack.c.h.bf16 %v7519_v4 }
  0x1c   :  { %5782 = vmatprep.subr.bf16.mxu0 %v137_v6  ;;  %5871 = vmatpush3.bf16.msra.mxu1 %v7465_v41  ;;  %9923 = vst [vmem:[#allocation19_spill] sm:$0xff] %v7564_v23  ;;  %9926 = vst [vmem:[#allocation22_spill] sm:$0xff] %v7600_v36 }
  0x1d   :  { %5872 = vmatprep.subr.bf16.mxu1 %v7497_v53  ;;  %v7522_v5 = vpack.c.bf16 %v543_v58, %v542_v57  ;;  %9921 = vst [vmem:[#allocation17_spill] sm:$0xff] %v7540_v14  ;;  %v548_v24 = vsub.f32 %v5080_v60, %v532_v16  ;;  %v549_v26 = vsub.f32 %v5081_v61, %v533_v17  ;;  %9928 = vst [vmem:[#allocation24_spill] sm:$0xff] %v7627_v44 }
  0x1e   :  { %v63_v61 = vunpack.c.h.bf16 %v7600_v36 }
  0x1f   :  { %5783 = vmatpush3.bf16.msra.mxu0 %v137_v6  ;;  %9920 = vst [vmem:[#allocation16_spill] sm:$0xff] %v7522_v5  ;;  %v530_v6 = vunpack.c.l.bf16 %v7501_v59  ;;  %v7584_v32 = vpack.c.bf16 %v549_v26, %v548_v24 }
  0x20   :  { %5784 = vmatprep.subr.bf16.mxu0 %v138_v22  ;;  %5873 = vmatpush3.bf16.msra.mxu1 %v7497_v53 }
  0x21   :  { %5874 = vmatprep.subr.bf16.mxu1 %v7522_v5  ;;  %v546_v20 = vsub.f32 %v5078_v47, %v530_v6  ;;  %9925 = vst [vmem:[#allocation21_spill] sm:$0xff] %v7584_v32 }
  0x23   :  { %5785 = vmatpush3.bf16.msra.mxu0 %v138_v22  ;;  %v7558_v22 = vpack.c.bf16 %v7538_v12, %v7533_v10  ;;  %v7568_v27 = vpack.c.bf16 %v547_v21, %v546_v20 }
  0x24   :  { %5786 = vmatprep.subr.bf16.mxu0 %v139_v37  ;;  %5875 = vmatpush3.bf16.msra.mxu1 %v7522_v5 }
  0x25   :  { %9922 = vst [vmem:[#allocation18_spill] sm:$0xff] %v7558_v22  ;;  %5876 = vmatprep.subr.bf16.mxu1 %v7540_v14  ;;  %9924 = vst [vmem:[#allocation20_spill] sm:$0xff] %v7568_v27  ;;  %v58_v54 = vunpack.c.l.bf16 %v7558_v22  ;;  %v59_v55 = vunpack.c.h.bf16 %v7558_v22 }
  0x27   :  { %5787 = vmatpush3.bf16.msra.mxu0 %v139_v37  ;;  %v7606_v37 = vpack.c.bf16 %v7595_v34, %v7590_v33 }
  0x28   :  { %5804 = vmatprep.subr.bf16.mxu0 %v7332_v3  ;;  %5877 = vmatpush3.bf16.msra.mxu1 %v7540_v14 }
  0x29   :  { %5878 = vmatprep.subr.bf16.mxu1 %v7568_v27  ;;  %9927 = vst [vmem:[#allocation23_spill] sm:$0xff] %v7606_v37  ;;  %v64_v2 = vunpack.c.l.bf16 %v7606_v37  ;;  %v65_v6 = vunpack.c.h.bf16 %v7606_v37 }
  0x2a   :  { %5789 = vmatmul.mubr.bf16.vlgmr.msra.gmra.mrb[0].mxu0 %v7511_v63 }
  0x2b   :  { %5805 = vmatpush3.bf16.msra.mxu0 %v7332_v3  ;;  %5792 = vmatprep.mubr.bf16.mxu0 %v7515_v0  ;;  %v81_v16 = vsub.f32 %v7595_v34, %v65_v6 }
  0x2c   :  { %5806 = vmatprep.subr.bf16.mxu0 %v7343_v7  ;;  %5879 = vmatpush3.bf16.msra.mxu1 %v7568_v27 }
  0x2d   :  { %5880 = vmatprep.subr.bf16.mxu1 %v7584_v32 }
  0x2f   :  { %5807 = vmatpush3.bf16.msra.mxu0 %v7343_v7 }
  0x30   :  { %5808 = vmatprep.subr.bf16.mxu0 %v7345_v8  ;;  %5881 = vmatpush3.bf16.msra.mxu1 %v7584_v32 }
  0x32   :  { %5793 = vmatmul.mubr.bf16.gmra.mrb[4].mxu0 %v7558_v22 }
  0x33   :  { %5809 = vmatpush3.bf16.msra.mxu0 %v7345_v8  ;;  %5796 = vmatprep.mubr.bf16.mxu0 %v7564_v23 }
  0x34   :  { %5810 = vmatprep.subr.bf16.mxu0 %v7355_v13 }
  0x37   :  { %5811 = vmatpush3.bf16.msra.mxu0 %v7355_v13 }
  0x38   :  { %5812 = vmatprep.subr.bf16.mxu0 %v7369_v29 }
  0x3a   :  { %5797 = vmatmul.mubr.bf16.gmra.mrb[8].mxu0 %v7600_v36 }
  0x3b   :  { %5813 = vmatpush3.bf16.msra.mxu0 %v7369_v29  ;;  %5800 = vmatprep.mubr.bf16.mxu0 %v7606_v37 }
  0x3c   :  { %5814 = vmatprep.subr.bf16.mxu0 %v7377_v35 }
  0x3f   :  { %5815 = vmatpush3.bf16.msra.mxu0 %v7377_v35 }
  0x40   :  { %5816 = vmatprep.subr.bf16.mxu0 %v7396_v46 }
  0x42   :  { %5801 = vmatmul.mubr.bf16.gmra.mrb[12].mxu0 %v7627_v44 }
  0x43   :  { %5817 = vmatpush3.bf16.msra.mxu0 %v7396_v46  ;;  %5820 = vmatprep.mubr.bf16.mxu0 %v7393_v43 }
  0x44   :  { %5818 = vmatprep.subr.bf16.mxu0 %v7409_v56 }
  0x47   :  { %5819 = vmatpush3.bf16.msra.mxu0 %v7409_v56 }
  0x48   :  { %5836 = vmatprep.subr.bf16.mxu0 %v7332_v3 }
  0x4a   :  { %5821 = vmatmul.mubr.bf16.vlgmr.msra.gmra.mrb[0].mxu0 %v7511_v63 }
  0x4b   :  { %5837 = vmatpush3.bf16.msra.mxu0 %v7332_v3  ;;  %5824 = vmatprep.mubr.bf16.mxu0 %v7515_v0  ;;  %v54_v3 = vunpack.c.l.bf16 %v7511_v63 }
  0x4c   :  { %5838 = vmatprep.subr.bf16.mxu0 %v7343_v7 }
  0x4f   :  { %5839 = vmatpush3.bf16.msra.mxu0 %v7343_v7  ;;  %v55_v7 = vunpack.c.h.bf16 %v7511_v63 }
  0x50   :  { %5840 = vmatprep.subr.bf16.mxu0 %v7345_v8 }
  0x51   :  { %v71_v45 = vsub.f32 %v7484_v50, %v55_v7  ;;  %v61_v50 = vunpack.c.h.bf16 %v7564_v23 }
  0x52   :  { %5825 = vmatmul.mubr.bf16.gmra.mrb[4].mxu0 %v7558_v22 }
  0x53   :  { %5841 = vmatpush3.bf16.msra.mxu0 %v7345_v8  ;;  %5828 = vmatprep.mubr.bf16.mxu0 %v7564_v23  ;;  %v56_v8 = vunpack.c.l.bf16 %v7515_v0  ;;  %v77_v58 = vsub.f32 %v7553_v19, %v61_v50  ;;  %v67_v19 = vunpack.c.h.bf16 %v7627_v44 }
  0x54   :  { %5842 = vmatprep.subr.bf16.mxu0 %v7355_v13 }
  0x55   :  { %v72_v47 = vsub.f32 %v7489_v51, %v56_v8  ;;  %v74_v51 = vsub.f32 %v7533_v10, %v58_v54  ;;  %v79_v10 = vsub.f32 %v7582_v30, %v63_v61  ;;  %v83_v24 = vsub.f32 %v7622_v42, %v67_v19  ;;  %v5083_v30 = vld [vmem:[%s9722_s1 + $0xf8] sm:$0xff] }
  0x57   :  { %5843 = vmatpush3.bf16.msra.mxu0 %v7355_v13  ;;  %v57_v13 = vunpack.c.h.bf16 %v7515_v0 }
  0x58   :  { %5844 = vmatprep.subr.bf16.mxu0 %v7369_v29 }
  0x5a   :  { %5829 = vmatmul.mubr.bf16.gmra.mrb[8].mxu0 %v7600_v36 }
  0x5b   :  { %5845 = vmatpush3.bf16.msra.mxu0 %v7369_v29  ;;  %5832 = vmatprep.mubr.bf16.mxu0 %v7606_v37  ;;  %v70_v29 = vsub.f32 %v7478_v49, %v54_v3 }
  0x5c   :  { %5846 = vmatprep.subr.bf16.mxu0 %v7377_v35 }
  0x5d   :  { %v7667_v48 = vpack.c.bf16 %v71_v45, %v70_v29 }
  0x5f   :  { %5847 = vmatpush3.bf16.msra.mxu0 %v7377_v35  ;;  %v73_v35 = vsub.f32 %v7494_v52, %v57_v13  ;;  %9929 = vst [vmem:[#allocation25_spill] sm:$0xff] %v7667_v48  ;;  %v75_v52 = vsub.f32 %v7538_v12, %v59_v55  ;;  %v80_v12 = vsub.f32 %v7590_v33, %v64_v2 }
  0x60   :  { %5848 = vmatprep.subr.bf16.mxu0 %v7396_v46 }
  0x61   :  { %v7672_v49 = vpack.c.bf16 %v73_v35, %v72_v47  ;;  %v7682_v60 = vpack.c.bf16 %v75_v52, %v74_v51  ;;  %v7700_v20 = vpack.c.bf16 %v81_v16, %v80_v12 }
  0x62   :  { %5833 = vmatmul.mubr.bf16.gmra.mrb[12].mxu0 %v7627_v44 }
  0x63   :  { %5849 = vmatpush3.bf16.msra.mxu0 %v7396_v46  ;;  %5852 = vmatprep.mubr.bf16.mxu0 %v7412_v62  ;;  %9930 = vst [vmem:[#allocation26_spill] sm:$0xff] %v7672_v49  ;;  %v60_v46 = vunpack.c.l.bf16 %v7564_v23  ;;  %9931 = vst [vmem:[#allocation27_spill] sm:$0xff] %v7682_v60 }
  0x64   :  { %5850 = vmatprep.subr.bf16.mxu0 %v7409_v56  ;;  %9934 = vst [vmem:[#allocation30_spill] sm:$0xff] %v7700_v20 }
  0x65   :  { %v76_v57 = vsub.f32 %v7548_v18, %v60_v46  ;;  %v66_v18 = vunpack.c.l.bf16 %v7627_v44 }
  0x67   :  { %5851 = vmatpush3.bf16.msra.mxu0 %v7409_v56  ;;  %v62_v56 = vunpack.c.l.bf16 %v7600_v36  ;;  %v7686_v1 = vpack.c.bf16 %v77_v58, %v76_v57  ;;  %v82_v21 = vsub.f32 %v7617_v39, %v66_v18 }
  0x69   :  { %9932 = vst [vmem:[#allocation28_spill] sm:$0xff] %v7686_v1  ;;  %v78_v9 = vsub.f32 %v7577_v28, %v62_v56  ;;  %v7706_v26 = vpack.c.bf16 %v83_v24, %v82_v21  ;;  %v5082_v28 = vld [vmem:[%s9722_s1 + $0xf0] sm:$0xff] }
  0x6a   :  { %5853 = vmatmul.mubr.bf16.vlgmr.msra.gmra.mrb[0].mxu0 %v7667_v48  ;;  %v7715_v33 = vpack.c.bf16 %v5083_v30, %v5082_v28 }
  0x6b   :  { %5856 = vmatprep.mubr.bf16.mxu0 %v7672_v49  ;;  %v7696_v17 = vpack.c.bf16 %v79_v10, %v78_v9  ;;  %9935 = vst [vmem:[#allocation31_spill] sm:$0xff] %v7706_v26 }
  0x6c   :  { %9936 = vst [vmem:[#allocation32_spill] sm:$0xff] %v7715_v33  ;;  %v534_v34 = vunpack.c.l.bf16 %v7715_v33  ;;  %v535_v39 = vunpack.c.h.bf16 %v7715_v33 }
  0x6d   :  { %9933 = vst [vmem:[#allocation29_spill] sm:$0xff] %v7696_v17 }
  0x6e   :  { %v550_v42 = vsub.f32 %v5082_v28, %v534_v34  ;;  %v551_v3 = vsub.f32 %v5083_v30, %v535_v39 }
  0x70   :  { %v7719_v7 = vpack.c.bf16 %v551_v3, %v550_v42 }
  0x72   :  { %5857 = vmatmul.mubr.bf16.gmra.mrb[4].mxu0 %v7682_v60  ;;  %9937 = vst [vmem:[#allocation33_spill] sm:$0xff] %v7719_v7  ;;  %5882 = vmatprep.subr.bf16.mxu1 %v7719_v7 }
  0x73   :  { %5860 = vmatprep.mubr.bf16.mxu0 %v7686_v1  ;;  %5883 = vmatpush3.bf16.msra.mxu1 %v7719_v7 }
  0x74   :  { %5900 = vmatprep.subr.bf16.mxu1 %v7428_v11 }
  0x7a   :  { %5861 = vmatmul.mubr.bf16.gmra.mrb[8].mxu0 %v7696_v17 }
  0x7b   :  { %5864 = vmatprep.mubr.bf16.mxu0 %v7700_v20 }
  0x82   :  { %5865 = vmatmul.mubr.bf16.gmra.mrb[12].mxu0 %v7706_v26 }
 0x13d   :  { %v5854_v8 = vpop.f32.mrb[0].mxu0 }
 0x13e   :  { %v368_v13 = vpop.f32.mrb[1].mxu0 }
 0x13f   :  { %v5855_v29 = vpop.f32.mrb[2].mxu0 }
 0x140   :  { %v7724_v45 = vpack.c.bf16 %v5855_v29, %v5854_v8  ;;  %v371_v47 = vpop.f32.mrb[3].mxu0 }
 0x141   :  { %v7726_v35 = vpack.c.bf16 %v371_v47, %v368_v13 }
 0x142   :  { %v474_v54 = vunpack.c.l.bf16 %v7724_v45  ;;  %v475_v55 = vunpack.c.h.bf16 %v7724_v45 }
 0x143   :  { %v472_v46 = vunpack.c.l.bf16 %v7726_v35  ;;  %v473_v50 = vunpack.c.h.bf16 %v7726_v35  ;;  %5884 = vmatprep.mubr.bf16.mxu1 %v7726_v35 }
 0x144   :  { %v7733_v51 = vsub.f32 %v5854_v8, %v474_v54  ;;  %v7735_v52 = vsub.f32 %v5855_v29, %v475_v55  ;;  %5885 = vmatmul.mubr.bf16.vlgmr.msra.gmra.mrb[0].mxu1 %v7724_v45 }
 0x145   :  { %v7738_v57 = vsub.f32 %v368_v13, %v472_v46  ;;  %v7740_v58 = vsub.f32 %v371_v47, %v473_v50  ;;  %v5858_v56 = vpop.f32.mrb[4].mxu0  ;;  %5901 = vmatpush3.bf16.msra.mxu1 %v7428_v11 }
 0x146   :  { %v384_v2 = vpop.f32.mrb[5].mxu0  ;;  %5902 = vmatprep.subr.bf16.mxu1 %v7436_v15 }
 0x147   :  { %v5859_v9 = vpop.f32.mrb[6].mxu0 }
 0x148   :  { %v7748_v10 = vpack.c.bf16 %v5859_v9, %v5858_v56  ;;  %v387_v12 = vpop.f32.mrb[7].mxu0 }
 0x149   :  { %v7750_v16 = vpack.c.bf16 %v387_v12, %v384_v2  ;;  %5903 = vmatpush3.bf16.msra.mxu1 %v7436_v15 }
 0x14a   :  { %v478_v18 = vunpack.c.l.bf16 %v7748_v10  ;;  %v479_v19 = vunpack.c.h.bf16 %v7748_v10  ;;  %5904 = vmatprep.subr.bf16.mxu1 %v7448_v25 }
 0x14b   :  { %v476_v21 = vunpack.c.l.bf16 %v7750_v16  ;;  %v477_v24 = vunpack.c.h.bf16 %v7750_v16  ;;  %5888 = vmatprep.mubr.bf16.mxu1 %v7750_v16 }
 0x14c   :  { %v7759_v28 = vsub.f32 %v5858_v56, %v478_v18  ;;  %v7761_v30 = vsub.f32 %v5859_v9, %v479_v19  ;;  %5889 = vmatmul.mubr.bf16.gmra.mrb[4].mxu1 %v7748_v10 }
 0x14d   :  { %v7764_v34 = vsub.f32 %v384_v2, %v476_v21  ;;  %v7766_v39 = vsub.f32 %v387_v12, %v477_v24  ;;  %v5862_v42 = vpop.f32.mrb[8].mxu0  ;;  %5905 = vmatpush3.bf16.msra.mxu1 %v7448_v25 }
 0x14e   :  { %v400_v8 = vpop.f32.mrb[9].mxu0  ;;  %5906 = vmatprep.subr.bf16.mxu1 %v7456_v31 }
 0x14f   :  { %v5863_v29 = vpop.f32.mrb[10].mxu0 }
 0x150   :  { %v469_v47 = vpack.c.bf16 %v5863_v29, %v5862_v42  ;;  %v403_v54 = vpop.f32.mrb[11].mxu0 }
 0x151   :  { %v468_v55 = vpack.c.bf16 %v403_v54, %v400_v8  ;;  %5907 = vmatpush3.bf16.msra.mxu1 %v7456_v31 }
 0x152   :  { %v482_v46 = vunpack.c.l.bf16 %v469_v47  ;;  %v483_v50 = vunpack.c.h.bf16 %v469_v47  ;;  %5908 = vmatprep.subr.bf16.mxu1 %v7463_v40 }
 0x153   :  { %v480_v56 = vunpack.c.l.bf16 %v468_v55  ;;  %v481_v2 = vunpack.c.h.bf16 %v468_v55  ;;  %5892 = vmatprep.mubr.bf16.mxu1 %v468_v55 }
 0x154   :  { %v498_v9 = vsub.f32 %v5862_v42, %v482_v46  ;;  %v499_v12 = vsub.f32 %v5863_v29, %v483_v50  ;;  %5893 = vmatmul.mubr.bf16.gmra.mrb[8].mxu1 %v469_v47 }
 0x155   :  { %v496_v18 = vsub.f32 %v400_v8, %v480_v56  ;;  %v497_v19 = vsub.f32 %v403_v54, %v481_v2  ;;  %v5866_v21 = vpop.f32.mrb[12].mxu0  ;;  %5909 = vmatpush3.bf16.msra.mxu1 %v7463_v40 }
 0x156   :  { %v509_v24 = vpack.c.bf16 %v499_v12, %v498_v9  ;;  %v416_v3 = vpop.f32.mrb[13].mxu0  ;;  %5910 = vmatprep.subr.bf16.mxu1 %v7501_v59 }
 0x157   :  { %v508_v13 = vpack.c.bf16 %v497_v19, %v496_v18  ;;  %v5867_v61 = vpop.f32.mrb[14].mxu0 }
 0x158   :  { %v471_v6 = vpack.c.bf16 %v5867_v61, %v5866_v21  ;;  %v419_v44 = vpop.f32.mrb[15].mxu0 }
 0x159   :  { %v470_v37 = vpack.c.bf16 %v419_v44, %v416_v3  ;;  %5911 = vmatpush3.bf16.msra.mxu1 %v7501_v59 }
 0x15a   :  { %v486_v36 = vunpack.c.l.bf16 %v471_v6  ;;  %v487_v42 = vunpack.c.h.bf16 %v471_v6  ;;  %5912 = vmatprep.subr.bf16.mxu1 %v7519_v4 }
 0x15b   :  { %v484_v8 = vunpack.c.l.bf16 %v470_v37  ;;  %v485_v29 = vunpack.c.h.bf16 %v470_v37  ;;  %5896 = vmatprep.mubr.bf16.mxu1 %v470_v37 }
 0x15c   :  { %v502_v54 = vsub.f32 %v5866_v21, %v486_v36  ;;  %v503_v46 = vsub.f32 %v5867_v61, %v487_v42  ;;  %5897 = vmatmul.mubr.bf16.gmra.mrb[12].mxu1 %v471_v6  ;;  %v9938_v36 = vpack.c.bf16 %v7740_v58, %v7738_v57  ;;  %v5103_v21 = vld [vmem:[%s9722_s1 + $0x198] sm:$0xff]  ;;  %v5105_v42 = vld [vmem:[%s9722_s1 + $0x1a8] sm:$0xff] }
 0x15d   :  { %v500_v50 = vsub.f32 %v416_v3, %v484_v8  ;;  %v501_v56 = vsub.f32 %v419_v44, %v485_v29  ;;  %5913 = vmatpush3.bf16.msra.mxu1 %v7519_v4  ;;  %5916 = vmatprep.mubr.bf16.mxu1 %v7726_v35  ;;  %v9940_v44 = vpack.c.bf16 %v7766_v39, %v7764_v34  ;;  %v5084_v35 = vld [vmem:[%s9722_s1 + $0x100] sm:$0xff] }
 0x15e   :  { %v511_v2 = vpack.c.bf16 %v503_v46, %v502_v54  ;;  %5914 = vmatprep.subr.bf16.mxu1 %v7715_v33 }
 0x15f   :  { %v510_v9 = vpack.c.bf16 %v501_v56, %v500_v50 }
 0x161   :  { %5915 = vmatpush3.bf16.msra.mxu1 %v7715_v33 }
 0x162   :  { %5932 = vmatprep.subr.bf16.mxu1 %v7428_v11 }
 0x164   :  { %5917 = vmatmul.mubr.bf16.vlgmr.msra.gmra.mrb[0].mxu1 %v7724_v45  ;;  %v9941_v45 = vpack.c.bf16 %v7761_v30, %v7759_v28 }
 0x165   :  { %5920 = vmatprep.mubr.bf16.mxu1 %v7750_v16  ;;  %5933 = vmatpush3.bf16.msra.mxu1 %v7428_v11 }
 0x166   :  { %5934 = vmatprep.subr.bf16.mxu1 %v7436_v15 }
 0x169   :  { %5935 = vmatpush3.bf16.msra.mxu1 %v7436_v15 }
 0x16a   :  { %5936 = vmatprep.subr.bf16.mxu1 %v7448_v25 }
 0x16c   :  { %5921 = vmatmul.mubr.bf16.gmra.mrb[4].mxu1 %v7748_v10 }
 0x16d   :  { %5924 = vmatprep.mubr.bf16.mxu1 %v468_v55  ;;  %5937 = vmatpush3.bf16.msra.mxu1 %v7448_v25  ;;  %v5102_v55 = vld [vmem:[%s9722_s1 + $0x190] sm:$0xff] }
 0x16e   :  { %5938 = vmatprep.subr.bf16.mxu1 %v7456_v31  ;;  %v7868_v54 = vpack.c.bf16 %v5103_v21, %v5102_v55 }
 0x170   :  { %9948 = vst [vmem:[#allocation40_spill] sm:$0xff] %v7868_v54 }
 0x171   :  { %5939 = vmatpush3.bf16.msra.mxu1 %v7456_v31 }
 0x172   :  { %5940 = vmatprep.subr.bf16.mxu1 %v7463_v40 }
 0x174   :  { %5925 = vmatmul.mubr.bf16.gmra.mrb[8].mxu1 %v469_v47  ;;  %v5101_v47 = vld [vmem:[%s9722_s1 + $0x188] sm:$0xff] }
 0x175   :  { %5928 = vmatprep.mubr.bf16.mxu1 %v470_v37  ;;  %5941 = vmatpush3.bf16.msra.mxu1 %v7463_v40  ;;  %v9939_v37 = vpack.c.bf16 %v7735_v52, %v7733_v51  ;;  %v5085_v51 = vld [vmem:[%s9722_s1 + $0x108] sm:$0xff] }
 0x176   :  { %5942 = vmatprep.subr.bf16.mxu1 %v7501_v59  ;;  %v7821_v52 = vpack.c.bf16 %v5085_v51, %v5084_v35 }
 0x178   :  { %9942 = vst [vmem:[#allocation34_spill] sm:$0xff] %v7821_v52  ;;  %5980 = vmatprep.mubr.bf16.mxu0 %v7821_v52  ;;  %v892_v57 = vunpack.c.l.bf16 %v7821_v52  ;;  %v893_v58 = vunpack.c.h.bf16 %v7821_v52 }
 0x179   :  { %5943 = vmatpush3.bf16.msra.mxu1 %v7501_v59 }
 0x17a   :  { %5944 = vmatprep.subr.bf16.mxu1 %v7519_v4  ;;  %v908_v61 = vsub.f32 %v5084_v35, %v892_v57  ;;  %v1363_v35 = vunpack.c.h.bf16 %v7868_v54 }
 0x17c   :  { %5929 = vmatmul.mubr.bf16.gmra.mrb[12].mxu1 %v471_v6  ;;  %v909_v6 = vsub.f32 %v5085_v51, %v893_v58  ;;  %v1379_v23 = vsub.f32 %v5103_v21, %v1363_v35  ;;  %v5109_v21 = vld [vmem:[%s9722_s1 + $0x1c8] sm:$0xff] }
 0x17d   :  { %5945 = vmatpush3.bf16.msra.mxu1 %v7519_v4  ;;  %5948 = vmatprep.mubr.bf16.mxu1 %v9938_v36 }
 0x17e   :  { %5946 = vmatprep.subr.bf16.mxu1 %v7715_v33  ;;  %v7826_v10 = vpack.c.bf16 %v909_v6, %v908_v61 }
 0x180   :  { %9943 = vst [vmem:[#allocation35_spill] sm:$0xff] %v7826_v10 }
 0x181   :  { %5947 = vmatpush3.bf16.msra.mxu1 %v7715_v33 }
 0x184   :  { %5949 = vmatmul.mubr.bf16.vlgmr.msra.gmra.mrb[0].mxu1 %v9939_v37 }
 0x185   :  { %5952 = vmatprep.mubr.bf16.mxu1 %v9940_v44 }
 0x18c   :  { %5953 = vmatmul.mubr.bf16.gmra.mrb[4].mxu1 %v9941_v45  ;;  %v1362_v45 = vunpack.c.l.bf16 %v7868_v54 }
 0x18d   :  { %5956 = vmatprep.mubr.bf16.mxu1 %v508_v13  ;;  %v5100_v13 = vld [vmem:[%s9722_s1 + $0x180] sm:$0xff] }
 0x18e   :  { %v7855_v19 = vpack.c.bf16 %v5101_v47, %v5100_v13 }
 0x194   :  { %5957 = vmatmul.mubr.bf16.gmra.mrb[8].mxu1 %v509_v24  ;;  %v5104_v24 = vld [vmem:[%s9722_s1 + $0x1a0] sm:$0xff] }
 0x195   :  { %5960 = vmatprep.mubr.bf16.mxu1 %v510_v9  ;;  %v7870_v46 = vpack.c.bf16 %v5105_v42, %v5104_v24  ;;  %v1361_v9 = vunpack.c.h.bf16 %v7855_v19 }
 0x197   :  { %9949 = vst [vmem:[#allocation41_spill] sm:$0xff] %v7870_v46  ;;  %v1377_v61 = vsub.f32 %v5101_v47, %v1361_v9  ;;  %v1364_v47 = vunpack.c.l.bf16 %v7870_v46  ;;  %v1365_v9 = vunpack.c.h.bf16 %v7870_v46 }
 0x19c   :  { %5961 = vmatmul.mubr.bf16.gmra.mrb[12].mxu1 %v511_v2  ;;  %v1360_v2 = vunpack.c.l.bf16 %v7855_v19 }
 0x19e   :  { %v1376_v58 = vsub.f32 %v5100_v13, %v1360_v2 }
 0x1a0   :  { %v7898_v13 = vpack.c.bf16 %v1377_v61, %v1376_v58 }
 0x1a2   :  { %9954 = vst [vmem:[#allocation46_spill] sm:$0xff] %v7898_v13  ;;  %6060 = vmatprep.subr.bf16.mxu1 %v7898_v13 }
 0x1a3   :  { %6061 = vmatpush3.bf16.msra.mxu1 %v7898_v13 }
 0x257   :  { %v7828_v16 = vpop.f32.mrb[0].mxu1 }
 0x258   :  { %9944 = vst [vmem:[#allocation36_spill] sm:$0xff] %v7828_v16  ;;  %v7830_v28 = vpop.f32.mrb[1].mxu1 }
 0x259   :  { %9945 = vst [vmem:[#allocation37_spill] sm:$0xff] %v7830_v28  ;;  %v7832_v30 = vpop.f32.mrb[2].mxu1 }
 0x25a   :  { %9946 = vst [vmem:[#allocation38_spill] sm:$0xff] %v7832_v30  ;;  %v7836_v34 = vpack.c.bf16 %v7832_v30, %v7828_v16  ;;  %v7838_v39 = vpop.f32.mrb[3].mxu1 }
 0x25b   :  { %9947 = vst [vmem:[#allocation39_spill] sm:$0xff] %v7838_v39  ;;  %v7842_v3 = vpack.c.bf16 %v7838_v39, %v7830_v28 }
 0x25c   :  { %v943_v12 = vunpack.c.h.bf16 %v7836_v34  ;;  %v942_v18 = vunpack.c.l.bf16 %v7836_v34 }
 0x25d   :  { %v941_v8 = vunpack.c.h.bf16 %v7842_v3  ;;  %v940_v29 = vunpack.c.l.bf16 %v7842_v3 }
 0x25e   :  { %v959_v50 = vsub.f32 %v7832_v30, %v943_v12  ;;  %v958_v56 = vsub.f32 %v7828_v16, %v942_v18  ;;  %v1378_v18 = vsub.f32 %v5102_v55, %v1362_v45  ;;  %v5108_v55 = vld [vmem:[%s9722_s1 + $0x1c0] sm:$0xff]  ;;  %v1380_v45 = vsub.f32 %v5104_v24, %v1364_v47 }
 0x25f   :  { %v957_v36 = vsub.f32 %v7838_v39, %v941_v8  ;;  %v7877_v37 = vpop.f32.mrb[4].mxu1  ;;  %v956_v44 = vsub.f32 %v7830_v28, %v940_v29  ;;  %v5106_v8 = vld [vmem:[%s9722_s1 + $0x1b0] sm:$0xff]  ;;  %v5107_v29 = vld [vmem:[%s9722_s1 + $0x1b8] sm:$0xff] }
 0x260   :  { %9950 = vst [vmem:[#allocation42_spill] sm:$0xff] %v7877_v37  ;;  %v7882_v51 = vpop.f32.mrb[5].mxu1  ;;  %v973_v57 = vpack.c.bf16 %v959_v50, %v958_v56  ;;  %v7911_v2 = vpack.c.bf16 %v1379_v23, %v1378_v18  ;;  %v7917_v35 = vpack.c.bf16 %v5107_v29, %v5106_v8  ;;  %v1381_v23 = vsub.f32 %v5105_v42, %v1365_v9  ;;  %v5110_v9 = vld [vmem:[%s9722_s1 + $0x1d0] sm:$0xff] }
 0x261   :  { %9951 = vst [vmem:[#allocation43_spill] sm:$0xff] %v7882_v51  ;;  %v7884_v6 = vpop.f32.mrb[6].mxu1  ;;  %v972_v12 = vpack.c.bf16 %v957_v36, %v956_v44  ;;  %v7922_v18 = vpack.c.bf16 %v5109_v21, %v5108_v55 }
 0x262   :  { %9952 = vst [vmem:[#allocation44_spill] sm:$0xff] %v7884_v6  ;;  %v7894_v22 = vpack.c.bf16 %v7884_v6, %v7877_v37  ;;  %v7896_v50 = vpop.f32.mrb[7].mxu1  ;;  %9955 = vst [vmem:[#allocation47_spill] sm:$0xff] %v7911_v2  ;;  %6062 = vmatprep.subr.bf16.mxu1 %v7911_v2  ;;  %v1366_v24 = vunpack.c.l.bf16 %v7917_v35  ;;  %v1367_v47 = vunpack.c.h.bf16 %v7917_v35  ;;  %v7933_v27 = vpack.c.bf16 %v1381_v23, %v1380_v45  ;;  %v5112_v45 = vld [vmem:[%s9722_s1 + $0x1e0] sm:$0xff] }
 0x263   :  { %9953 = vst [vmem:[#allocation45_spill] sm:$0xff] %v7896_v50  ;;  %v7909_v56 = vpack.c.bf16 %v7896_v50, %v7882_v51  ;;  %5964 = vmatprep.subr.bf16.mxu0 %v972_v12  ;;  %9956 = vst [vmem:[#allocation48_spill] sm:$0xff] %v7917_v35  ;;  %v1368_v42 = vunpack.c.l.bf16 %v7922_v18  ;;  %6063 = vmatpush3.bf16.msra.mxu1 %v7911_v2  ;;  %v1369_v41 = vunpack.c.h.bf16 %v7922_v18 }
 0x264   :  { %v947_v36 = vunpack.c.h.bf16 %v7894_v22  ;;  %5965 = vmatpush3.bf16.msra.mxu0 %v972_v12  ;;  %v946_v44 = vunpack.c.l.bf16 %v7894_v22  ;;  %9957 = vst [vmem:[#allocation49_spill] sm:$0xff] %v7922_v18  ;;  %9959 = vst [vmem:[#allocation51_spill] sm:$0xff] %v7933_v27  ;;  %v1382_v14 = vsub.f32 %v5106_v8, %v1366_v24  ;;  %v1383_v5 = vsub.f32 %v5107_v29, %v1367_v47 }
 0x265   :  { %v945_v58 = vunpack.c.h.bf16 %v7909_v56  ;;  %5966 = vmatprep.subr.bf16.mxu0 %v973_v57  ;;  %v944_v61 = vunpack.c.l.bf16 %v7909_v56  ;;  %v1384_v38 = vsub.f32 %v5108_v55, %v1368_v42  ;;  %6064 = vmatprep.subr.bf16.mxu1 %v7933_v27 }
 0x266   :  { %v963_v0 = vsub.f32 %v7884_v6, %v947_v36  ;;  %v962_v12 = vsub.f32 %v7877_v37, %v946_v44  ;;  %v5111_v36 = vld [vmem:[%s9722_s1 + $0x1d8] sm:$0xff]  ;;  %v7961_v8 = vpack.c.bf16 %v1383_v5, %v1382_v14 }
 0x267   :  { %v961_v63 = vsub.f32 %v7896_v50, %v945_v58  ;;  %v7930_v7 = vpop.f32.mrb[8].mxu1  ;;  %v960_v32 = vsub.f32 %v7882_v51, %v944_v61  ;;  %v5113_v61 = vld [vmem:[%s9722_s1 + $0x1e8] sm:$0xff]  ;;  %v7963_v29 = vpack.c.bf16 %v5111_v36, %v5110_v9  ;;  %6065 = vmatpush3.bf16.msra.mxu1 %v7933_v27 }
 0x268   :  { %9958 = vst [vmem:[#allocation50_spill] sm:$0xff] %v7930_v7  ;;  %v7942_v44 = vpop.f32.mrb[9].mxu1  ;;  %5967 = vmatpush3.bf16.msra.mxu0 %v973_v57  ;;  %v975_v58 = vpack.c.bf16 %v963_v0, %v962_v12  ;;  %9963 = vst [vmem:[#allocation55_spill] sm:$0xff] %v7961_v8  ;;  %v7969_v12 = vpack.c.bf16 %v5113_v61, %v5112_v45  ;;  %6066 = vmatprep.subr.bf16.mxu1 %v7961_v8 }
 0x269   :  { %9960 = vst [vmem:[#allocation52_spill] sm:$0xff] %v7942_v44  ;;  %v7950_v23 = vpop.f32.mrb[10].mxu1  ;;  %v974_v53 = vpack.c.bf16 %v961_v63, %v960_v32  ;;  %9964 = vst [vmem:[#allocation56_spill] sm:$0xff] %v7963_v29  ;;  %v1385_v32 = vsub.f32 %v5109_v21, %v1369_v41  ;;  %v1370_v47 = vunpack.c.l.bf16 %v7963_v29  ;;  %v1371_v5 = vunpack.c.h.bf16 %v7963_v29 }
 0x26a   :  { %9961 = vst [vmem:[#allocation53_spill] sm:$0xff] %v7950_v23  ;;  %v7956_v0 = vpack.c.bf16 %v7950_v23, %v7930_v7  ;;  %v7958_v57 = vpop.f32.mrb[11].mxu1  ;;  %9965 = vst [vmem:[#allocation57_spill] sm:$0xff] %v7969_v12  ;;  %v1372_v41 = vunpack.c.l.bf16 %v7969_v12  ;;  %v1373_v15 = vunpack.c.h.bf16 %v7969_v12 }
 0x26b   :  { %9962 = vst [vmem:[#allocation54_spill] sm:$0xff] %v7958_v57  ;;  %v7967_v63 = vpack.c.bf16 %v7958_v57, %v7942_v44  ;;  %5968 = vmatprep.subr.bf16.mxu0 %v974_v53  ;;  %v7978_v33 = vpack.c.bf16 %v1385_v32, %v1384_v38  ;;  %v1386_v4 = vsub.f32 %v5110_v9, %v1370_v47 }
 0x26c   :  { %v951_v55 = vunpack.c.h.bf16 %v7956_v0  ;;  %5969 = vmatpush3.bf16.msra.mxu0 %v974_v53  ;;  %v950_v24 = vunpack.c.l.bf16 %v7956_v0  ;;  %v1387_v59 = vsub.f32 %v5111_v36, %v1371_v5  ;;  %6067 = vmatpush3.bf16.msra.mxu1 %v7961_v8  ;;  %v1388_v47 = vsub.f32 %v5112_v45, %v1372_v41 }
 0x26d   :  { %v949_v14 = vunpack.c.h.bf16 %v7967_v63  ;;  %5970 = vmatprep.subr.bf16.mxu0 %v975_v58  ;;  %v948_v42 = vunpack.c.l.bf16 %v7967_v63  ;;  %9966 = vst [vmem:[#allocation58_spill] sm:$0xff] %v7978_v33  ;;  %6068 = vmatprep.subr.bf16.mxu1 %v7978_v33  ;;  %v1389_v5 = vsub.f32 %v5113_v61, %v1373_v15 }
 0x26e   :  { %v967_v21 = vsub.f32 %v7950_v23, %v951_v55  ;;  %v966_v53 = vsub.f32 %v7930_v7, %v950_v24  ;;  %v8001_v24 = vpack.c.bf16 %v1387_v59, %v1386_v4 }
 0x26f   :  { %v965_v40 = vsub.f32 %v7958_v57, %v949_v14  ;;  %v7985_v31 = vpop.f32.mrb[12].mxu1  ;;  %v964_v25 = vsub.f32 %v7942_v44, %v948_v42  ;;  %v8015_v4 = vpack.c.bf16 %v1389_v5, %v1388_v47  ;;  %v8039_v47 = vld [vmem:[%s9722_s1 + $0x128] sm:$0xff]  ;;  %v8130_v57 = vld [vmem:[%s9722_s1 + $0x178] sm:$0xff] }
 0x270   :  { %9967 = vst [vmem:[#allocation59_spill] sm:$0xff] %v7985_v31  ;;  %v7989_v38 = vpop.f32.mrb[13].mxu1  ;;  %5971 = vmatpush3.bf16.msra.mxu0 %v975_v58  ;;  %v977_v32 = vpack.c.bf16 %v967_v21, %v966_v53  ;;  %9971 = vst [vmem:[#allocation63_spill] sm:$0xff] %v8001_v24  ;;  %6069 = vmatpush3.bf16.msra.mxu1 %v7978_v33  ;;  %v8024_v53 = vld [vmem:[%s9722_s1 + $0x110] sm:$0xff] }
 0x271   :  { %9968 = vst [vmem:[#allocation60_spill] sm:$0xff] %v7989_v38  ;;  %v7991_v50 = vpop.f32.mrb[14].mxu1  ;;  %v976_v55 = vpack.c.bf16 %v965_v40, %v964_v25  ;;  %6070 = vmatprep.subr.bf16.mxu1 %v8001_v24  ;;  %9972 = vst [vmem:[#allocation64_spill] sm:$0xff] %v8015_v4 }
 0x272   :  { %9969 = vst [vmem:[#allocation61_spill] sm:$0xff] %v7991_v50  ;;  %v7996_v9 = vpack.c.bf16 %v7991_v50, %v7985_v31  ;;  %v7998_v36 = vpop.f32.mrb[15].mxu1 }
 0x273   :  { %9970 = vst [vmem:[#allocation62_spill] sm:$0xff] %v7998_v36  ;;  %v8005_v58 = vpack.c.bf16 %v7998_v36, %v7989_v38  ;;  %5972 = vmatprep.subr.bf16.mxu0 %v976_v55 }
 0x274   :  { %v955_v25 = vunpack.c.h.bf16 %v7996_v9  ;;  %5973 = vmatpush3.bf16.msra.mxu0 %v976_v55  ;;  %v954_v40 = vunpack.c.l.bf16 %v7996_v9  ;;  %6071 = vmatpush3.bf16.msra.mxu1 %v8001_v24  ;;  %v8029_v55 = vld [vmem:[%s9722_s1 + $0x118] sm:$0xff] }
 0x275   :  { %v953_v14 = vunpack.c.h.bf16 %v8005_v58  ;;  %5974 = vmatprep.subr.bf16.mxu0 %v977_v32  ;;  %v952_v42 = vunpack.c.l.bf16 %v8005_v58  ;;  %6072 = vmatprep.subr.bf16.mxu1 %v8015_v4  ;;  %v8044_v5 = vpack.c.bf16 %v8029_v55, %v8024_v53 }
 0x276   :  { %v971_v59 = vsub.f32 %v7991_v50, %v955_v25  ;;  %v970_v15 = vsub.f32 %v7985_v31, %v954_v40  ;;  %v8057_v40 = vld [vmem:[%s9722_s1 + $0x130] sm:$0xff] }
 0x277   :  { %v969_v45 = vsub.f32 %v7998_v36, %v953_v14  ;;  %v968_v61 = vsub.f32 %v7989_v38, %v952_v42  ;;  %9973 = vst [vmem:[#allocation65_spill] sm:$0xff] %v8044_v5  ;;  %v8062_v14 = vld [vmem:[%s9722_s1 + $0x138] sm:$0xff]  ;;  %v8068_v42 = vld [vmem:[%s9722_s1 + $0x140] sm:$0xff]  ;;  %v8107_v36 = vld [vmem:[%s9722_s1 + $0x168] sm:$0xff] }
 0x278   :  { %5975 = vmatpush3.bf16.msra.mxu0 %v977_v32  ;;  %v979_v41 = vpack.c.bf16 %v971_v59, %v970_v15  ;;  %v8034_v32 = vld [vmem:[%s9722_s1 + $0x120] sm:$0xff]  ;;  %6073 = vmatpush3.bf16.msra.mxu1 %v8015_v4  ;;  %v8073_v59 = vld [vmem:[%s9722_s1 + $0x148] sm:$0xff]  ;;  %v8077_v15 = vpack.c.bf16 %v8062_v14, %v8057_v40  ;;  %v8125_v31 = vld [vmem:[%s9722_s1 + $0x170] sm:$0xff] }
 0x279   :  { %v978_v21 = vpack.c.bf16 %v969_v45, %v968_v61  ;;  %v8048_v25 = vpack.c.bf16 %v8039_v47, %v8034_v32  ;;  %v8082_v45 = vpack.c.bf16 %v8073_v59, %v8068_v42  ;;  %v8091_v61 = vld [vmem:[%s9722_s1 + $0x150] sm:$0xff]  ;;  %v8135_v23 = vpack.c.bf16 %v8130_v57, %v8125_v31 }
 0x27a   :  { %9975 = vst [vmem:[#allocation67_spill] sm:$0xff] %v8077_v15  ;;  %v898_v51 = vunpack.c.l.bf16 %v8077_v15  ;;  %v899_v37 = vunpack.c.h.bf16 %v8077_v15 }
 0x27b   :  { %5976 = vmatprep.subr.bf16.mxu0 %v978_v21  ;;  %9974 = vst [vmem:[#allocation66_spill] sm:$0xff] %v8048_v25  ;;  %9976 = vst [vmem:[#allocation68_spill] sm:$0xff] %v8082_v45 }
 0x27c   :  { %5977 = vmatpush3.bf16.msra.mxu0 %v978_v21  ;;  %v8102_v21 = vld [vmem:[%s9722_s1 + $0x160] sm:$0xff]  ;;  %9979 = vst [vmem:[#allocation71_spill] sm:$0xff] %v8135_v23 }
 0x27d   :  { %5978 = vmatprep.subr.bf16.mxu0 %v979_v41  ;;  %v8116_v38 = vpack.c.bf16 %v8107_v36, %v8102_v21 }
 0x27f   :  { %9978 = vst [vmem:[#allocation70_spill] sm:$0xff] %v8116_v38 }
 0x280   :  { %5979 = vmatpush3.bf16.msra.mxu0 %v979_v41  ;;  %v8096_v41 = vld [vmem:[%s9722_s1 + $0x158] sm:$0xff] }
 0x281   :  { %5996 = vmatprep.subr.bf16.mxu0 %v7842_v3  ;;  %v8111_v50 = vpack.c.bf16 %v8096_v41, %v8091_v61 }
 0x283   :  { %5981 = vmatmul.mubr.bf16.vlgmr.msra.gmra.mrb[16].mxu0 %v8044_v5  ;;  %9977 = vst [vmem:[#allocation69_spill] sm:$0xff] %v8111_v50 }
 0x284   :  { %5997 = vmatpush3.bf16.msra.mxu0 %v7842_v3  ;;  %5984 = vmatprep.mubr.bf16.mxu0 %v8048_v25 }
 0x285   :  { %5998 = vmatprep.subr.bf16.mxu0 %v7836_v34 }
 0x288   :  { %5999 = vmatpush3.bf16.msra.mxu0 %v7836_v34 }
 0x289   :  { %6000 = vmatprep.subr.bf16.mxu0 %v7909_v56 }
 0x28b   :  { %5985 = vmatmul.mubr.bf16.gmra.mrb[20].mxu0 %v8077_v15 }
 0x28c   :  { %6001 = vmatpush3.bf16.msra.mxu0 %v7909_v56  ;;  %5988 = vmatprep.mubr.bf16.mxu0 %v8082_v45 }
 0x28d   :  { %6002 = vmatprep.subr.bf16.mxu0 %v7894_v22 }
 0x290   :  { %6003 = vmatpush3.bf16.msra.mxu0 %v7894_v22 }
 0x291   :  { %6004 = vmatprep.subr.bf16.mxu0 %v7967_v63 }
 0x293   :  { %5989 = vmatmul.mubr.bf16.gmra.mrb[24].mxu0 %v8111_v50 }
 0x294   :  { %6005 = vmatpush3.bf16.msra.mxu0 %v7967_v63  ;;  %5992 = vmatprep.mubr.bf16.mxu0 %v8116_v38 }
 0x295   :  { %6006 = vmatprep.subr.bf16.mxu0 %v7956_v0 }
 0x298   :  { %6007 = vmatpush3.bf16.msra.mxu0 %v7956_v0 }
 0x299   :  { %6008 = vmatprep.subr.bf16.mxu0 %v8005_v58 }
 0x29b   :  { %5993 = vmatmul.mubr.bf16.gmra.mrb[28].mxu0 %v8135_v23 }
 0x29c   :  { %6009 = vmatpush3.bf16.msra.mxu0 %v8005_v58  ;;  %6012 = vmatprep.mubr.bf16.mxu0 %v7821_v52 }
 0x29d   :  { %6010 = vmatprep.subr.bf16.mxu0 %v7996_v9 }
 0x2a0   :  { %6011 = vmatpush3.bf16.msra.mxu0 %v7996_v9 }
 0x2a1   :  { %6028 = vmatprep.subr.bf16.mxu0 %v7842_v3 }
 0x2a3   :  { %6013 = vmatmul.mubr.bf16.vlgmr.msra.gmra.mrb[16].mxu0 %v8044_v5 }
 0x2a4   :  { %6029 = vmatpush3.bf16.msra.mxu0 %v7842_v3  ;;  %6016 = vmatprep.mubr.bf16.mxu0 %v8048_v25  ;;  %v895_v3 = vunpack.c.h.bf16 %v8044_v5 }
 0x2a5   :  { %6030 = vmatprep.subr.bf16.mxu0 %v7836_v34 }
 0x2a6   :  { %v911_v44 = vsub.f32 %v8029_v55, %v895_v3  ;;  %v901_v55 = vunpack.c.h.bf16 %v8082_v45 }
 0x2a8   :  { %6031 = vmatpush3.bf16.msra.mxu0 %v7836_v34  ;;  %v894_v34 = vunpack.c.l.bf16 %v8044_v5 }
 0x2a9   :  { %6032 = vmatprep.subr.bf16.mxu0 %v7909_v56 }
 0x2ab   :  { %6017 = vmatmul.mubr.bf16.gmra.mrb[20].mxu0 %v8077_v15 }
 0x2ac   :  { %6033 = vmatpush3.bf16.msra.mxu0 %v7909_v56  ;;  %6020 = vmatprep.mubr.bf16.mxu0 %v8082_v45  ;;  %v896_v56 = vunpack.c.l.bf16 %v8048_v25 }
 0x2ad   :  { %6034 = vmatprep.subr.bf16.mxu0 %v7894_v22 }
 0x2ae   :  { %v912_v7 = vsub.f32 %v8034_v32, %v896_v56  ;;  %v914_v32 = vsub.f32 %v8057_v40, %v898_v51  ;;  %v905_v51 = vunpack.c.h.bf16 %v8116_v38 }
 0x2b0   :  { %6035 = vmatpush3.bf16.msra.mxu0 %v7894_v22  ;;  %v897_v22 = vunpack.c.h.bf16 %v8048_v25 }
 0x2b1   :  { %6036 = vmatprep.subr.bf16.mxu0 %v7967_v63 }
 0x2b3   :  { %6021 = vmatmul.mubr.bf16.gmra.mrb[24].mxu0 %v8111_v50 }
 0x2b4   :  { %6037 = vmatpush3.bf16.msra.mxu0 %v7967_v63  ;;  %6024 = vmatprep.mubr.bf16.mxu0 %v8116_v38  ;;  %v910_v63 = vsub.f32 %v8024_v53, %v894_v34  ;;  %v917_v34 = vsub.f32 %v8073_v59, %v901_v55 }
 0x2b5   :  { %6038 = vmatprep.subr.bf16.mxu0 %v7956_v0 }
 0x2b6   :  { %v8175_v6 = vpack.c.bf16 %v911_v44, %v910_v63  ;;  %v906_v63 = vunpack.c.l.bf16 %v8135_v23 }
 0x2b8   :  { %6039 = vmatpush3.bf16.msra.mxu0 %v7956_v0  ;;  %v913_v0 = vsub.f32 %v8039_v47, %v897_v22  ;;  %9980 = vst [vmem:[#allocation72_spill] sm:$0xff] %v8175_v6  ;;  %v915_v47 = vsub.f32 %v8062_v14, %v899_v37  ;;  %v904_v22 = vunpack.c.l.bf16 %v8116_v38 }
 0x2b9   :  { %6040 = vmatprep.subr.bf16.mxu0 %v8005_v58 }
 0x2ba   :  { %v8180_v53 = vpack.c.bf16 %v913_v0, %v912_v7  ;;  %v8190_v3 = vpack.c.bf16 %v915_v47, %v914_v32  ;;  %v902_v7 = vunpack.c.l.bf16 %v8111_v50  ;;  %v920_v14 = vsub.f32 %v8102_v21, %v904_v22  ;;  %v5115_v21 = vld [vmem:[%s9722_s1 + $0x1f8] sm:$0xff] }
 0x2bb   :  { %6025 = vmatmul.mubr.bf16.gmra.mrb[28].mxu0 %v8135_v23  ;;  %v907_v0 = vunpack.c.h.bf16 %v8135_v23 }
 0x2bc   :  { %6041 = vmatpush3.bf16.msra.mxu0 %v8005_v58  ;;  %6044 = vmatprep.mubr.bf16.mxu0 %v7826_v10  ;;  %9981 = vst [vmem:[#allocation73_spill] sm:$0xff] %v8180_v53  ;;  %v900_v58 = vunpack.c.l.bf16 %v8082_v45  ;;  %9982 = vst [vmem:[#allocation74_spill] sm:$0xff] %v8190_v3  ;;  %v918_v37 = vsub.f32 %v8091_v61, %v902_v7  ;;  %v922_v61 = vsub.f32 %v8125_v31, %v906_v63 }
 0x2bd   :  { %6042 = vmatprep.subr.bf16.mxu0 %v7996_v9 }
 0x2be   :  { %v916_v44 = vsub.f32 %v8068_v42, %v900_v58  ;;  %v921_v42 = vsub.f32 %v8107_v36, %v905_v51  ;;  %v5114_v36 = vld [vmem:[%s9722_s1 + $0x1f0] sm:$0xff] }
 0x2bf   :  { %v8223_v32 = vpack.c.bf16 %v5115_v21, %v5114_v36 }
 0x2c0   :  { %6043 = vmatpush3.bf16.msra.mxu0 %v7996_v9  ;;  %v903_v9 = vunpack.c.h.bf16 %v8111_v50  ;;  %v8194_v56 = vpack.c.bf16 %v917_v34, %v916_v44  ;;  %v8208_v58 = vpack.c.bf16 %v921_v42, %v920_v14 }
 0x2c1   :  { %9987 = vst [vmem:[#allocation79_spill] sm:$0xff] %v8223_v32  ;;  %v1374_v31 = vunpack.c.l.bf16 %v8223_v32 }
 0x2c2   :  { %9983 = vst [vmem:[#allocation75_spill] sm:$0xff] %v8194_v56  ;;  %v919_v40 = vsub.f32 %v8096_v41, %v903_v9  ;;  %9985 = vst [vmem:[#allocation77_spill] sm:$0xff] %v8208_v58  ;;  %v923_v41 = vsub.f32 %v8130_v57, %v907_v0  ;;  %v1375_v57 = vunpack.c.h.bf16 %v8223_v32 }
 0x2c3   :  { %6045 = vmatmul.mubr.bf16.vlgmr.msra.gmra.mrb[16].mxu0 %v8175_v6  ;;  %v1390_v47 = vsub.f32 %v5114_v36, %v1374_v31 }
 0x2c4   :  { %6048 = vmatprep.mubr.bf16.mxu0 %v8180_v53  ;;  %v8204_v59 = vpack.c.bf16 %v919_v40, %v918_v37  ;;  %v8214_v55 = vpack.c.bf16 %v923_v41, %v922_v61  ;;  %v1391_v44 = vsub.f32 %v5115_v21, %v1375_v57 }
 0x2c6   :  { %9984 = vst [vmem:[#allocation76_spill] sm:$0xff] %v8204_v59  ;;  %9986 = vst [vmem:[#allocation78_spill] sm:$0xff] %v8214_v55  ;;  %v8227_v34 = vpack.c.bf16 %v1391_v44, %v1390_v47 }
 0x2c8   :  { %9988 = vst [vmem:[#allocation80_spill] sm:$0xff] %v8227_v34  ;;  %6074 = vmatprep.subr.bf16.mxu1 %v8227_v34 }
 0x2c9   :  { %6075 = vmatpush3.bf16.msra.mxu1 %v8227_v34 }
 0x2ca   :  { %6092 = vmatprep.subr.bf16.mxu1 %v7855_v19 }
 0x2cb   :  { %6049 = vmatmul.mubr.bf16.gmra.mrb[20].mxu0 %v8190_v3 }
 0x2cc   :  { %6052 = vmatprep.mubr.bf16.mxu0 %v8194_v56 }
 0x2d3   :  { %6053 = vmatmul.mubr.bf16.gmra.mrb[24].mxu0 %v8204_v59 }
 0x2d4   :  { %6056 = vmatprep.mubr.bf16.mxu0 %v8208_v58 }
 0x2db   :  { %6057 = vmatmul.mubr.bf16.gmra.mrb[28].mxu0 %v8214_v55 }
 0x396   :  { %v6046_v7 = vpop.f32.mrb[16].mxu0 }
 0x397   :  { %v1208_v9 = vpop.f32.mrb[17].mxu0 }
 0x398   :  { %v6047_v22 = vpop.f32.mrb[18].mxu0 }
 0x399   :  { %v8232_v51 = vpack.c.bf16 %v6047_v22, %v6046_v7  ;;  %v1211_v37 = vpop.f32.mrb[19].mxu0 }
 0x39a   :  { %v8234_v40 = vpack.c.bf16 %v1211_v37, %v1208_v9 }
 0x39b   :  { %v1314_v14 = vunpack.c.l.bf16 %v8232_v51  ;;  %v1315_v42 = vunpack.c.h.bf16 %v8232_v51 }
 0x39c   :  { %v1312_v63 = vunpack.c.l.bf16 %v8234_v40  ;;  %v1313_v0 = vunpack.c.h.bf16 %v8234_v40  ;;  %6076 = vmatprep.mubr.bf16.mxu1 %v8234_v40 }
 0x39d   :  { %v8241_v61 = vsub.f32 %v6046_v7, %v1314_v14  ;;  %v8243_v41 = vsub.f32 %v6047_v22, %v1315_v42  ;;  %6077 = vmatmul.mubr.bf16.vlgmr.msra.gmra.mrb[16].mxu1 %v8232_v51 }
 0x39e   :  { %v8246_v36 = vsub.f32 %v1208_v9, %v1312_v63  ;;  %v8248_v21 = vsub.f32 %v1211_v37, %v1313_v0  ;;  %v6050_v31 = vpop.f32.mrb[20].mxu0  ;;  %6093 = vmatpush3.bf16.msra.mxu1 %v7855_v19 }
 0x39f   :  { %v1224_v47 = vpop.f32.mrb[21].mxu0  ;;  %6094 = vmatprep.subr.bf16.mxu1 %v7868_v54 }
 0x3a0   :  { %v6051_v7 = vpop.f32.mrb[22].mxu0 }
 0x3a1   :  { %v8256_v22 = vpack.c.bf16 %v6051_v7, %v6050_v31  ;;  %v1227_v14 = vpop.f32.mrb[23].mxu0 }
 0x3a2   :  { %v8258_v9 = vpack.c.bf16 %v1227_v14, %v1224_v47  ;;  %6095 = vmatpush3.bf16.msra.mxu1 %v7868_v54 }
 0x3a3   :  { %v1318_v37 = vunpack.c.l.bf16 %v8256_v22  ;;  %v1319_v42 = vunpack.c.h.bf16 %v8256_v22  ;;  %6096 = vmatprep.subr.bf16.mxu1 %v7870_v46 }
 0x3a4   :  { %v1316_v63 = vunpack.c.l.bf16 %v8258_v9  ;;  %v1317_v0 = vunpack.c.h.bf16 %v8258_v9  ;;  %6080 = vmatprep.mubr.bf16.mxu1 %v8258_v9 }
 0x3a5   :  { %v8267_v57 = vsub.f32 %v6050_v31, %v1318_v37  ;;  %v8269_v44 = vsub.f32 %v6051_v7, %v1319_v42  ;;  %6081 = vmatmul.mubr.bf16.gmra.mrb[20].mxu1 %v8256_v22 }
 0x3a6   :  { %v8272_v39 = vsub.f32 %v1224_v47, %v1316_v63  ;;  %v8274_v30 = vsub.f32 %v1227_v14, %v1317_v0  ;;  %v6054_v28 = vpop.f32.mrb[24].mxu0  ;;  %6097 = vmatpush3.bf16.msra.mxu1 %v7870_v46 }
 0x3a7   :  { %v1240_v43 = vpop.f32.mrb[25].mxu0  ;;  %6098 = vmatprep.subr.bf16.mxu1 %v7917_v35 }
 0x3a8   :  { %v6055_v7 = vpop.f32.mrb[26].mxu0 }
 0x3a9   :  { %v1309_v37 = vpack.c.bf16 %v6055_v7, %v6054_v28  ;;  %v1243_v42 = vpop.f32.mrb[27].mxu0 }
 0x3aa   :  { %v1308_v26 = vpack.c.bf16 %v1243_v42, %v1240_v43  ;;  %6099 = vmatpush3.bf16.msra.mxu1 %v7917_v35 }
 0x3ab   :  { %v1322_v47 = vunpack.c.l.bf16 %v1309_v37  ;;  %v1323_v14 = vunpack.c.h.bf16 %v1309_v37  ;;  %6100 = vmatprep.subr.bf16.mxu1 %v7922_v18 }
 0x3ac   :  { %v1320_v63 = vunpack.c.l.bf16 %v1308_v26  ;;  %v1321_v0 = vunpack.c.h.bf16 %v1308_v26  ;;  %6084 = vmatprep.mubr.bf16.mxu1 %v1308_v26 }
 0x3ad   :  { %v1338_v16 = vsub.f32 %v6054_v28, %v1322_v47  ;;  %v1339_v20 = vsub.f32 %v6055_v7, %v1323_v14  ;;  %6085 = vmatmul.mubr.bf16.gmra.mrb[24].mxu1 %v1309_v37 }
 0x3ae   :  { %v1336_v17 = vsub.f32 %v1240_v43, %v1320_v63  ;;  %v1337_v1 = vsub.f32 %v1243_v42, %v1321_v0  ;;  %v6058_v60 = vpop.f32.mrb[28].mxu0  ;;  %6101 = vmatpush3.bf16.msra.mxu1 %v7922_v18  ;;  %v5135_v63 = vld [vmem:[%s9722_s1 + $0x298] sm:$0xff]  ;;  %v5136_v0 = vld [vmem:[%s9722_s1 + $0x2a0] sm:$0xff] }
 0x3af   :  { %v1349_v31 = vpack.c.bf16 %v1339_v20, %v1338_v16  ;;  %v1256_v49 = vpop.f32.mrb[29].mxu0  ;;  %6102 = vmatprep.subr.bf16.mxu1 %v7963_v29 }
 0x3b0   :  { %v1348_v48 = vpack.c.bf16 %v1337_v1, %v1336_v17  ;;  %v6059_v62 = vpop.f32.mrb[30].mxu0 }
 0x3b1   :  { %v1311_v23 = vpack.c.bf16 %v6059_v62, %v6058_v60  ;;  %v1259_v38 = vpop.f32.mrb[31].mxu0 }
 0x3b2   :  { %v1310_v50 = vpack.c.bf16 %v1259_v38, %v1256_v49  ;;  %6103 = vmatpush3.bf16.msra.mxu1 %v7963_v29 }
 0x3b3   :  { %v1326_v45 = vunpack.c.l.bf16 %v1311_v23  ;;  %v1327_v28 = vunpack.c.h.bf16 %v1311_v23  ;;  %6104 = vmatprep.subr.bf16.mxu1 %v7969_v12 }
 0x3b4   :  { %v1324_v43 = vunpack.c.l.bf16 %v1310_v50  ;;  %v1325_v7 = vunpack.c.h.bf16 %v1310_v50  ;;  %6088 = vmatprep.mubr.bf16.mxu1 %v1310_v50 }
 0x3b5   :  { %v1342_v42 = vsub.f32 %v6058_v60, %v1326_v45  ;;  %v1343_v47 = vsub.f32 %v6059_v62, %v1327_v28  ;;  %6089 = vmatmul.mubr.bf16.gmra.mrb[28].mxu1 %v1311_v23  ;;  %v9989_v62 = vpack.c.bf16 %v8248_v21, %v8246_v36  ;;  %v9991_v60 = vpack.c.bf16 %v8274_v30, %v8272_v39  ;;  %v5137_v28 = vld [vmem:[%s9722_s1 + $0x2a8] sm:$0xff] }
 0x3b6   :  { %v1340_v20 = vsub.f32 %v1256_v49, %v1324_v43  ;;  %v1341_v16 = vsub.f32 %v1259_v38, %v1325_v7  ;;  %6105 = vmatpush3.bf16.msra.mxu1 %v7969_v12  ;;  %6108 = vmatprep.mubr.bf16.mxu1 %v8234_v40  ;;  %v9990_v49 = vpack.c.bf16 %v8243_v41, %v8241_v61 }
 0x3b7   :  { %v1351_v1 = vpack.c.bf16 %v1343_v47, %v1342_v42  ;;  %6106 = vmatprep.subr.bf16.mxu1 %v8223_v32  ;;  %v8378_v47 = vpack.c.bf16 %v5137_v28, %v5136_v0 }
 0x3b8   :  { %v1350_v17 = vpack.c.bf16 %v1341_v16, %v1340_v20 }
 0x3ba   :  { %6107 = vmatpush3.bf16.msra.mxu1 %v8223_v32 }
 0x3bb   :  { %6124 = vmatprep.subr.bf16.mxu1 %v7855_v19 }
 0x3bd   :  { %6109 = vmatmul.mubr.bf16.vlgmr.msra.gmra.mrb[16].mxu1 %v8232_v51 }
 0x3be   :  { %6112 = vmatprep.mubr.bf16.mxu1 %v8258_v9  ;;  %6125 = vmatpush3.bf16.msra.mxu1 %v7855_v19  ;;  %v5134_v9 = vld [vmem:[%s9722_s1 + $0x290] sm:$0xff] }
 0x3bf   :  { %6126 = vmatprep.subr.bf16.mxu1 %v7868_v54  ;;  %v8376_v42 = vpack.c.bf16 %v5135_v63, %v5134_v9 }
 0x3c2   :  { %6127 = vmatpush3.bf16.msra.mxu1 %v7868_v54 }
 0x3c3   :  { %6128 = vmatprep.subr.bf16.mxu1 %v7870_v46 }
 0x3c5   :  { %6113 = vmatmul.mubr.bf16.gmra.mrb[20].mxu1 %v8256_v22  ;;  %v5133_v22 = vld [vmem:[%s9722_s1 + $0x288] sm:$0xff] }
 0x3c6   :  { %6116 = vmatprep.mubr.bf16.mxu1 %v1308_v26  ;;  %6129 = vmatpush3.bf16.msra.mxu1 %v7870_v46  ;;  %v9992_v26 = vpack.c.bf16 %v8269_v44, %v8267_v57  ;;  %v5132_v44 = vld [vmem:[%s9722_s1 + $0x280] sm:$0xff] }
 0x3c7   :  { %6130 = vmatprep.subr.bf16.mxu1 %v7917_v35  ;;  %v8363_v14 = vpack.c.bf16 %v5133_v22, %v5132_v44 }
 0x3ca   :  { %6131 = vmatpush3.bf16.msra.mxu1 %v7917_v35 }
 0x3cb   :  { %6132 = vmatprep.subr.bf16.mxu1 %v7922_v18 }
 0x3cd   :  { %6117 = vmatmul.mubr.bf16.gmra.mrb[24].mxu1 %v1309_v37 }
 0x3ce   :  { %6120 = vmatprep.mubr.bf16.mxu1 %v1310_v50  ;;  %6133 = vmatpush3.bf16.msra.mxu1 %v7922_v18  ;;  %v5116_v50 = vld [vmem:[%s9722_s1 + $0x200] sm:$0xff] }
 0x3cf   :  { %6134 = vmatprep.subr.bf16.mxu1 %v7963_v29 }
 0x3d2   :  { %6135 = vmatpush3.bf16.msra.mxu1 %v7963_v29 }
 0x3d3   :  { %6136 = vmatprep.subr.bf16.mxu1 %v7969_v12 }
 0x3d5   :  { %6121 = vmatmul.mubr.bf16.gmra.mrb[28].mxu1 %v1311_v23  ;;  %v5117_v23 = vld [vmem:[%s9722_s1 + $0x208] sm:$0xff] }
 0x3d6   :  { %6137 = vmatpush3.bf16.msra.mxu1 %v7969_v12  ;;  %6140 = vmatprep.mubr.bf16.mxu1 %v9989_v62  ;;  %v8329_v38 = vpack.c.bf16 %v5117_v23, %v5116_v50 }
 0x3d7   :  { %6138 = vmatprep.subr.bf16.mxu1 %v8223_v32 }
 0x3d8   :  { %6172 = vmatprep.mubr.bf16.mxu0 %v8329_v38  ;;  %v1732_v30 = vunpack.c.l.bf16 %v8329_v38  ;;  %v1733_v39 = vunpack.c.h.bf16 %v8329_v38 }
 0x3da   :  { %6139 = vmatpush3.bf16.msra.mxu1 %v8223_v32  ;;  %v1749_v45 = vsub.f32 %v5117_v23, %v1733_v39 }
 0x3dd   :  { %6141 = vmatmul.mubr.bf16.vlgmr.msra.gmra.mrb[16].mxu1 %v9990_v49 }
 0x3de   :  { %6144 = vmatprep.mubr.bf16.mxu1 %v9991_v60 }
 0x3e5   :  { %6145 = vmatmul.mubr.bf16.gmra.mrb[20].mxu1 %v9992_v26  ;;  %v2202_v26 = vunpack.c.l.bf16 %v8376_v42 }
 0x3e6   :  { %6148 = vmatprep.mubr.bf16.mxu1 %v1348_v48  ;;  %v1748_v48 = vsub.f32 %v5116_v50, %v1732_v30  ;;  %v2203_v50 = vunpack.c.h.bf16 %v8376_v42 }
 0x3e8   :  { %v8334_v51 = vpack.c.bf16 %v1749_v45, %v1748_v48  ;;  %v2219_v15 = vsub.f32 %v5135_v63, %v2203_v50  ;;  %v5141_v63 = vld [vmem:[%s9722_s1 + $0x2c8] sm:$0xff] }
 0x3ed   :  { %6149 = vmatmul.mubr.bf16.gmra.mrb[24].mxu1 %v1349_v31 }
 0x3ee   :  { %6152 = vmatprep.mubr.bf16.mxu1 %v1350_v17  ;;  %v2201_v17 = vunpack.c.h.bf16 %v8363_v14 }
 0x3f0   :  { %v2217_v48 = vsub.f32 %v5133_v22, %v2201_v17  ;;  %v2204_v22 = vunpack.c.l.bf16 %v8378_v47  ;;  %v2205_v17 = vunpack.c.h.bf16 %v8378_v47 }
 0x3f5   :  { %6153 = vmatmul.mubr.bf16.gmra.mrb[28].mxu1 %v1351_v1  ;;  %v2200_v1 = vunpack.c.l.bf16 %v8363_v14 }
 0x3f7   :  { %v2216_v39 = vsub.f32 %v5132_v44, %v2200_v1 }
 0x3f9   :  { %v8406_v44 = vpack.c.bf16 %v2217_v48, %v2216_v39 }
 0x3fb   :  { %6252 = vmatprep.subr.bf16.mxu1 %v8406_v44 }
 0x3fc   :  { %6253 = vmatpush3.bf16.msra.mxu1 %v8406_v44 }
 0x4b0   :  { %v8336_v40 = vpop.f32.mrb[16].mxu1 }
 0x4b1   :  { %9993 = vst [vmem:[#allocation81_spill] sm:$0xff] %v8336_v40  ;;  %v8338_v61 = vpop.f32.mrb[17].mxu1 }
 0x4b2   :  { %9994 = vst [vmem:[#allocation82_spill] sm:$0xff] %v8338_v61  ;;  %v8340_v41 = vpop.f32.mrb[18].mxu1 }
 0x4b3   :  { %9995 = vst [vmem:[#allocation83_spill] sm:$0xff] %v8340_v41  ;;  %v8344_v36 = vpack.c.bf16 %v8340_v41, %v8336_v40  ;;  %v8346_v21 = vpop.f32.mrb[19].mxu1 }
 0x4b4   :  { %9996 = vst [vmem:[#allocation84_spill] sm:$0xff] %v8346_v21  ;;  %v8350_v57 = vpack.c.bf16 %v8346_v21, %v8338_v61 }
 0x4b5   :  { %v1783_v31 = vunpack.c.h.bf16 %v8344_v36  ;;  %v1782_v37 = vunpack.c.l.bf16 %v8344_v36 }
 0x4b6   :  { %v1781_v43 = vunpack.c.h.bf16 %v8350_v57  ;;  %v1780_v7 = vunpack.c.l.bf16 %v8350_v57 }
 0x4b7   :  { %v1799_v20 = vsub.f32 %v8340_v41, %v1783_v31  ;;  %v1798_v16 = vsub.f32 %v8336_v40, %v1782_v37  ;;  %v2218_v37 = vsub.f32 %v5134_v9, %v2202_v26  ;;  %v5140_v9 = vld [vmem:[%s9722_s1 + $0x2c0] sm:$0xff]  ;;  %v2220_v26 = vsub.f32 %v5136_v0, %v2204_v22 }
 0x4b8   :  { %v1797_v62 = vsub.f32 %v8346_v21, %v1781_v43  ;;  %v8385_v49 = vpop.f32.mrb[20].mxu1  ;;  %v1796_v60 = vsub.f32 %v8338_v61, %v1780_v7  ;;  %v5138_v43 = vld [vmem:[%s9722_s1 + $0x2b0] sm:$0xff]  ;;  %v5139_v7 = vld [vmem:[%s9722_s1 + $0x2b8] sm:$0xff] }
 0x4b9   :  { %9997 = vst [vmem:[#allocation85_spill] sm:$0xff] %v8385_v49  ;;  %v8390_v23 = vpop.f32.mrb[21].mxu1  ;;  %v1813_v30 = vpack.c.bf16 %v1799_v20, %v1798_v16  ;;  %v8419_v1 = vpack.c.bf16 %v2219_v15, %v2218_v37  ;;  %v8425_v50 = vpack.c.bf16 %v5139_v7, %v5138_v43  ;;  %v2221_v15 = vsub.f32 %v5137_v28, %v2205_v17  ;;  %v5142_v17 = vld [vmem:[%s9722_s1 + $0x2d0] sm:$0xff] }
 0x4ba   :  { %9998 = vst [vmem:[#allocation86_spill] sm:$0xff] %v8390_v23  ;;  %v8392_v45 = vpop.f32.mrb[22].mxu1  ;;  %v1812_v31 = vpack.c.bf16 %v1797_v62, %v1796_v60  ;;  %v8430_v37 = vpack.c.bf16 %v5141_v63, %v5140_v9 }
 0x4bb   :  { %9999 = vst [vmem:[#allocation87_spill] sm:$0xff] %v8392_v45  ;;  %v8402_v25 = vpack.c.bf16 %v8392_v45, %v8385_v49  ;;  %v8404_v20 = vpop.f32.mrb[23].mxu1  ;;  %6254 = vmatprep.subr.bf16.mxu1 %v8419_v1  ;;  %v2206_v0 = vunpack.c.l.bf16 %v8425_v50  ;;  %v2207_v22 = vunpack.c.h.bf16 %v8425_v50  ;;  %v8441_v24 = vpack.c.bf16 %v2221_v15, %v2220_v26  ;;  %v5144_v26 = vld [vmem:[%s9722_s1 + $0x2e0] sm:$0xff] }
 0x4bc   :  { %10000 = vst [vmem:[#allocation88_spill] sm:$0xff] %v8404_v20  ;;  %v8417_v16 = vpack.c.bf16 %v8404_v20, %v8390_v23  ;;  %6156 = vmatprep.subr.bf16.mxu0 %v1812_v31  ;;  %v2208_v28 = vunpack.c.l.bf16 %v8430_v37  ;;  %6255 = vmatpush3.bf16.msra.mxu1 %v8419_v1  ;;  %v2209_v2 = vunpack.c.h.bf16 %v8430_v37 }
 0x4bd   :  { %v1787_v62 = vunpack.c.h.bf16 %v8402_v25  ;;  %6157 = vmatpush3.bf16.msra.mxu0 %v1812_v31  ;;  %v1786_v60 = vunpack.c.l.bf16 %v8402_v25  ;;  %v2222_v33 = vsub.f32 %v5138_v43, %v2206_v0  ;;  %v2223_v8 = vsub.f32 %v5139_v7, %v2207_v22  ;;  %6256 = vmatprep.subr.bf16.mxu1 %v8441_v24 }
 0x4be   :  { %v1785_v39 = vunpack.c.h.bf16 %v8417_v16  ;;  %6158 = vmatprep.subr.bf16.mxu0 %v1813_v30  ;;  %v1784_v48 = vunpack.c.l.bf16 %v8417_v16  ;;  %v2224_v13 = vsub.f32 %v5140_v9, %v2208_v28 }
 0x4bf   :  { %v1803_v5 = vsub.f32 %v8392_v45, %v1787_v62  ;;  %v1802_v31 = vsub.f32 %v8385_v49, %v1786_v60  ;;  %v5143_v62 = vld [vmem:[%s9722_s1 + $0x2d8] sm:$0xff]  ;;  %v8469_v43 = vpack.c.bf16 %v2223_v8, %v2222_v33 }
 0x4c0   :  { %v1801_v11 = vsub.f32 %v8404_v20, %v1785_v39  ;;  %v8438_v34 = vpop.f32.mrb[24].mxu1  ;;  %v1800_v4 = vsub.f32 %v8390_v23, %v1784_v48  ;;  %v5145_v48 = vld [vmem:[%s9722_s1 + $0x2e8] sm:$0xff]  ;;  %v8471_v7 = vpack.c.bf16 %v5143_v62, %v5142_v17  ;;  %6257 = vmatpush3.bf16.msra.mxu1 %v8441_v24 }
 0x4c1   :  { %10001 = vst [vmem:[#allocation89_spill] sm:$0xff] %v8438_v34  ;;  %v8450_v60 = vpop.f32.mrb[25].mxu1  ;;  %6159 = vmatpush3.bf16.msra.mxu0 %v1813_v30  ;;  %v1815_v39 = vpack.c.bf16 %v1803_v5, %v1802_v31  ;;  %v8477_v31 = vpack.c.bf16 %v5145_v48, %v5144_v26  ;;  %6258 = vmatprep.subr.bf16.mxu1 %v8469_v43 }
 0x4c2   :  { %10002 = vst [vmem:[#allocation90_spill] sm:$0xff] %v8450_v60  ;;  %v8458_v15 = vpop.f32.mrb[26].mxu1  ;;  %v1814_v27 = vpack.c.bf16 %v1801_v11, %v1800_v4  ;;  %v2225_v4 = vsub.f32 %v5141_v63, %v2209_v2  ;;  %v2210_v22 = vunpack.c.l.bf16 %v8471_v7  ;;  %v2211_v33 = vunpack.c.h.bf16 %v8471_v7 }
 0x4c3   :  { %10003 = vst [vmem:[#allocation91_spill] sm:$0xff] %v8458_v15  ;;  %v8464_v5 = vpack.c.bf16 %v8458_v15, %v8438_v34  ;;  %v8466_v30 = vpop.f32.mrb[27].mxu1  ;;  %v2212_v2 = vunpack.c.l.bf16 %v8477_v31  ;;  %v2213_v54 = vunpack.c.h.bf16 %v8477_v31 }
 0x4c4   :  { %10004 = vst [vmem:[#allocation92_spill] sm:$0xff] %v8466_v30  ;;  %v8475_v11 = vpack.c.bf16 %v8466_v30, %v8450_v60  ;;  %6160 = vmatprep.subr.bf16.mxu0 %v1814_v27  ;;  %v8486_v32 = vpack.c.bf16 %v2225_v4, %v2224_v13  ;;  %v2226_v12 = vsub.f32 %v5142_v17, %v2210_v22 }
 0x4c5   :  { %v1791_v9 = vunpack.c.h.bf16 %v8464_v5  ;;  %6161 = vmatpush3.bf16.msra.mxu0 %v1814_v27  ;;  %v1790_v0 = vunpack.c.l.bf16 %v8464_v5  ;;  %v2227_v29 = vsub.f32 %v5143_v62, %v2211_v33  ;;  %6259 = vmatpush3.bf16.msra.mxu1 %v8469_v43  ;;  %v2228_v22 = vsub.f32 %v5144_v26, %v2212_v2 }
 0x4c6   :  { %v1789_v8 = vunpack.c.h.bf16 %v8475_v11  ;;  %6162 = vmatprep.subr.bf16.mxu0 %v1815_v39  ;;  %v1788_v28 = vunpack.c.l.bf16 %v8475_v11  ;;  %6260 = vmatprep.subr.bf16.mxu1 %v8486_v32  ;;  %v2229_v33 = vsub.f32 %v5145_v48, %v2213_v54 }
 0x4c7   :  { %v1807_v63 = vsub.f32 %v8458_v15, %v1791_v9  ;;  %v1806_v27 = vsub.f32 %v8438_v34, %v1790_v0  ;;  %v8509_v0 = vpack.c.bf16 %v2227_v29, %v2226_v12 }
 0x4c8   :  { %v1805_v18 = vsub.f32 %v8466_v30, %v1789_v8  ;;  %v8493_v35 = vpop.f32.mrb[28].mxu1  ;;  %v1804_v46 = vsub.f32 %v8450_v60, %v1788_v28  ;;  %v8523_v12 = vpack.c.bf16 %v2229_v33, %v2228_v22  ;;  %v8547_v22 = vld [vmem:[%s9722_s1 + $0x228] sm:$0xff]  ;;  %v8638_v30 = vld [vmem:[%s9722_s1 + $0x278] sm:$0xff] }
 0x4c9   :  { %10005 = vst [vmem:[#allocation93_spill] sm:$0xff] %v8493_v35  ;;  %v8497_v13 = vpop.f32.mrb[29].mxu1  ;;  %6163 = vmatpush3.bf16.msra.mxu0 %v1815_v39  ;;  %v1817_v4 = vpack.c.bf16 %v1807_v63, %v1806_v27  ;;  %6261 = vmatpush3.bf16.msra.mxu1 %v8486_v32  ;;  %v8532_v27 = vld [vmem:[%s9722_s1 + $0x210] sm:$0xff] }
 0x4ca   :  { %10006 = vst [vmem:[#allocation94_spill] sm:$0xff] %v8497_v13  ;;  %v8499_v20 = vpop.f32.mrb[30].mxu1  ;;  %v1816_v9 = vpack.c.bf16 %v1805_v18, %v1804_v46  ;;  %6262 = vmatprep.subr.bf16.mxu1 %v8509_v0 }
 0x4cb   :  { %10007 = vst [vmem:[#allocation95_spill] sm:$0xff] %v8499_v20  ;;  %v8504_v17 = vpack.c.bf16 %v8499_v20, %v8493_v35  ;;  %v8506_v62 = vpop.f32.mrb[31].mxu1 }
 0x4cc   :  { %10008 = vst [vmem:[#allocation96_spill] sm:$0xff] %v8506_v62  ;;  %v8513_v39 = vpack.c.bf16 %v8506_v62, %v8497_v13  ;;  %6164 = vmatprep.subr.bf16.mxu0 %v1816_v9 }
 0x4cd   :  { %v1795_v46 = vunpack.c.h.bf16 %v8504_v17  ;;  %6165 = vmatpush3.bf16.msra.mxu0 %v1816_v9  ;;  %v1794_v18 = vunpack.c.l.bf16 %v8504_v17  ;;  %6263 = vmatpush3.bf16.msra.mxu1 %v8509_v0  ;;  %v8537_v9 = vld [vmem:[%s9722_s1 + $0x218] sm:$0xff] }
 0x4ce   :  { %v1793_v8 = vunpack.c.h.bf16 %v8513_v39  ;;  %6166 = vmatprep.subr.bf16.mxu0 %v1817_v4  ;;  %v1792_v28 = vunpack.c.l.bf16 %v8513_v39  ;;  %6264 = vmatprep.subr.bf16.mxu1 %v8523_v12  ;;  %v8552_v33 = vpack.c.bf16 %v8537_v9, %v8532_v27 }
 0x4cf   :  { %v1811_v29 = vsub.f32 %v8499_v20, %v1795_v46  ;;  %v1810_v54 = vsub.f32 %v8493_v35, %v1794_v18  ;;  %v8565_v18 = vld [vmem:[%s9722_s1 + $0x230] sm:$0xff] }
 0x4d0   :  { %v1809_v26 = vsub.f32 %v8506_v62, %v1793_v8  ;;  %v1808_v48 = vsub.f32 %v8497_v13, %v1792_v28  ;;  %v8570_v8 = vld [vmem:[%s9722_s1 + $0x238] sm:$0xff]  ;;  %v8576_v28 = vld [vmem:[%s9722_s1 + $0x240] sm:$0xff]  ;;  %v8615_v62 = vld [vmem:[%s9722_s1 + $0x268] sm:$0xff] }
 0x4d1   :  { %6167 = vmatpush3.bf16.msra.mxu0 %v1817_v4  ;;  %v1819_v2 = vpack.c.bf16 %v1811_v29, %v1810_v54  ;;  %v8542_v4 = vld [vmem:[%s9722_s1 + $0x220] sm:$0xff]  ;;  %6265 = vmatpush3.bf16.msra.mxu1 %v8523_v12  ;;  %v8581_v29 = vld [vmem:[%s9722_s1 + $0x248] sm:$0xff]  ;;  %v8585_v54 = vpack.c.bf16 %v8570_v8, %v8565_v18  ;;  %v8633_v35 = vld [vmem:[%s9722_s1 + $0x270] sm:$0xff] }
 0x4d2   :  { %v1818_v63 = vpack.c.bf16 %v1809_v26, %v1808_v48  ;;  %v8556_v46 = vpack.c.bf16 %v8547_v22, %v8542_v4  ;;  %v8590_v26 = vpack.c.bf16 %v8581_v29, %v8576_v28  ;;  %v8599_v48 = vld [vmem:[%s9722_s1 + $0x250] sm:$0xff]  ;;  %v8643_v15 = vpack.c.bf16 %v8638_v30, %v8633_v35 }
 0x4d3   :  { %v1738_v23 = vunpack.c.l.bf16 %v8585_v54  ;;  %v1739_v49 = vunpack.c.h.bf16 %v8585_v54 }
 0x4d4   :  { %6168 = vmatprep.subr.bf16.mxu0 %v1818_v63  ;;  %10009 = vst [vmem:[#allocation97_spill] sm:$0xff] %v8590_v26  ;;  %10012 = vst [vmem:[#allocation100_spill] sm:$0xff] %v8643_v15 }
 0x4d5   :  { %6169 = vmatpush3.bf16.msra.mxu0 %v1818_v63  ;;  %v8610_v63 = vld [vmem:[%s9722_s1 + $0x260] sm:$0xff] }
 0x4d6   :  { %6170 = vmatprep.subr.bf16.mxu0 %v1819_v2  ;;  %v8624_v13 = vpack.c.bf16 %v8615_v62, %v8610_v63 }
 0x4d8   :  { %10011 = vst [vmem:[#allocation99_spill] sm:$0xff] %v8624_v13 }
 0x4d9   :  { %6171 = vmatpush3.bf16.msra.mxu0 %v1819_v2  ;;  %v8604_v2 = vld [vmem:[%s9722_s1 + $0x258] sm:$0xff] }
 0x4da   :  { %6188 = vmatprep.subr.bf16.mxu0 %v8350_v57  ;;  %v8619_v20 = vpack.c.bf16 %v8604_v2, %v8599_v48 }
 0x4dc   :  { %6173 = vmatmul.mubr.bf16.vlgmr.msra.gmra.mrb[32].mxu0 %v8552_v33  ;;  %10010 = vst [vmem:[#allocation98_spill] sm:$0xff] %v8619_v20 }
 0x4dd   :  { %6189 = vmatpush3.bf16.msra.mxu0 %v8350_v57  ;;  %6176 = vmatprep.mubr.bf16.mxu0 %v8556_v46 }
 0x4de   :  { %6190 = vmatprep.subr.bf16.mxu0 %v8344_v36 }
 0x4e1   :  { %6191 = vmatpush3.bf16.msra.mxu0 %v8344_v36 }
 0x4e2   :  { %6192 = vmatprep.subr.bf16.mxu0 %v8417_v16 }
 0x4e4   :  { %6177 = vmatmul.mubr.bf16.gmra.mrb[36].mxu0 %v8585_v54 }
 0x4e5   :  { %6193 = vmatpush3.bf16.msra.mxu0 %v8417_v16  ;;  %6180 = vmatprep.mubr.bf16.mxu0 %v8590_v26 }
 0x4e6   :  { %6194 = vmatprep.subr.bf16.mxu0 %v8402_v25 }
 0x4e9   :  { %6195 = vmatpush3.bf16.msra.mxu0 %v8402_v25 }
 0x4ea   :  { %6196 = vmatprep.subr.bf16.mxu0 %v8475_v11 }
 0x4ec   :  { %6181 = vmatmul.mubr.bf16.gmra.mrb[40].mxu0 %v8619_v20 }
 0x4ed   :  { %6197 = vmatpush3.bf16.msra.mxu0 %v8475_v11  ;;  %6184 = vmatprep.mubr.bf16.mxu0 %v8624_v13 }
 0x4ee   :  { %6198 = vmatprep.subr.bf16.mxu0 %v8464_v5 }
 0x4f1   :  { %6199 = vmatpush3.bf16.msra.mxu0 %v8464_v5 }
 0x4f2   :  { %6200 = vmatprep.subr.bf16.mxu0 %v8513_v39 }
 0x4f4   :  { %6185 = vmatmul.mubr.bf16.gmra.mrb[44].mxu0 %v8643_v15 }
 0x4f5   :  { %6201 = vmatpush3.bf16.msra.mxu0 %v8513_v39  ;;  %6204 = vmatprep.mubr.bf16.mxu0 %v8329_v38 }
 0x4f6   :  { %6202 = vmatprep.subr.bf16.mxu0 %v8504_v17 }
 0x4f9   :  { %6203 = vmatpush3.bf16.msra.mxu0 %v8504_v17 }
 0x4fa   :  { %6220 = vmatprep.subr.bf16.mxu0 %v8350_v57 }
 0x4fc   :  { %6205 = vmatmul.mubr.bf16.vlgmr.msra.gmra.mrb[32].mxu0 %v8552_v33 }
 0x4fd   :  { %6221 = vmatpush3.bf16.msra.mxu0 %v8350_v57  ;;  %6208 = vmatprep.mubr.bf16.mxu0 %v8556_v46  ;;  %v1735_v57 = vunpack.c.h.bf16 %v8552_v33 }
 0x4fe   :  { %6222 = vmatprep.subr.bf16.mxu0 %v8344_v36 }
 0x4ff   :  { %v1751_v60 = vsub.f32 %v8537_v9, %v1735_v57  ;;  %v1741_v9 = vunpack.c.h.bf16 %v8590_v26 }
 0x501   :  { %6223 = vmatpush3.bf16.msra.mxu0 %v8344_v36  ;;  %v1734_v36 = vunpack.c.l.bf16 %v8552_v33 }
 0x502   :  { %6224 = vmatprep.subr.bf16.mxu0 %v8417_v16 }
 0x504   :  { %6209 = vmatmul.mubr.bf16.gmra.mrb[36].mxu0 %v8585_v54 }
 0x505   :  { %6225 = vmatpush3.bf16.msra.mxu0 %v8417_v16  ;;  %6212 = vmatprep.mubr.bf16.mxu0 %v8590_v26  ;;  %v1736_v16 = vunpack.c.l.bf16 %v8556_v46 }
 0x506   :  { %6226 = vmatprep.subr.bf16.mxu0 %v8402_v25 }
 0x507   :  { %v1752_v34 = vsub.f32 %v8542_v4, %v1736_v16  ;;  %v1754_v4 = vsub.f32 %v8565_v18, %v1738_v23  ;;  %v1745_v23 = vunpack.c.h.bf16 %v8624_v13 }
 0x509   :  { %6227 = vmatpush3.bf16.msra.mxu0 %v8402_v25  ;;  %v1737_v25 = vunpack.c.h.bf16 %v8556_v46 }
 0x50a   :  { %6228 = vmatprep.subr.bf16.mxu0 %v8475_v11 }
 0x50c   :  { %6213 = vmatmul.mubr.bf16.gmra.mrb[40].mxu0 %v8619_v20 }
 0x50d   :  { %6229 = vmatpush3.bf16.msra.mxu0 %v8475_v11  ;;  %6216 = vmatprep.mubr.bf16.mxu0 %v8624_v13  ;;  %v1750_v11 = vsub.f32 %v8532_v27, %v1734_v36  ;;  %v1757_v36 = vsub.f32 %v8581_v29, %v1741_v9 }
 0x50e   :  { %6230 = vmatprep.subr.bf16.mxu0 %v8464_v5 }
 0x50f   :  { %v8683_v45 = vpack.c.bf16 %v1751_v60, %v1750_v11  ;;  %v1746_v11 = vunpack.c.l.bf16 %v8643_v15 }
 0x511   :  { %6231 = vmatpush3.bf16.msra.mxu0 %v8464_v5  ;;  %v1753_v5 = vsub.f32 %v8547_v22, %v1737_v25  ;;  %v1755_v22 = vsub.f32 %v8570_v8, %v1739_v49  ;;  %v1744_v25 = vunpack.c.l.bf16 %v8624_v13 }
 0x512   :  { %6232 = vmatprep.subr.bf16.mxu0 %v8513_v39 }
 0x513   :  { %v8688_v27 = vpack.c.bf16 %v1753_v5, %v1752_v34  ;;  %v8698_v57 = vpack.c.bf16 %v1755_v22, %v1754_v4  ;;  %v1742_v34 = vunpack.c.l.bf16 %v8619_v20  ;;  %v1760_v8 = vsub.f32 %v8610_v63, %v1744_v25  ;;  %v5147_v63 = vld [vmem:[%s9722_s1 + $0x2f8] sm:$0xff] }
 0x514   :  { %6217 = vmatmul.mubr.bf16.gmra.mrb[44].mxu0 %v8643_v15  ;;  %v1747_v5 = vunpack.c.h.bf16 %v8643_v15 }
 0x515   :  { %6233 = vmatpush3.bf16.msra.mxu0 %v8513_v39  ;;  %6236 = vmatprep.mubr.bf16.mxu0 %v8334_v51  ;;  %v1740_v39 = vunpack.c.l.bf16 %v8590_v26  ;;  %v1758_v49 = vsub.f32 %v8599_v48, %v1742_v34  ;;  %v1762_v48 = vsub.f32 %v8633_v35, %v1746_v11 }
 0x516   :  { %6234 = vmatprep.subr.bf16.mxu0 %v8504_v17 }
 0x517   :  { %v1756_v60 = vsub.f32 %v8576_v28, %v1740_v39  ;;  %v1761_v28 = vsub.f32 %v8615_v62, %v1745_v23  ;;  %v5146_v62 = vld [vmem:[%s9722_s1 + $0x2f0] sm:$0xff] }
 0x518   :  { %v8732_v4 = vpack.c.bf16 %v5147_v63, %v5146_v62 }
 0x519   :  { %6235 = vmatpush3.bf16.msra.mxu0 %v8504_v17  ;;  %v1743_v17 = vunpack.c.h.bf16 %v8619_v20  ;;  %v8702_v16 = vpack.c.bf16 %v1757_v36, %v1756_v60  ;;  %v8716_v39 = vpack.c.bf16 %v1761_v28, %v1760_v8 }
 0x51a   :  { %v2214_v35 = vunpack.c.l.bf16 %v8732_v4 }
 0x51b   :  { %v1759_v18 = vsub.f32 %v8604_v2, %v1743_v17  ;;  %v1763_v2 = vsub.f32 %v8638_v30, %v1747_v5  ;;  %v2215_v30 = vunpack.c.h.bf16 %v8732_v4 }
 0x51c   :  { %6237 = vmatmul.mubr.bf16.vlgmr.msra.gmra.mrb[32].mxu0 %v8683_v45  ;;  %v2230_v22 = vsub.f32 %v5146_v62, %v2214_v35 }
 0x51d   :  { %6240 = vmatprep.mubr.bf16.mxu0 %v8688_v27  ;;  %v8712_v29 = vpack.c.bf16 %v1759_v18, %v1758_v49  ;;  %v8722_v9 = vpack.c.bf16 %v1763_v2, %v1762_v48  ;;  %v2231_v60 = vsub.f32 %v5147_v63, %v2215_v30 }
 0x51f   :  { %v8736_v36 = vpack.c.bf16 %v2231_v60, %v2230_v22 }
 0x521   :  { %6266 = vmatprep.subr.bf16.mxu1 %v8736_v36 }
 0x522   :  { %6267 = vmatpush3.bf16.msra.mxu1 %v8736_v36 }
 0x523   :  { %6284 = vmatprep.subr.bf16.mxu1 %v8363_v14 }
 0x524   :  { %6241 = vmatmul.mubr.bf16.gmra.mrb[36].mxu0 %v8698_v57 }
 0x525   :  { %6244 = vmatprep.mubr.bf16.mxu0 %v8702_v16 }
 0x52c   :  { %6245 = vmatmul.mubr.bf16.gmra.mrb[40].mxu0 %v8712_v29 }
 0x52d   :  { %6248 = vmatprep.mubr.bf16.mxu0 %v8716_v39 }
 0x534   :  { %6249 = vmatmul.mubr.bf16.gmra.mrb[44].mxu0 %v8722_v9 }
 0x535   :  { %6364 = vmatprep.mubr.bf16.mxu0 %v8363_v14 }
 0x5ef   :  { %v6238_v34 = vpop.f32.mrb[32].mxu0 }
 0x5f0   :  { %v2048_v17 = vpop.f32.mrb[33].mxu0 }
 0x5f1   :  { %v6239_v25 = vpop.f32.mrb[34].mxu0 }
 0x5f2   :  { %v8741_v23 = vpack.c.bf16 %v6239_v25, %v6238_v34  ;;  %v2051_v49 = vpop.f32.mrb[35].mxu0 }
 0x5f3   :  { %v8743_v18 = vpack.c.bf16 %v2051_v49, %v2048_v17 }
 0x5f4   :  { %v2154_v8 = vunpack.c.l.bf16 %v8741_v23  ;;  %v2155_v28 = vunpack.c.h.bf16 %v8741_v23 }
 0x5f5   :  { %v2152_v11 = vunpack.c.l.bf16 %v8743_v18  ;;  %v2153_v5 = vunpack.c.h.bf16 %v8743_v18  ;;  %6268 = vmatprep.mubr.bf16.mxu1 %v8743_v18 }
 0x5f6   :  { %v8750_v48 = vsub.f32 %v6238_v34, %v2154_v8  ;;  %v8752_v2 = vsub.f32 %v6239_v25, %v2155_v28  ;;  %6269 = vmatmul.mubr.bf16.vlgmr.msra.gmra.mrb[32].mxu1 %v8741_v23 }
 0x5f7   :  { %v8755_v62 = vsub.f32 %v2048_v17, %v2152_v11  ;;  %v8757_v63 = vsub.f32 %v2051_v49, %v2153_v5  ;;  %v6242_v35 = vpop.f32.mrb[36].mxu0  ;;  %6285 = vmatpush3.bf16.msra.mxu1 %v8363_v14 }
 0x5f8   :  { %v2064_v22 = vpop.f32.mrb[37].mxu0  ;;  %6286 = vmatprep.subr.bf16.mxu1 %v8376_v42 }
 0x5f9   :  { %v6243_v34 = vpop.f32.mrb[38].mxu0 }
 0x5fa   :  { %v8765_v25 = vpack.c.bf16 %v6243_v34, %v6242_v35  ;;  %v2067_v8 = vpop.f32.mrb[39].mxu0 }
 0x5fb   :  { %v8767_v17 = vpack.c.bf16 %v2067_v8, %v2064_v22  ;;  %6287 = vmatpush3.bf16.msra.mxu1 %v8376_v42 }
 0x5fc   :  { %v2158_v49 = vunpack.c.l.bf16 %v8765_v25  ;;  %v2159_v28 = vunpack.c.h.bf16 %v8765_v25  ;;  %6288 = vmatprep.subr.bf16.mxu1 %v8378_v47 }
 0x5fd   :  { %v2156_v11 = vunpack.c.l.bf16 %v8767_v17  ;;  %v2157_v5 = vunpack.c.h.bf16 %v8767_v17  ;;  %6272 = vmatprep.mubr.bf16.mxu1 %v8767_v17 }
 0x5fe   :  { %v8776_v30 = vsub.f32 %v6242_v35, %v2158_v49  ;;  %v8778_v60 = vsub.f32 %v6243_v34, %v2159_v28  ;;  %6273 = vmatmul.mubr.bf16.gmra.mrb[36].mxu1 %v8765_v25 }
 0x5ff   :  { %v8781_v21 = vsub.f32 %v2064_v22, %v2156_v11  ;;  %v8783_v41 = vsub.f32 %v2067_v8, %v2157_v5  ;;  %v6246_v61 = vpop.f32.mrb[40].mxu0  ;;  %6289 = vmatpush3.bf16.msra.mxu1 %v8378_v47 }
 0x600   :  { %v2080_v52 = vpop.f32.mrb[41].mxu0  ;;  %6290 = vmatprep.subr.bf16.mxu1 %v8425_v50 }
 0x601   :  { %v6247_v34 = vpop.f32.mrb[42].mxu0 }
 0x602   :  { %v2149_v49 = vpack.c.bf16 %v6247_v34, %v6246_v61  ;;  %v2083_v28 = vpop.f32.mrb[43].mxu0 }
 0x603   :  { %v2148_v55 = vpack.c.bf16 %v2083_v28, %v2080_v52  ;;  %6291 = vmatpush3.bf16.msra.mxu1 %v8425_v50 }
 0x604   :  { %v2162_v22 = vunpack.c.l.bf16 %v2149_v49  ;;  %v2163_v8 = vunpack.c.h.bf16 %v2149_v49  ;;  %6292 = vmatprep.subr.bf16.mxu1 %v8430_v37 }
 0x605   :  { %v2160_v11 = vunpack.c.l.bf16 %v2148_v55  ;;  %v2161_v5 = vunpack.c.h.bf16 %v2148_v55  ;;  %6276 = vmatprep.mubr.bf16.mxu1 %v2148_v55 }
 0x606   :  { %v8793_v40 = vsub.f32 %v6246_v61, %v2162_v22  ;;  %v8795_v58 = vsub.f32 %v6247_v34, %v2163_v8  ;;  %6277 = vmatmul.mubr.bf16.gmra.mrb[40].mxu1 %v2149_v49 }
 0x607   :  { %v2176_v59 = vsub.f32 %v2080_v52, %v2160_v11  ;;  %v2177_v35 = vsub.f32 %v2083_v28, %v2161_v5  ;;  %v6250_v56 = vpop.f32.mrb[44].mxu0  ;;  %6293 = vmatpush3.bf16.msra.mxu1 %v8430_v37 }
 0x608   :  { %v2189_v3 = vpack.c.bf16 %v8795_v58, %v8793_v40  ;;  %v2096_v53 = vpop.f32.mrb[45].mxu0  ;;  %6294 = vmatprep.subr.bf16.mxu1 %v8471_v7 }
 0x609   :  { %v2188_v6 = vpack.c.bf16 %v2177_v35, %v2176_v59  ;;  %v6251_v10 = vpop.f32.mrb[46].mxu0 }
 0x60a   :  { %v2151_v15 = vpack.c.bf16 %v6251_v10, %v6250_v56  ;;  %v2099_v13 = vpop.f32.mrb[47].mxu0 }
 0x60b   :  { %v2150_v61 = vpack.c.bf16 %v2099_v13, %v2096_v53  ;;  %6295 = vmatpush3.bf16.msra.mxu1 %v8471_v7 }
 0x60c   :  { %v2166_v34 = vunpack.c.l.bf16 %v2151_v15  ;;  %v2167_v22 = vunpack.c.h.bf16 %v2151_v15  ;;  %6296 = vmatprep.subr.bf16.mxu1 %v8477_v31 }
 0x60d   :  { %v2164_v52 = vunpack.c.l.bf16 %v2150_v61  ;;  %v2165_v28 = vunpack.c.h.bf16 %v2150_v61  ;;  %6280 = vmatprep.mubr.bf16.mxu1 %v2150_v61 }
 0x60e   :  { %v2182_v8 = vsub.f32 %v6250_v56, %v2166_v34  ;;  %v2183_v11 = vsub.f32 %v6251_v10, %v2167_v22  ;;  %6281 = vmatmul.mubr.bf16.gmra.mrb[44].mxu1 %v2151_v15  ;;  %v10013_v10 = vpack.c.bf16 %v8757_v63, %v8755_v62  ;;  %v10015_v56 = vpack.c.bf16 %v8783_v41, %v8781_v21 }
 0x60f   :  { %v2180_v58 = vsub.f32 %v2096_v53, %v2164_v52  ;;  %v2181_v40 = vsub.f32 %v2099_v13, %v2165_v28  ;;  %6297 = vmatpush3.bf16.msra.mxu1 %v8477_v31  ;;  %6300 = vmatprep.mubr.bf16.mxu1 %v8743_v18  ;;  %v10014_v53 = vpack.c.bf16 %v8752_v2, %v8750_v48 }
 0x610   :  { %v2191_v59 = vpack.c.bf16 %v2183_v11, %v2182_v8  ;;  %6298 = vmatprep.subr.bf16.mxu1 %v8732_v4  ;;  %v5187_v8 = vld [vmem:[%s9722_s1 + $0x438] sm:$0xff] }
 0x611   :  { %v2190_v35 = vpack.c.bf16 %v2181_v40, %v2180_v58 }
 0x613   :  { %6299 = vmatpush3.bf16.msra.mxu1 %v8732_v4 }
 0x614   :  { %6316 = vmatprep.subr.bf16.mxu1 %v8363_v14 }
 0x616   :  { %6301 = vmatmul.mubr.bf16.vlgmr.msra.gmra.mrb[32].mxu1 %v8741_v23 }
 0x617   :  { %6304 = vmatprep.mubr.bf16.mxu1 %v8767_v17  ;;  %6317 = vmatpush3.bf16.msra.mxu1 %v8363_v14 }
 0x618   :  { %6318 = vmatprep.subr.bf16.mxu1 %v8376_v42 }
 0x61b   :  { %6319 = vmatpush3.bf16.msra.mxu1 %v8376_v42 }
 0x61c   :  { %6320 = vmatprep.subr.bf16.mxu1 %v8378_v47 }
 0x61e   :  { %6305 = vmatmul.mubr.bf16.gmra.mrb[36].mxu1 %v8765_v25  ;;  %v5186_v25 = vld [vmem:[%s9722_s1 + $0x430] sm:$0xff] }
 0x61f   :  { %6308 = vmatprep.mubr.bf16.mxu1 %v2148_v55  ;;  %6321 = vmatpush3.bf16.msra.mxu1 %v8378_v47  ;;  %v10016_v55 = vpack.c.bf16 %v8778_v60, %v8776_v30 }
 0x620   :  { %6322 = vmatprep.subr.bf16.mxu1 %v8425_v50 }
 0x623   :  { %6323 = vmatpush3.bf16.msra.mxu1 %v8425_v50 }
 0x624   :  { %6324 = vmatprep.subr.bf16.mxu1 %v8430_v37 }
 0x626   :  { %6309 = vmatmul.mubr.bf16.gmra.mrb[40].mxu1 %v2149_v49 }
 0x627   :  { %6312 = vmatprep.mubr.bf16.mxu1 %v2150_v61  ;;  %6325 = vmatpush3.bf16.msra.mxu1 %v8430_v37  ;;  %v5184_v61 = vld [vmem:[%s9722_s1 + $0x420] sm:$0xff] }
 0x628   :  { %6326 = vmatprep.subr.bf16.mxu1 %v8471_v7 }
 0x62b   :  { %6327 = vmatpush3.bf16.msra.mxu1 %v8471_v7 }
 0x62c   :  { %6328 = vmatprep.subr.bf16.mxu1 %v8477_v31 }
 0x62e   :  { %6313 = vmatmul.mubr.bf16.gmra.mrb[44].mxu1 %v2151_v15  ;;  %v5181_v15 = vld [vmem:[%s9722_s1 + $0x408] sm:$0xff] }
 0x62f   :  { %6329 = vmatpush3.bf16.msra.mxu1 %v8477_v31  ;;  %6332 = vmatprep.mubr.bf16.mxu1 %v10013_v10 }
 0x630   :  { %6330 = vmatprep.subr.bf16.mxu1 %v8732_v4 }
 0x633   :  { %6331 = vmatpush3.bf16.msra.mxu1 %v8732_v4 }
 0x634   :  { %6444 = vmatprep.subr.bf16.mxu1 %v8334_v51 }
 0x636   :  { %6333 = vmatmul.mubr.bf16.vlgmr.msra.gmra.mrb[32].mxu1 %v10014_v53 }
 0x637   :  { %6336 = vmatprep.mubr.bf16.mxu1 %v10015_v56  ;;  %6445 = vmatpush3.bf16.msra.mxu1 %v8334_v51  ;;  %v5183_v51 = vld [vmem:[%s9722_s1 + $0x418] sm:$0xff] }
 0x638   :  { %6446 = vmatprep.subr.bf16.mxu1 %v8683_v45 }
 0x63b   :  { %6447 = vmatpush3.bf16.msra.mxu1 %v8683_v45  ;;  %v5180_v45 = vld [vmem:[%s9722_s1 + $0x400] sm:$0xff] }
 0x63c   :  { %6448 = vmatprep.subr.bf16.mxu1 %v8688_v27 }
 0x63e   :  { %6337 = vmatmul.mubr.bf16.gmra.mrb[36].mxu1 %v10016_v55 }
 0x63f   :  { %6340 = vmatprep.mubr.bf16.mxu1 %v2188_v6  ;;  %6449 = vmatpush3.bf16.msra.mxu1 %v8688_v27 }
 0x640   :  { %6450 = vmatprep.subr.bf16.mxu1 %v8698_v57 }
 0x643   :  { %6451 = vmatpush3.bf16.msra.mxu1 %v8698_v57 }
 0x644   :  { %6452 = vmatprep.subr.bf16.mxu1 %v8702_v16 }
 0x646   :  { %6341 = vmatmul.mubr.bf16.gmra.mrb[40].mxu1 %v2189_v3  ;;  %v5182_v3 = vld [vmem:[%s9722_s1 + $0x410] sm:$0xff] }
 0x647   :  { %6344 = vmatprep.mubr.bf16.mxu1 %v2190_v35  ;;  %6453 = vmatpush3.bf16.msra.mxu1 %v8702_v16 }
 0x648   :  { %6454 = vmatprep.subr.bf16.mxu1 %v8712_v29 }
 0x64b   :  { %6455 = vmatpush3.bf16.msra.mxu1 %v8712_v29 }
 0x64c   :  { %6456 = vmatprep.subr.bf16.mxu1 %v8716_v39 }
 0x64e   :  { %6345 = vmatmul.mubr.bf16.gmra.mrb[44].mxu1 %v2191_v59 }
 0x64f   :  { %6457 = vmatpush3.bf16.msra.mxu1 %v8716_v39 }
 0x650   :  { %6458 = vmatprep.subr.bf16.mxu1 %v8722_v9 }
 0x653   :  { %6459 = vmatpush3.bf16.msra.mxu1 %v8722_v9 }
 0x654   :  { %6476 = vmatprep.subr.bf16.mxu1 %v8329_v38 }
 0x709   :  { %v6334_v6 = vpop.f32.mrb[32].mxu1 }
 0x70a   :  { %v2824_v41 = vsub.f32 0.0, %v6334_v6  ;;  %v2468_v21 = vpop.f32.mrb[33].mxu1  ;;  %v2792_v57 = vsub.f32 %v6334_v6, %v5182_v3 }
 0x70b   :  { %v2822_v13 = vsub.f32 0.0, %v2468_v21  ;;  %v6335_v27 = vpop.f32.mrb[34].mxu1  ;;  %v2790_v23 = vsub.f32 %v2468_v21, %v5180_v45 }
 0x70c   :  { %v2840_v16 = vsub.f32 %v2824_v41, %v5182_v3  ;;  %v2793_v29 = vsub.f32 %v6335_v27, %v5183_v51  ;;  %v2825_v39 = vsub.f32 0.0, %v6335_v27  ;;  %v2471_v9 = vpop.f32.mrb[35].mxu1  ;;  %v2808_v17 = vmax.f32 %v2792_v57, 0.0  ;;  %v5185_v3 = vld [vmem:[%s9722_s1 + $0x428] sm:$0xff] }
 0x70d   :  { %v2838_v18 = vsub.f32 %v2822_v13, %v5180_v45  ;;  %v2791_v48 = vsub.f32 %v2471_v9, %v5181_v15  ;;  %v2823_v2 = vsub.f32 0.0, %v2471_v9  ;;  %v2806_v34 = vmax.f32 %v2790_v23, 0.0 }
 0x70e   :  { %v2856_v62 = vmax.f32 %v2840_v16, 0.0  ;;  %v2841_v63 = vsub.f32 %v2825_v39, %v5183_v51  ;;  %v2809_v49 = vmax.f32 %v2793_v29, 0.0 }
 0x70f   :  { %v2854_v30 = vmax.f32 %v2838_v18, 0.0  ;;  %v2839_v60 = vsub.f32 %v2823_v2, %v5181_v15  ;;  %v2807_v22 = vmax.f32 %v2791_v48, 0.0  ;;  %v5190_v48 = vld [vmem:[%s9722_s1 + $0x450] sm:$0xff] }
 0x710   :  { %v2857_v5 = vmax.f32 %v2841_v63, 0.0  ;;  %v8876_v11 = vsub.f32 %v2808_v17, %v2856_v62  ;;  %v5188_v17 = vld [vmem:[%s9722_s1 + $0x440] sm:$0xff] }
 0x711   :  { %v2855_v52 = vmax.f32 %v2839_v60, 0.0  ;;  %v6338_v28 = vpop.f32.mrb[36].mxu1  ;;  %v2870_v10 = vsub.f32 %v2806_v34, %v2854_v30 }
 0x712   :  { %v8878_v58 = vsub.f32 %v2809_v49, %v2857_v5  ;;  %v2796_v40 = vsub.f32 %v6338_v28, %v5186_v25  ;;  %v2828_v59 = vsub.f32 0.0, %v6338_v28  ;;  %v2484_v35 = vpop.f32.mrb[37].mxu1 }
 0x713   :  { %v2871_v53 = vsub.f32 %v2807_v22, %v2855_v52  ;;  %v2794_v56 = vsub.f32 %v2484_v35, %v5184_v61  ;;  %v2826_v55 = vsub.f32 0.0, %v2484_v35  ;;  %v6339_v6 = vpop.f32.mrb[38].mxu1 }
 0x714   :  { %v8885_v51 = vpack.c.bf16 %v8878_v58, %v8876_v11  ;;  %v2844_v41 = vsub.f32 %v2828_v59, %v5186_v25  ;;  %v2797_v21 = vsub.f32 %v6339_v6, %v5187_v8  ;;  %v2487_v45 = vpop.f32.mrb[39].mxu1  ;;  %v2812_v13 = vmax.f32 %v2796_v40, 0.0 }
 0x715   :  { %v8887_v15 = vpack.c.bf16 %v2871_v53, %v2870_v10  ;;  %v2842_v27 = vsub.f32 %v2826_v55, %v5184_v61  ;;  %v2829_v57 = vsub.f32 0.0, %v6339_v6  ;;  %v2810_v29 = vmax.f32 %v2794_v56, 0.0  ;;  %v5191_v61 = vld [vmem:[%s9722_s1 + $0x458] sm:$0xff] }
 0x716   :  { %v2860_v16 = vmax.f32 %v2844_v41, 0.0  ;;  %v2795_v39 = vsub.f32 %v2487_v45, %v5185_v3  ;;  %v2827_v9 = vsub.f32 0.0, %v2487_v45  ;;  %v2813_v30 = vmax.f32 %v2797_v21, 0.0  ;;  %v5189_v41 = vld [vmem:[%s9722_s1 + $0x448] sm:$0xff] }
 0x717   :  { %v2858_v23 = vmax.f32 %v2842_v27, 0.0  ;;  %v2845_v18 = vsub.f32 %v2829_v57, %v5187_v8  ;;  %v2894_v2 = vunpack.c.l.bf16 %v8887_v15  ;;  %v2895_v62 = vunpack.c.h.bf16 %v8887_v15 }
 0x718   :  { %v8894_v63 = vsub.f32 %v2812_v13, %v2860_v16  ;;  %v2811_v60 = vmax.f32 %v2795_v39, 0.0  ;;  %v2843_v25 = vsub.f32 %v2827_v9, %v5185_v3  ;;  %v2896_v52 = vunpack.c.l.bf16 %v8885_v51 }
 0x719   :  { %v2861_v49 = vmax.f32 %v2845_v18, 0.0  ;;  %v6342_v5 = vpop.f32.mrb[40].mxu1  ;;  %v2910_v34 = vsub.f32 %v2870_v10, %v2894_v2  ;;  %v2911_v22 = vsub.f32 %v2871_v53, %v2895_v62  ;;  %v2874_v28 = vsub.f32 %v2810_v29, %v2858_v23 }
 0x71a   :  { %v2859_v8 = vmax.f32 %v2843_v25, 0.0  ;;  %v2800_v40 = vsub.f32 %v6342_v5, %v5190_v48  ;;  %v2832_v59 = vsub.f32 0.0, %v6342_v5  ;;  %v2500_v35 = vpop.f32.mrb[41].mxu1  ;;  %v2897_v27 = vunpack.c.h.bf16 %v8885_v51  ;;  %v5194_v25 = vld [vmem:[%s9722_s1 + $0x470] sm:$0xff] }
 0x71b   :  { %v8903_v56 = vsub.f32 %v2813_v30, %v2861_v49  ;;  %v2798_v55 = vsub.f32 %v2500_v35, %v5188_v17  ;;  %v2830_v6 = vsub.f32 0.0, %v2500_v35  ;;  %v6343_v3 = vpop.f32.mrb[42].mxu1  ;;  %v2926_v21 = vpack.c.bf16 %v2911_v22, %v2910_v34  ;;  %v5192_v34 = vld [vmem:[%s9722_s1 + $0x460] sm:$0xff] }
 0x71c   :  { %v2875_v45 = vsub.f32 %v2811_v60, %v2859_v8  ;;  %v2848_v10 = vsub.f32 %v2832_v59, %v5190_v48  ;;  %v2801_v53 = vsub.f32 %v6343_v3, %v5191_v61  ;;  %v2503_v13 = vpop.f32.mrb[43].mxu1  ;;  %v2816_v16 = vmax.f32 %v2800_v40, 0.0 }
 0x71d   :  { %v8911_v57 = vpack.c.bf16 %v8903_v56, %v8894_v63  ;;  %v2846_v29 = vsub.f32 %v2830_v6, %v5188_v17  ;;  %v2833_v39 = vsub.f32 0.0, %v6343_v3  ;;  %6348 = vmatprep.subr.bf16.mxu0 %v2926_v21  ;;  %v2814_v18 = vmax.f32 %v2798_v55, 0.0 }
 0x71e   :  { %v8913_v9 = vpack.c.bf16 %v2875_v45, %v2874_v28  ;;  %v2864_v23 = vmax.f32 %v2848_v10, 0.0  ;;  %v2799_v2 = vsub.f32 %v2503_v13, %v5189_v41  ;;  %6349 = vmatpush3.bf16.msra.mxu0 %v2926_v21  ;;  %v2831_v30 = vsub.f32 0.0, %v2503_v13 }
 0x71f   :  { %v2862_v62 = vmax.f32 %v2846_v29, 0.0  ;;  %v2849_v48 = vsub.f32 %v2833_v39, %v5191_v61  ;;  %v2912_v60 = vsub.f32 %v8876_v11, %v2896_v52  ;;  %v2817_v17 = vmax.f32 %v2801_v53, 0.0  ;;  %v5195_v52 = vld [vmem:[%s9722_s1 + $0x478] sm:$0xff] }
 0x720   :  { %v8919_v49 = vsub.f32 %v2816_v16, %v2864_v23  ;;  %v2913_v5 = vsub.f32 %v8878_v58, %v2897_v27  ;;  %v2898_v22 = vunpack.c.l.bf16 %v8913_v9  ;;  %v2815_v40 = vmax.f32 %v2799_v2, 0.0 }
 0x721   :  { %v2878_v8 = vsub.f32 %v2814_v18, %v2862_v62  ;;  %v2865_v61 = vmax.f32 %v2849_v48, 0.0  ;;  %v2847_v59 = vsub.f32 %v2831_v30, %v5189_v41  ;;  %v6346_v11 = vpop.f32.mrb[44].mxu1  ;;  %v2899_v58 = vunpack.c.h.bf16 %v8913_v9  ;;  %v5193_v41 = vld [vmem:[%s9722_s1 + $0x468] sm:$0xff] }
 0x722   :  { %v2927_v35 = vpack.c.bf16 %v2913_v5, %v2912_v60  ;;  %v2804_v55 = vsub.f32 %v6346_v11, %v5194_v25  ;;  %v2836_v6 = vsub.f32 0.0, %v6346_v11  ;;  %v2516_v3 = vpop.f32.mrb[45].mxu1  ;;  %v2914_v18 = vsub.f32 %v2874_v28, %v2898_v22 }
 0x723   :  { %v2881_v21 = vsub.f32 %v2817_v17, %v2865_v61  ;;  %v2863_v10 = vmax.f32 %v2847_v59, 0.0  ;;  %v2802_v53 = vsub.f32 %v2516_v3, %v5192_v34  ;;  %v2834_v13 = vsub.f32 0.0, %v2516_v3  ;;  %v6347_v27 = vpop.f32.mrb[46].mxu1 }
 0x724   :  { %6350 = vmatprep.subr.bf16.mxu0 %v2927_v35  ;;  %v2852_v16 = vsub.f32 %v2836_v6, %v5194_v25  ;;  %v2805_v29 = vsub.f32 %v6347_v27, %v5195_v52  ;;  %v2837_v39 = vsub.f32 0.0, %v6347_v27  ;;  %v2519_v23 = vpop.f32.mrb[47].mxu1  ;;  %v2820_v48 = vmax.f32 %v2804_v55, 0.0 }
 0x725   :  { %v8934_v2 = vpack.c.bf16 %v2881_v21, %v8919_v49  ;;  %v2879_v62 = vsub.f32 %v2815_v40, %v2863_v10  ;;  %v2850_v30 = vsub.f32 %v2834_v13, %v5192_v34  ;;  %6351 = vmatpush3.bf16.msra.mxu0 %v2927_v35  ;;  %v2818_v17 = vmax.f32 %v2802_v53, 0.0 }
 0x726   :  { %v2868_v60 = vmax.f32 %v2852_v16, 0.0  ;;  %v2853_v5 = vsub.f32 %v2837_v39, %v5195_v52  ;;  %v2803_v61 = vsub.f32 %v2519_v23, %v5193_v41  ;;  %v2821_v11 = vmax.f32 %v2805_v29, 0.0 }
 0x727   :  { %v8936_v59 = vpack.c.bf16 %v2879_v62, %v2878_v8  ;;  %v2835_v3 = vsub.f32 0.0, %v2519_v23  ;;  %v2915_v25 = vsub.f32 %v2875_v45, %v2899_v58  ;;  %v2866_v27 = vmax.f32 %v2850_v30, 0.0 }
 0x728   :  { %v2884_v6 = vsub.f32 %v2820_v48, %v2868_v60  ;;  %v2869_v20 = vmax.f32 %v2853_v5, 0.0  ;;  %v2900_v28 = vunpack.c.l.bf16 %v8911_v57  ;;  %v2819_v22 = vmax.f32 %v2803_v61, 0.0 }
 0x729   :  { %v2851_v26 = vsub.f32 %v2835_v3, %v5193_v41  ;;  %v2928_v40 = vpack.c.bf16 %v2915_v25, %v2914_v18  ;;  %v2901_v34 = vunpack.c.h.bf16 %v8911_v57  ;;  %v2902_v52 = vunpack.c.l.bf16 %v8936_v59 }
 0x72a   :  { %v2885_v35 = vsub.f32 %v2821_v11, %v2869_v20  ;;  %v2916_v55 = vsub.f32 %v8894_v63, %v2900_v28  ;;  %v2903_v10 = vunpack.c.h.bf16 %v8936_v59  ;;  %v2904_v58 = vunpack.c.l.bf16 %v8934_v2 }
 0x72b   :  { %v2867_v53 = vmax.f32 %v2851_v26, 0.0  ;;  %6352 = vmatprep.subr.bf16.mxu0 %v2928_v40  ;;  %v2917_v45 = vsub.f32 %v8903_v56, %v2901_v34  ;;  %v2905_v13 = vunpack.c.h.bf16 %v8934_v2  ;;  %v2882_v16 = vsub.f32 %v2818_v17, %v2866_v27 }
 0x72c   :  { %v8946_v41 = vpack.c.bf16 %v2885_v35, %v2884_v6  ;;  %6353 = vmatpush3.bf16.msra.mxu0 %v2928_v40  ;;  %v2918_v29 = vsub.f32 %v2878_v8, %v2902_v52  ;;  %v2919_v20 = vsub.f32 %v2879_v62, %v2903_v10  ;;  %v2920_v23 = vsub.f32 %v8919_v49, %v2904_v58 }
 0x72d   :  { %v2883_v39 = vsub.f32 %v2819_v22, %v2867_v53  ;;  %v2929_v63 = vpack.c.bf16 %v2917_v45, %v2916_v55  ;;  %v2921_v18 = vsub.f32 %v2881_v21, %v2905_v13 }
 0x72e   :  { %v2930_v48 = vpack.c.bf16 %v2919_v20, %v2918_v29  ;;  %v2908_v26 = vunpack.c.l.bf16 %v8946_v41  ;;  %v2909_v56 = vunpack.c.h.bf16 %v8946_v41  ;;  %v10017_v29 = vld [vmem:[#allocation97_spill] sm:$0xff] }
 0x72f   :  { %v8951_v30 = vpack.c.bf16 %v2883_v39, %v2882_v16  ;;  %6354 = vmatprep.subr.bf16.mxu0 %v2929_v63  ;;  %v2931_v60 = vpack.c.bf16 %v2921_v18, %v2920_v23 }
 0x730   :  { %6355 = vmatpush3.bf16.msra.mxu0 %v2929_v63  ;;  %v2924_v17 = vsub.f32 %v2884_v6, %v2908_v26  ;;  %v2925_v5 = vsub.f32 %v2885_v35, %v2909_v56 }
 0x731   :  { %6356 = vmatprep.subr.bf16.mxu0 %v2930_v48  ;;  %v2906_v8 = vunpack.c.l.bf16 %v8951_v30  ;;  %v2907_v62 = vunpack.c.h.bf16 %v8951_v30 }
 0x732   :  { %v2933_v61 = vpack.c.bf16 %v2925_v5, %v2924_v17 }
 0x733   :  { %v2922_v49 = vsub.f32 %v2882_v16, %v2906_v8  ;;  %v2923_v21 = vsub.f32 %v2883_v39, %v2907_v62 }
 0x734   :  { %6357 = vmatpush3.bf16.msra.mxu0 %v2930_v48 }
 0x735   :  { %6358 = vmatprep.subr.bf16.mxu0 %v2931_v60  ;;  %v2932_v11 = vpack.c.bf16 %v2923_v21, %v2922_v49 }
 0x738   :  { %6359 = vmatpush3.bf16.msra.mxu0 %v2931_v60  ;;  %v10018_v60 = vld [vmem:[#allocation98_spill] sm:$0xff] }
 0x739   :  { %6360 = vmatprep.subr.bf16.mxu0 %v2932_v11 }
 0x73c   :  { %6361 = vmatpush3.bf16.msra.mxu0 %v2932_v11  ;;  %v10019_v11 = vld [vmem:[#allocation99_spill] sm:$0xff] }
 0x73d   :  { %6362 = vmatprep.subr.bf16.mxu0 %v2933_v61 }
 0x740   :  { %6363 = vmatpush3.bf16.msra.mxu0 %v2933_v61 }
 0x741   :  { %6380 = vmatprep.subr.bf16.mxu0 %v8887_v15 }
 0x743   :  { %6365 = vmatmul.mubr.bf16.vlgmr.msra.gmra.mrb[48].mxu0 %v8376_v42 }
 0x744   :  { %6381 = vmatpush3.bf16.msra.mxu0 %v8887_v15  ;;  %6368 = vmatprep.mubr.bf16.mxu0 %v8378_v47 }
 0x745   :  { %6382 = vmatprep.subr.bf16.mxu0 %v8885_v51 }
 0x748   :  { %6383 = vmatpush3.bf16.msra.mxu0 %v8885_v51 }
 0x749   :  { %6384 = vmatprep.subr.bf16.mxu0 %v8913_v9 }
 0x74b   :  { %6369 = vmatmul.mubr.bf16.gmra.mrb[52].mxu0 %v8425_v50 }
 0x74c   :  { %6385 = vmatpush3.bf16.msra.mxu0 %v8913_v9  ;;  %6372 = vmatprep.mubr.bf16.mxu0 %v8430_v37 }
 0x74d   :  { %6386 = vmatprep.subr.bf16.mxu0 %v8911_v57 }
 0x750   :  { %6387 = vmatpush3.bf16.msra.mxu0 %v8911_v57 }
 0x751   :  { %6388 = vmatprep.subr.bf16.mxu0 %v8936_v59 }
 0x753   :  { %6373 = vmatmul.mubr.bf16.gmra.mrb[56].mxu0 %v8471_v7 }
 0x754   :  { %6389 = vmatpush3.bf16.msra.mxu0 %v8936_v59  ;;  %6376 = vmatprep.mubr.bf16.mxu0 %v8477_v31 }
 0x755   :  { %6390 = vmatprep.subr.bf16.mxu0 %v8934_v2 }
 0x758   :  { %6391 = vmatpush3.bf16.msra.mxu0 %v8934_v2 }
 0x759   :  { %6392 = vmatprep.subr.bf16.mxu0 %v8951_v30 }
 0x75b   :  { %6377 = vmatmul.mubr.bf16.gmra.mrb[60].mxu0 %v8732_v4 }
 0x75c   :  { %6393 = vmatpush3.bf16.msra.mxu0 %v8951_v30  ;;  %6396 = vmatprep.mubr.bf16.mxu0 %v8363_v14 }
 0x75d   :  { %6394 = vmatprep.subr.bf16.mxu0 %v8946_v41 }
 0x760   :  { %6395 = vmatpush3.bf16.msra.mxu0 %v8946_v41 }
 0x761   :  { %6412 = vmatprep.subr.bf16.mxu0 %v8887_v15 }
 0x763   :  { %6397 = vmatmul.mubr.bf16.vlgmr.msra.gmra.mrb[48].mxu0 %v8376_v42 }
 0x764   :  { %6413 = vmatpush3.bf16.msra.mxu0 %v8887_v15  ;;  %6400 = vmatprep.mubr.bf16.mxu0 %v8378_v47 }
 0x765   :  { %6414 = vmatprep.subr.bf16.mxu0 %v8885_v51 }
 0x768   :  { %6415 = vmatpush3.bf16.msra.mxu0 %v8885_v51 }
 0x769   :  { %6416 = vmatprep.subr.bf16.mxu0 %v8913_v9 }
 0x76b   :  { %6401 = vmatmul.mubr.bf16.gmra.mrb[52].mxu0 %v8425_v50 }
 0x76c   :  { %6417 = vmatpush3.bf16.msra.mxu0 %v8913_v9  ;;  %6404 = vmatprep.mubr.bf16.mxu0 %v8430_v37 }
 0x76d   :  { %6418 = vmatprep.subr.bf16.mxu0 %v8911_v57 }
 0x770   :  { %6419 = vmatpush3.bf16.msra.mxu0 %v8911_v57 }
 0x771   :  { %6420 = vmatprep.subr.bf16.mxu0 %v8936_v59 }
 0x773   :  { %6405 = vmatmul.mubr.bf16.gmra.mrb[56].mxu0 %v8471_v7 }
 0x774   :  { %6421 = vmatpush3.bf16.msra.mxu0 %v8936_v59  ;;  %6408 = vmatprep.mubr.bf16.mxu0 %v8477_v31 }
 0x775   :  { %6422 = vmatprep.subr.bf16.mxu0 %v8934_v2 }
 0x778   :  { %6423 = vmatpush3.bf16.msra.mxu0 %v8934_v2 }
 0x779   :  { %6424 = vmatprep.subr.bf16.mxu0 %v8951_v30 }
 0x77b   :  { %6409 = vmatmul.mubr.bf16.gmra.mrb[60].mxu0 %v8732_v4 }
 0x77c   :  { %6425 = vmatpush3.bf16.msra.mxu0 %v8951_v30  ;;  %6428 = vmatprep.mubr.bf16.mxu0 %v8406_v44 }
 0x77d   :  { %6426 = vmatprep.subr.bf16.mxu0 %v8946_v41 }
 0x780   :  { %6427 = vmatpush3.bf16.msra.mxu0 %v8946_v41 }
 0x783   :  { %6429 = vmatmul.mubr.bf16.vlgmr.msra.gmra.mrb[48].mxu0 %v8419_v1 }
 0x784   :  { %6432 = vmatprep.mubr.bf16.mxu0 %v8441_v24 }
 0x78b   :  { %6433 = vmatmul.mubr.bf16.gmra.mrb[52].mxu0 %v8469_v43 }
 0x78c   :  { %6436 = vmatprep.mubr.bf16.mxu0 %v8486_v32 }
 0x793   :  { %6437 = vmatmul.mubr.bf16.gmra.mrb[56].mxu0 %v8509_v0 }
 0x794   :  { %6440 = vmatprep.mubr.bf16.mxu0 %v8523_v12 }
 0x79b   :  { %6441 = vmatmul.mubr.bf16.gmra.mrb[60].mxu0 %v8736_v36 }
 0x79c   :  { %6556 = vmatprep.mubr.bf16.mxu0 %v7855_v19 }
 0x856   :  { %v6430_v14 = vpop.f32.mrb[48].mxu0 }
 0x857   :  { %v3162_v42 = vpop.f32.mrb[49].mxu0 }
 0x858   :  { %v6431_v47 = vpop.f32.mrb[50].mxu0 }
 0x859   :  { %v9011_v44 = vpack.c.bf16 %v6431_v47, %v6430_v14  ;;  %v3165_v1 = vpop.f32.mrb[51].mxu0 }
 0x85a   :  { %v9013_v50 = vpack.c.bf16 %v3165_v1, %v3162_v42 }
 0x85b   :  { %v3251_v24 = vunpack.c.l.bf16 %v9011_v44  ;;  %v3252_v32 = vunpack.c.h.bf16 %v9011_v44 }
 0x85c   :  { %v3249_v37 = vunpack.c.l.bf16 %v9013_v50  ;;  %v3250_v43 = vunpack.c.h.bf16 %v9013_v50  ;;  %6460 = vmatprep.mubr.bf16.mxu1 %v9013_v50 }
 0x85d   :  { %v9020_v7 = vsub.f32 %v6430_v14, %v3251_v24  ;;  %v9022_v31 = vsub.f32 %v6431_v47, %v3252_v32  ;;  %6461 = vmatmul.mubr.bf16.vlgmr.msra.gmra.mrb[48].mxu1 %v9011_v44 }
 0x85e   :  { %v9025_v0 = vsub.f32 %v3162_v42, %v3249_v37  ;;  %v9027_v12 = vsub.f32 %v3165_v1, %v3250_v43  ;;  %v6434_v4 = vpop.f32.mrb[52].mxu0  ;;  %6477 = vmatpush3.bf16.msra.mxu1 %v8329_v38  ;;  %v10020_v43 = vld [vmem:[#allocation100_spill] sm:$0xff] }
 0x85f   :  { %v3282_v36 = vpack.c.bf16 %v9022_v31, %v9020_v7  ;;  %v3178_v51 = vpop.f32.mrb[53].mxu0  ;;  %6478 = vmatprep.subr.bf16.mxu1 %v8552_v33  ;;  %v10027_v7 = vld [vmem:[#allocation77_spill] sm:$0xff]  ;;  %v10028_v31 = vld [vmem:[#allocation78_spill] sm:$0xff] }
 0x860   :  { %v3281_v15 = vpack.c.bf16 %v9027_v12, %v9025_v0  ;;  %v6435_v57 = vpop.f32.mrb[54].mxu0  ;;  %v10029_v0 = vld [vmem:[#allocation34_spill] sm:$0xff]  ;;  %v10030_v12 = vld [vmem:[#allocation81_spill] sm:$0xff] }
 0x861   :  { %v9035_v9 = vpack.c.bf16 %v6435_v57, %v6434_v4  ;;  %v3181_v2 = vpop.f32.mrb[55].mxu0 }
 0x862   :  { %v9037_v59 = vpack.c.bf16 %v3181_v2, %v3178_v51  ;;  %6479 = vmatpush3.bf16.msra.mxu1 %v8552_v33 }
 0x863   :  { %v3255_v3 = vunpack.c.l.bf16 %v9035_v9  ;;  %v3256_v25 = vunpack.c.h.bf16 %v9035_v9  ;;  %6480 = vmatprep.subr.bf16.mxu1 %v8556_v46 }
 0x864   :  { %v3253_v6 = vunpack.c.l.bf16 %v9037_v59  ;;  %v3254_v27 = vunpack.c.h.bf16 %v9037_v59  ;;  %6464 = vmatprep.mubr.bf16.mxu1 %v9037_v59 }
 0x865   :  { %v9046_v28 = vsub.f32 %v6434_v4, %v3255_v3  ;;  %v9048_v22 = vsub.f32 %v6435_v57, %v3256_v25  ;;  %6465 = vmatmul.mubr.bf16.gmra.mrb[52].mxu1 %v9035_v9  ;;  %v10031_v57 = vld [vmem:[#allocation82_spill] sm:$0xff] }
 0x866   :  { %v9051_v40 = vsub.f32 %v3178_v51, %v3253_v6  ;;  %v9053_v34 = vsub.f32 %v3181_v2, %v3254_v27  ;;  %v6438_v35 = vpop.f32.mrb[56].mxu0  ;;  %6481 = vmatpush3.bf16.msra.mxu1 %v8556_v46  ;;  %v5166_v51 = vld [vmem:[%s9722_s1 + $0x390] sm:$0xff]  ;;  %v10032_v2 = vld [vmem:[#allocation83_spill] sm:$0xff] }
 0x867   :  { %v3284_v55 = vpack.c.bf16 %v9048_v22, %v9046_v28  ;;  %v3194_v52 = vpop.f32.mrb[57].mxu0  ;;  %6482 = vmatprep.subr.bf16.mxu1 %v8585_v54  ;;  %v2679_v3 = vsub.f32 %v10030_v12, %v5166_v51  ;;  %v10033_v27 = vld [vmem:[#allocation84_spill] sm:$0xff] }
 0x868   :  { %v3283_v10 = vpack.c.bf16 %v9053_v34, %v9051_v40  ;;  %v6439_v53 = vpop.f32.mrb[58].mxu0  ;;  %v2710_v28 = vsub.f32 0.0, %v10033_v27  ;;  %v5167_v40 = vld [vmem:[%s9722_s1 + $0x398] sm:$0xff] }
 0x869   :  { %v3246_v45 = vpack.c.bf16 %v6439_v53, %v6438_v35  ;;  %v3197_v58 = vpop.f32.mrb[59].mxu0  ;;  %v10034_v34 = vld [vmem:[#allocation85_spill] sm:$0xff] }
 0x86a   :  { %v3245_v13 = vpack.c.bf16 %v3197_v58, %v3194_v52  ;;  %6483 = vmatpush3.bf16.msra.mxu1 %v8585_v54 }
 0x86b   :  { %v3259_v16 = vunpack.c.l.bf16 %v3246_v45  ;;  %v3260_v41 = vunpack.c.h.bf16 %v3246_v45  ;;  %6484 = vmatprep.subr.bf16.mxu1 %v10017_v29 }
 0x86c   :  { %v3257_v20 = vunpack.c.l.bf16 %v3245_v13  ;;  %v3258_v39 = vunpack.c.h.bf16 %v3245_v13  ;;  %6468 = vmatprep.mubr.bf16.mxu1 %v3245_v13 }
 0x86d   :  { %v9063_v63 = vsub.f32 %v6438_v35, %v3259_v16  ;;  %v9065_v23 = vsub.f32 %v6439_v53, %v3260_v41  ;;  %6469 = vmatmul.mubr.bf16.gmra.mrb[56].mxu1 %v3246_v45  ;;  %v2715_v35 = vsub.f32 0.0, %v10034_v34  ;;  %v2695_v53 = vmax.f32 %v2679_v3, 0.0  ;;  %v10036_v16 = vld [vmem:[#allocation87_spill] sm:$0xff] }
 0x86e   :  { %v3273_v18 = vsub.f32 %v3194_v52, %v3257_v20  ;;  %v3274_v48 = vsub.f32 %v3197_v58, %v3258_v39  ;;  %v6442_v26 = vpop.f32.mrb[60].mxu0  ;;  %6485 = vmatpush3.bf16.msra.mxu1 %v10017_v29  ;;  %v10035_v52 = vld [vmem:[#allocation86_spill] sm:$0xff]  ;;  %v2716_v41 = vsub.f32 0.0, %v10036_v16  ;;  %v2680_v39 = vsub.f32 %v10032_v2, %v5167_v40 }
 0x86f   :  { %v3286_v56 = vpack.c.bf16 %v9065_v23, %v9063_v63  ;;  %v3210_v30 = vpop.f32.mrb[61].mxu0  ;;  %6486 = vmatprep.subr.bf16.mxu1 %v10018_v60  ;;  %v5170_v23 = vld [vmem:[%s9722_s1 + $0x3b0] sm:$0xff] }
 0x870   :  { %v3285_v17 = vpack.c.bf16 %v3274_v48, %v3273_v18  ;;  %v6443_v5 = vpop.f32.mrb[62].mxu0  ;;  %v10038_v18 = vld [vmem:[#allocation89_spill] sm:$0xff] }
 0x871   :  { %v3248_v8 = vpack.c.bf16 %v6443_v5, %v6442_v26  ;;  %v3213_v62 = vpop.f32.mrb[63].mxu0  ;;  %v2719_v48 = vsub.f32 0.0, %v10038_v18 }
 0x872   :  { %v3247_v61 = vpack.c.bf16 %v3213_v62, %v3210_v30  ;;  %6487 = vmatpush3.bf16.msra.mxu1 %v10018_v60 }
 0x873   :  { %v3263_v49 = vunpack.c.l.bf16 %v3248_v8  ;;  %v3264_v21 = vunpack.c.h.bf16 %v3248_v8  ;;  %6488 = vmatprep.subr.bf16.mxu1 %v10019_v11 }
 0x874   :  { %v3261_v14 = vunpack.c.l.bf16 %v3247_v61  ;;  %v3262_v42 = vunpack.c.h.bf16 %v3247_v61  ;;  %6472 = vmatprep.mubr.bf16.mxu1 %v3247_v61 }
 0x875   :  { %v3279_v47 = vsub.f32 %v6442_v26, %v3263_v49  ;;  %v3280_v1 = vsub.f32 %v6443_v5, %v3264_v21  ;;  %6473 = vmatmul.mubr.bf16.gmra.mrb[60].mxu1 %v3248_v8  ;;  %v10039_v26 = vld [vmem:[#allocation90_spill] sm:$0xff]  ;;  %v10041_v5 = vld [vmem:[#allocation92_spill] sm:$0xff]  ;;  %v2731_v49 = vsub.f32 %v2715_v35, %v5170_v23 }
 0x876   :  { %v3277_v24 = vsub.f32 %v3210_v30, %v3261_v14  ;;  %v3278_v32 = vsub.f32 %v3213_v62, %v3262_v42  ;;  %6489 = vmatpush3.bf16.msra.mxu1 %v10019_v11  ;;  %6492 = vmatprep.mubr.bf16.mxu1 %v9013_v50  ;;  %v10026_v50 = vld [vmem:[#allocation76_spill] sm:$0xff]  ;;  %v10040_v30 = vld [vmem:[#allocation91_spill] sm:$0xff]  ;;  %v5168_v21 = vld [vmem:[%s9722_s1 + $0x3a0] sm:$0xff] }
 0x877   :  { %v3288_v37 = vpack.c.bf16 %v3280_v1, %v3279_v47  ;;  %6490 = vmatprep.subr.bf16.mxu1 %v10020_v43  ;;  %v2683_v47 = vsub.f32 %v10034_v34, %v5170_v23  ;;  %v5172_v34 = vld [vmem:[%s9722_s1 + $0x3c0] sm:$0xff]  ;;  %v10045_v35 = vld [vmem:[#allocation96_spill] sm:$0xff] }
 0x878   :  { %v3287_v4 = vpack.c.bf16 %v3278_v32, %v3277_v24  ;;  %v5171_v24 = vld [vmem:[%s9722_s1 + $0x3b8] sm:$0xff]  ;;  %v10043_v32 = vld [vmem:[#allocation94_spill] sm:$0xff]  ;;  %v2685_v23 = vsub.f32 %v10039_v26, %v5172_v34 }
 0x87a   :  { %6491 = vmatpush3.bf16.msra.mxu1 %v10020_v43 }
 0x87b   :  { %6508 = vmatprep.subr.bf16.mxu1 %v8329_v38 }
 0x87d   :  { %6493 = vmatmul.mubr.bf16.vlgmr.msra.gmra.mrb[48].mxu1 %v9011_v44  ;;  %v10025_v44 = vld [vmem:[#allocation75_spill] sm:$0xff] }
 0x87e   :  { %6496 = vmatprep.mubr.bf16.mxu1 %v9037_v59  ;;  %6509 = vmatpush3.bf16.msra.mxu1 %v8329_v38  ;;  %v10021_v38 = vld [vmem:[#allocation35_spill] sm:$0xff]  ;;  %v2712_v59 = vsub.f32 0.0, %v10032_v2  ;;  %v2699_v2 = vmax.f32 %v2683_v47, 0.0 }
 0x87f   :  { %6510 = vmatprep.subr.bf16.mxu1 %v8552_v33 }
 0x882   :  { %6511 = vmatpush3.bf16.msra.mxu1 %v8552_v33  ;;  %v10022_v33 = vld [vmem:[#allocation72_spill] sm:$0xff] }
 0x883   :  { %6512 = vmatprep.subr.bf16.mxu1 %v8556_v46 }
 0x885   :  { %6497 = vmatmul.mubr.bf16.gmra.mrb[52].mxu1 %v9035_v9  ;;  %v2709_v9 = vsub.f32 0.0, %v10031_v57 }
 0x886   :  { %6500 = vmatprep.mubr.bf16.mxu1 %v3245_v13  ;;  %6513 = vmatpush3.bf16.msra.mxu1 %v8556_v46  ;;  %v10023_v46 = vld [vmem:[#allocation73_spill] sm:$0xff]  ;;  %v5165_v13 = vld [vmem:[%s9722_s1 + $0x388] sm:$0xff] }
 0x887   :  { %6514 = vmatprep.subr.bf16.mxu1 %v8585_v54  ;;  %v2726_v63 = vsub.f32 %v2710_v28, %v5165_v13 }
 0x88a   :  { %6515 = vmatpush3.bf16.msra.mxu1 %v8585_v54  ;;  %v10024_v54 = vld [vmem:[#allocation74_spill] sm:$0xff] }
 0x88b   :  { %6516 = vmatprep.subr.bf16.mxu1 %v10017_v29 }
 0x88d   :  { %6501 = vmatmul.mubr.bf16.gmra.mrb[56].mxu1 %v3246_v45 }
 0x88e   :  { %6504 = vmatprep.mubr.bf16.mxu1 %v3247_v61  ;;  %6517 = vmatpush3.bf16.msra.mxu1 %v10017_v29  ;;  %v10037_v29 = vld [vmem:[#allocation88_spill] sm:$0xff]  ;;  %v2678_v61 = vsub.f32 %v10033_v27, %v5165_v13 }
 0x88f   :  { %6518 = vmatprep.subr.bf16.mxu1 %v10018_v60  ;;  %v2714_v20 = vsub.f32 0.0, %v10037_v29 }
 0x892   :  { %6519 = vmatpush3.bf16.msra.mxu1 %v10018_v60  ;;  %v2720_v60 = vsub.f32 0.0, %v10040_v30 }
 0x893   :  { %6520 = vmatprep.subr.bf16.mxu1 %v10019_v11 }
 0x895   :  { %6505 = vmatmul.mubr.bf16.gmra.mrb[60].mxu1 %v3248_v8  ;;  %v2718_v8 = vsub.f32 0.0, %v10041_v5 }
 0x896   :  { %6521 = vmatpush3.bf16.msra.mxu1 %v10019_v11  ;;  %6524 = vmatprep.mubr.bf16.mxu1 %v3281_v15  ;;  %v5164_v15 = vld [vmem:[%s9722_s1 + $0x380] sm:$0xff]  ;;  %v10042_v11 = vld [vmem:[#allocation93_spill] sm:$0xff] }
 0x897   :  { %6522 = vmatprep.subr.bf16.mxu1 %v10020_v43  ;;  %v2677_v6 = vsub.f32 %v10031_v57, %v5164_v15  ;;  %v2725_v22 = vsub.f32 %v2709_v9, %v5164_v15  ;;  %v2723_v14 = vsub.f32 0.0, %v10042_v11  ;;  %v2684_v15 = vsub.f32 %v10036_v16, %v5171_v24 }
 0x899   :  { %v2693_v58 = vmax.f32 %v2677_v6, 0.0  ;;  %v2700_v16 = vmax.f32 %v2684_v15, 0.0 }
 0x89a   :  { %6523 = vmatpush3.bf16.msra.mxu1 %v10020_v43  ;;  %v2696_v43 = vmax.f32 %v2680_v39, 0.0 }
 0x89b   :  { %6636 = vmatprep.subr.bf16.mxu1 %v10021_v38 }
 0x89d   :  { %6525 = vmatmul.mubr.bf16.vlgmr.msra.gmra.mrb[48].mxu1 %v3282_v36  ;;  %v2711_v36 = vsub.f32 0.0, %v10030_v12 }
 0x89e   :  { %6528 = vmatprep.mubr.bf16.mxu1 %v3283_v10  ;;  %6637 = vmatpush3.bf16.msra.mxu1 %v10021_v38  ;;  %v2713_v10 = vsub.f32 0.0, %v10035_v52  ;;  %v2732_v38 = vsub.f32 %v2716_v41, %v5171_v24 }
 0x89f   :  { %6638 = vmatprep.subr.bf16.mxu1 %v10022_v33  ;;  %v2727_v25 = vsub.f32 %v2711_v36, %v5166_v51  ;;  %v2694_v36 = vmax.f32 %v2678_v61, 0.0  ;;  %v2747_v51 = vmax.f32 %v2731_v49, 0.0  ;;  %v5173_v49 = vld [vmem:[%s9722_s1 + $0x3c8] sm:$0xff] }
 0x8a0   :  { %v2729_v1 = vsub.f32 %v2713_v10, %v5168_v21 }
 0x8a1   :  { %v2743_v45 = vmax.f32 %v2727_v25, 0.0  ;;  %v5174_v25 = vld [vmem:[%s9722_s1 + $0x3d0] sm:$0xff]  ;;  %v2763_v13 = vsub.f32 %v2699_v2, %v2747_v51 }
 0x8a2   :  { %6639 = vmatpush3.bf16.msra.mxu1 %v10022_v33  ;;  %v5169_v33 = vld [vmem:[%s9722_s1 + $0x3a8] sm:$0xff]  ;;  %v2687_v41 = vsub.f32 %v10038_v18, %v5174_v25 }
 0x8a3   :  { %6640 = vmatprep.subr.bf16.mxu1 %v10023_v46  ;;  %v2759_v42 = vsub.f32 %v2695_v53, %v2743_v45  ;;  %v2682_v3 = vsub.f32 %v10037_v29, %v5169_v33  ;;  %v5175_v29 = vld [vmem:[%s9722_s1 + $0x3d8] sm:$0xff] }
 0x8a4   :  { %v2688_v47 = vsub.f32 %v10040_v30, %v5175_v29  ;;  %v2703_v2 = vmax.f32 %v2687_v41, 0.0  ;;  %v2701_v30 = vmax.f32 %v2685_v23, 0.0 }
 0x8a5   :  { %6529 = vmatmul.mubr.bf16.gmra.mrb[52].mxu1 %v3284_v55  ;;  %v2728_v55 = vsub.f32 %v2712_v59, %v5167_v40  ;;  %v2745_v59 = vmax.f32 %v2729_v1, 0.0  ;;  %v2735_v40 = vsub.f32 %v2719_v48, %v5174_v25 }
 0x8a6   :  { %6532 = vmatprep.mubr.bf16.mxu1 %v3285_v17  ;;  %6641 = vmatpush3.bf16.msra.mxu1 %v10023_v46  ;;  %v2741_v17 = vmax.f32 %v2725_v22, 0.0  ;;  %v10044_v46 = vld [vmem:[#allocation95_spill] sm:$0xff]  ;;  %v2748_v22 = vmax.f32 %v2732_v38, 0.0 }
 0x8a7   :  { %6642 = vmatprep.subr.bf16.mxu1 %v10024_v54  ;;  %v2744_v62 = vmax.f32 %v2728_v55, 0.0  ;;  %v2722_v55 = vsub.f32 0.0, %v10045_v35 }
 0x8a9   :  { %v2760_v12 = vsub.f32 %v2696_v43, %v2744_v62  ;;  %v2751_v62 = vmax.f32 %v2735_v40, 0.0  ;;  %v2736_v43 = vsub.f32 %v2720_v60, %v5175_v29  ;;  %v5178_v60 = vld [vmem:[%s9722_s1 + $0x3f0] sm:$0xff] }
 0x8aa   :  { %6643 = vmatpush3.bf16.msra.mxu1 %v10024_v54  ;;  %v2724_v54 = vsub.f32 0.0, %v10044_v46 }
 0x8ab   :  { %6644 = vmatprep.subr.bf16.mxu1 %v10025_v44  ;;  %v2752_v25 = vmax.f32 %v2736_v43, 0.0 }
 0x8ad   :  { %6533 = vmatmul.mubr.bf16.gmra.mrb[56].mxu1 %v3286_v56  ;;  %v2717_v56 = vsub.f32 0.0, %v10039_v26 }
 0x8ae   :  { %6536 = vmatprep.mubr.bf16.mxu1 %v3287_v4  ;;  %6645 = vmatpush3.bf16.msra.mxu1 %v10025_v44  ;;  %v2742_v4 = vmax.f32 %v2726_v63, 0.0  ;;  %v2757_v44 = vsub.f32 %v2693_v58, %v2741_v17  ;;  %v2698_v63 = vmax.f32 %v2682_v3, 0.0  ;;  %v2764_v17 = vsub.f32 %v2700_v16, %v2748_v22 }
 0x8af   :  { %6646 = vmatprep.subr.bf16.mxu1 %v10026_v50  ;;  %v2733_v61 = vsub.f32 %v2717_v56, %v5172_v34  ;;  %v2734_v56 = vsub.f32 %v2718_v8, %v5173_v49 }
 0x8b0   :  { %v2758_v28 = vsub.f32 %v2694_v36, %v2742_v4 }
 0x8b1   :  { %v2749_v51 = vmax.f32 %v2733_v61, 0.0 }
 0x8b2   :  { %6647 = vmatpush3.bf16.msra.mxu1 %v10026_v50  ;;  %v2681_v50 = vsub.f32 %v10035_v52, %v5168_v21 }
 0x8b3   :  { %6648 = vmatprep.subr.bf16.mxu1 %v10027_v7  ;;  %v2765_v34 = vsub.f32 %v2701_v30, %v2749_v51 }
 0x8b4   :  { %v2697_v53 = vmax.f32 %v2681_v50, 0.0  ;;  %v2686_v50 = vsub.f32 %v10041_v5, %v5173_v49  ;;  %v5176_v5 = vld [vmem:[%s9722_s1 + $0x3e0] sm:$0xff] }
 0x8b5   :  { %6537 = vmatmul.mubr.bf16.gmra.mrb[60].mxu1 %v3288_v37  ;;  %v2721_v37 = vsub.f32 0.0, %v10043_v32 }
 0x8b6   :  { %6649 = vmatpush3.bf16.msra.mxu1 %v10027_v7  ;;  %v2730_v7 = vsub.f32 %v2714_v20, %v5169_v33  ;;  %v2761_v39 = vsub.f32 %v2697_v53, %v2745_v59  ;;  %v2702_v22 = vmax.f32 %v2686_v50, 0.0 }
 0x8b7   :  { %6650 = vmatprep.subr.bf16.mxu1 %v10028_v31 }
 0x8b8   :  { %v2746_v45 = vmax.f32 %v2730_v7, 0.0 }
 0x8ba   :  { %6651 = vmatpush3.bf16.msra.mxu1 %v10028_v31  ;;  %v2762_v21 = vsub.f32 %v2698_v63, %v2746_v45 }
 0x8bb   :  { %6668 = vmatprep.subr.bf16.mxu1 %v10029_v0 }
 0x970   :  { %v6526_v31 = vpop.f32.mrb[48].mxu1 }
 0x971   :  { %v3598_v57 = vadd.f32 %v6526_v31, %v2759_v42  ;;  %v3517_v9 = vpop.f32.mrb[49].mxu1 }
 0x972   :  { %v3596_v6 = vadd.f32 %v3517_v9, %v2757_v44  ;;  %v6527_v27 = vpop.f32.mrb[50].mxu1 }
 0x973   :  { %v3599_v52 = vadd.f32 %v6527_v27, %v2760_v12  ;;  %v3520_v10 = vpop.f32.mrb[51].mxu1 }
 0x974   :  { %v3597_v58 = vadd.f32 %v3520_v10, %v2758_v28  ;;  %v2704_v28 = vmax.f32 %v2688_v47, 0.0  ;;  %v2739_v10 = vsub.f32 %v2723_v14, %v5178_v60 }
 0x975   :  { %v9183_v20 = vpack.c.bf16 %v3599_v52, %v3598_v57 }
 0x976   :  { %v9186_v48 = vpack.c.bf16 %v3597_v58, %v3596_v6  ;;  %v2768_v29 = vsub.f32 %v2704_v28, %v2752_v25 }
 0x977   :  { %v3623_v18 = vunpack.c.h.bf16 %v9183_v20  ;;  %v3622_v42 = vunpack.c.l.bf16 %v9183_v20 }
 0x978   :  { %v3621_v1 = vunpack.c.h.bf16 %v9186_v48  ;;  %v6530_v24 = vpop.f32.mrb[52].mxu1  ;;  %v3620_v26 = vunpack.c.l.bf16 %v9186_v48 }
 0x979   :  { %v3639_v4 = vsub.f32 %v3599_v52, %v3623_v18  ;;  %v3602_v38 = vadd.f32 %v6530_v24, %v2763_v13  ;;  %v3533_v33 = vpop.f32.mrb[53].mxu1  ;;  %v3638_v44 = vsub.f32 %v3598_v57, %v3622_v42  ;;  %v2750_v57 = vmax.f32 %v2734_v56, 0.0 }
 0x97a   :  { %v3637_v7 = vsub.f32 %v3597_v58, %v3621_v1  ;;  %v3600_v31 = vadd.f32 %v3533_v33, %v2761_v39  ;;  %v6531_v12 = vpop.f32.mrb[54].mxu1  ;;  %v3636_v36 = vsub.f32 %v3596_v6, %v3620_v26  ;;  %v2767_v6 = vsub.f32 %v2703_v2, %v2751_v62 }
 0x97b   :  { %v3603_v15 = vadd.f32 %v6531_v12, %v2764_v17  ;;  %v3536_v9 = vpop.f32.mrb[55].mxu1  ;;  %v3653_v59 = vpack.c.bf16 %v3639_v4, %v3638_v44  ;;  %v2691_v52 = vsub.f32 %v10042_v11, %v5178_v60  ;;  %v2689_v58 = vsub.f32 %v10043_v32, %v5176_v5  ;;  %v5179_v11 = vld [vmem:[%s9722_s1 + $0x3f8] sm:$0xff] }
 0x97c   :  { %v3601_v8 = vadd.f32 %v3536_v9, %v2762_v21  ;;  %v3652_v3 = vpack.c.bf16 %v3637_v7, %v3636_v36  ;;  %v2737_v13 = vsub.f32 %v2721_v37, %v5176_v5  ;;  %v2766_v39 = vsub.f32 %v2702_v22, %v2750_v57  ;;  %v5177_v37 = vld [vmem:[%s9722_s1 + $0x3e8] sm:$0xff] }
 0x97d   :  { %v9207_v27 = vpack.c.bf16 %v3603_v15, %v3602_v38  ;;  %v2740_v32 = vsub.f32 %v2724_v54, %v5179_v11  ;;  %v2738_v42 = vsub.f32 %v2722_v55, %v5177_v37  ;;  %v2755_v24 = vmax.f32 %v2739_v10, 0.0 }
 0x97e   :  { %v9209_v40 = vpack.c.bf16 %v3601_v8, %v3600_v31  ;;  %6540 = vmatprep.subr.bf16.mxu0 %v3652_v3  ;;  %v2692_v43 = vsub.f32 %v10044_v46, %v5179_v11  ;;  %v2753_v4 = vmax.f32 %v2737_v13, 0.0  ;;  %v2707_v44 = vmax.f32 %v2691_v52, 0.0 }
 0x97f   :  { %v3627_v53 = vunpack.c.h.bf16 %v9207_v27  ;;  %6541 = vmatpush3.bf16.msra.mxu0 %v3652_v3  ;;  %v3626_v45 = vunpack.c.l.bf16 %v9207_v27  ;;  %v2756_v50 = vmax.f32 %v2740_v32, 0.0  ;;  %v2705_v55 = vmax.f32 %v2689_v58, 0.0  ;;  %v10046_v32 = vld [vmem:[#allocation40_spill] sm:$0xff] }
 0x980   :  { %v3625_v16 = vunpack.c.h.bf16 %v9209_v40  ;;  %v6534_v41 = vpop.f32.mrb[56].mxu1  ;;  %6542 = vmatprep.subr.bf16.mxu0 %v3653_v59  ;;  %v3624_v63 = vunpack.c.l.bf16 %v9209_v40  ;;  %v2771_v36 = vsub.f32 %v2707_v44, %v2755_v24  ;;  %v2708_v51 = vmax.f32 %v2692_v43, 0.0  ;;  %v10060_v24 = vld [vmem:[#allocation80_spill] sm:$0xff] }
 0x981   :  { %v3643_v14 = vsub.f32 %v3603_v15, %v3627_v53  ;;  %v3606_v23 = vadd.f32 %v6534_v41, %v2767_v6  ;;  %v3549_v17 = vpop.f32.mrb[57].mxu1  ;;  %v3642_v62 = vsub.f32 %v3602_v38, %v3626_v45  ;;  %v2690_v38 = vsub.f32 %v10045_v35, %v5177_v37  ;;  %v10047_v37 = vld [vmem:[#allocation41_spill] sm:$0xff] }
 0x982   :  { %v3641_v61 = vsub.f32 %v3601_v8, %v3625_v16  ;;  %v3604_v49 = vadd.f32 %v3549_v17, %v2765_v34  ;;  %v6535_v18 = vpop.f32.mrb[58].mxu1  ;;  %v3640_v21 = vsub.f32 %v3600_v31, %v3624_v63  ;;  %v2754_v31 = vmax.f32 %v2738_v42, 0.0  ;;  %v10052_v42 = vld [vmem:[#allocation79_spill] sm:$0xff] }
 0x983   :  { %v3607_v47 = vadd.f32 %v6535_v18, %v2768_v29  ;;  %v3552_v1 = vpop.f32.mrb[59].mxu1  ;;  %6543 = vmatpush3.bf16.msra.mxu0 %v3653_v59  ;;  %v3655_v26 = vpack.c.bf16 %v3643_v14, %v3642_v62  ;;  %v2769_v35 = vsub.f32 %v2705_v55, %v2753_v4  ;;  %v2706_v2 = vmax.f32 %v2690_v38, 0.0  ;;  %v10050_v18 = vld [vmem:[#allocation56_spill] sm:$0xff] }
 0x984   :  { %v3605_v56 = vadd.f32 %v3552_v1, %v2766_v39  ;;  %v3654_v54 = vpack.c.bf16 %v3641_v61, %v3640_v21  ;;  %v2772_v3 = vsub.f32 %v2708_v51, %v2756_v50  ;;  %v10048_v61 = vld [vmem:[#allocation48_spill] sm:$0xff]  ;;  %v10051_v21 = vld [vmem:[#allocation57_spill] sm:$0xff] }
 0x985   :  { %v9233_v33 = vpack.c.bf16 %v3607_v47, %v3606_v23  ;;  %v2770_v28 = vsub.f32 %v2706_v2, %v2754_v31  ;;  %v10059_v1 = vld [vmem:[#allocation64_spill] sm:$0xff] }
 0x986   :  { %v9235_v7 = vpack.c.bf16 %v3605_v56, %v3604_v49  ;;  %6544 = vmatprep.subr.bf16.mxu0 %v3654_v54 }
 0x987   :  { %v3631_v12 = vunpack.c.h.bf16 %v9233_v33  ;;  %6545 = vmatpush3.bf16.msra.mxu0 %v3654_v54  ;;  %v3630_v46 = vunpack.c.l.bf16 %v9233_v33 }
 0x988   :  { %v3629_v15 = vunpack.c.h.bf16 %v9235_v7  ;;  %v6538_v9 = vpop.f32.mrb[60].mxu1  ;;  %6546 = vmatprep.subr.bf16.mxu0 %v3655_v26  ;;  %v3628_v59 = vunpack.c.l.bf16 %v9235_v7 }
 0x989   :  { %v3647_v30 = vsub.f32 %v3607_v47, %v3631_v12  ;;  %v3610_v60 = vadd.f32 %v6538_v9, %v2771_v36  ;;  %v3565_v8 = vpop.f32.mrb[61].mxu1  ;;  %v3646_v25 = vsub.f32 %v3606_v23, %v3630_v46  ;;  %v10058_v47 = vld [vmem:[#allocation63_spill] sm:$0xff] }
 0x98a   :  { %v3645_v57 = vsub.f32 %v3605_v56, %v3629_v15  ;;  %v3608_v5 = vadd.f32 %v3565_v8, %v2769_v35  ;;  %v6539_v6 = vpop.f32.mrb[62].mxu1  ;;  %v3644_v22 = vsub.f32 %v3604_v49, %v3628_v59  ;;  %v10049_v49 = vld [vmem:[#allocation49_spill] sm:$0xff] }
 0x98b   :  { %v3611_v34 = vadd.f32 %v6539_v6, %v2772_v3  ;;  %v3568_v52 = vpop.f32.mrb[63].mxu1  ;;  %6547 = vmatpush3.bf16.msra.mxu0 %v3655_v26  ;;  %v3657_v10 = vpack.c.bf16 %v3647_v30, %v3646_v25  ;;  %v10061_v26 = vld [vmem:[#allocation4_spill] sm:$0xff]  ;;  %v10062_v35 = vld [vmem:[#allocation65_spill] sm:$0xff] }
 0x98c   :  { %v3609_v53 = vadd.f32 %v3568_v52, %v2770_v28  ;;  %v3656_v45 = vpack.c.bf16 %v3645_v57, %v3644_v22  ;;  %v10063_v57 = vld [vmem:[#allocation66_spill] sm:$0xff] }
 0x98d   :  { %v9241_v58 = vpack.c.bf16 %v3611_v34, %v3610_v60 }
 0x98e   :  { %v3618_v13 = vpack.c.bf16 %v3609_v53, %v3608_v5  ;;  %6548 = vmatprep.subr.bf16.mxu0 %v3656_v45 }
 0x98f   :  { %v3635_v16 = vunpack.c.h.bf16 %v9241_v58  ;;  %6549 = vmatpush3.bf16.msra.mxu0 %v3656_v45  ;;  %v3634_v41 = vunpack.c.l.bf16 %v9241_v58 }
 0x990   :  { %v3633_v29 = vunpack.c.h.bf16 %v3618_v13  ;;  %6550 = vmatprep.subr.bf16.mxu0 %v3657_v10  ;;  %v3632_v39 = vunpack.c.l.bf16 %v3618_v13 }
 0x991   :  { %v3651_v63 = vsub.f32 %v3611_v34, %v3635_v16  ;;  %v3650_v11 = vsub.f32 %v3610_v60, %v3634_v41 }
 0x992   :  { %v3649_v14 = vsub.f32 %v3609_v53, %v3633_v29  ;;  %v3648_v23 = vsub.f32 %v3608_v5, %v3632_v39 }
 0x993   :  { %6551 = vmatpush3.bf16.msra.mxu0 %v3657_v10  ;;  %v3659_v17 = vpack.c.bf16 %v3651_v63, %v3650_v11 }
 0x994   :  { %v3658_v62 = vpack.c.bf16 %v3649_v14, %v3648_v23  ;;  %v10065_v14 = vld [vmem:[#allocation68_spill] sm:$0xff] }
 0x996   :  { %6552 = vmatprep.subr.bf16.mxu0 %v3658_v62 }
 0x997   :  { %6553 = vmatpush3.bf16.msra.mxu0 %v3658_v62 }
 0x998   :  { %6554 = vmatprep.subr.bf16.mxu0 %v3659_v17 }
 0x99b   :  { %6555 = vmatpush3.bf16.msra.mxu0 %v3659_v17 }
 0x99c   :  { %6572 = vmatprep.subr.bf16.mxu0 %v9186_v48 }
 0x99e   :  { %6557 = vmatmul.mubr.bf16.vlgmr.msra.gmra.mrb[64].mxu0 %v10046_v32 }
 0x99f   :  { %6573 = vmatpush3.bf16.msra.mxu0 %v9186_v48  ;;  %6560 = vmatprep.mubr.bf16.mxu0 %v10047_v37 }
 0x9a0   :  { %6574 = vmatprep.subr.bf16.mxu0 %v9183_v20 }
 0x9a3   :  { %6575 = vmatpush3.bf16.msra.mxu0 %v9183_v20 }
 0x9a4   :  { %6576 = vmatprep.subr.bf16.mxu0 %v9209_v40 }
 0x9a6   :  { %6561 = vmatmul.mubr.bf16.gmra.mrb[68].mxu0 %v10048_v61 }
 0x9a7   :  { %6577 = vmatpush3.bf16.msra.mxu0 %v9209_v40  ;;  %6564 = vmatprep.mubr.bf16.mxu0 %v10049_v49 }
 0x9a8   :  { %6578 = vmatprep.subr.bf16.mxu0 %v9207_v27 }
 0x9ab   :  { %6579 = vmatpush3.bf16.msra.mxu0 %v9207_v27 }
 0x9ac   :  { %6580 = vmatprep.subr.bf16.mxu0 %v9235_v7 }
 0x9ae   :  { %6565 = vmatmul.mubr.bf16.gmra.mrb[72].mxu0 %v10050_v18 }
 0x9af   :  { %6581 = vmatpush3.bf16.msra.mxu0 %v9235_v7  ;;  %6568 = vmatprep.mubr.bf16.mxu0 %v10051_v21 }
 0x9b0   :  { %6582 = vmatprep.subr.bf16.mxu0 %v9233_v33 }
 0x9b3   :  { %6583 = vmatpush3.bf16.msra.mxu0 %v9233_v33 }
 0x9b4   :  { %6584 = vmatprep.subr.bf16.mxu0 %v3618_v13 }
 0x9b6   :  { %6569 = vmatmul.mubr.bf16.gmra.mrb[76].mxu0 %v10052_v42 }
 0x9b7   :  { %6585 = vmatpush3.bf16.msra.mxu0 %v3618_v13  ;;  %6588 = vmatprep.mubr.bf16.mxu0 %v7855_v19  ;;  %v10053_v19 = vld [vmem:[#allocation46_spill] sm:$0xff] }
 0x9b8   :  { %6586 = vmatprep.subr.bf16.mxu0 %v9241_v58 }
 0x9bb   :  { %6587 = vmatpush3.bf16.msra.mxu0 %v9241_v58 }
 0x9bc   :  { %6604 = vmatprep.subr.bf16.mxu0 %v9186_v48 }
 0x9be   :  { %6589 = vmatmul.mubr.bf16.vlgmr.msra.gmra.mrb[64].mxu0 %v10046_v32 }
 0x9bf   :  { %6605 = vmatpush3.bf16.msra.mxu0 %v9186_v48  ;;  %6592 = vmatprep.mubr.bf16.mxu0 %v10047_v37  ;;  %v10055_v48 = vld [vmem:[#allocation51_spill] sm:$0xff] }
 0x9c0   :  { %6606 = vmatprep.subr.bf16.mxu0 %v9183_v20 }
 0x9c3   :  { %6607 = vmatpush3.bf16.msra.mxu0 %v9183_v20  ;;  %v10054_v20 = vld [vmem:[#allocation47_spill] sm:$0xff] }
 0x9c4   :  { %6608 = vmatprep.subr.bf16.mxu0 %v9209_v40 }
 0x9c6   :  { %6593 = vmatmul.mubr.bf16.gmra.mrb[68].mxu0 %v10048_v61 }
 0x9c7   :  { %6609 = vmatpush3.bf16.msra.mxu0 %v9209_v40  ;;  %6596 = vmatprep.mubr.bf16.mxu0 %v10049_v49  ;;  %v10057_v40 = vld [vmem:[#allocation58_spill] sm:$0xff] }
 0x9c8   :  { %6610 = vmatprep.subr.bf16.mxu0 %v9207_v27 }
 0x9cb   :  { %6611 = vmatpush3.bf16.msra.mxu0 %v9207_v27  ;;  %v10056_v27 = vld [vmem:[#allocation55_spill] sm:$0xff] }
 0x9cc   :  { %6612 = vmatprep.subr.bf16.mxu0 %v9235_v7 }
 0x9ce   :  { %6597 = vmatmul.mubr.bf16.gmra.mrb[72].mxu0 %v10050_v18 }
 0x9cf   :  { %6613 = vmatpush3.bf16.msra.mxu0 %v9235_v7  ;;  %6600 = vmatprep.mubr.bf16.mxu0 %v10051_v21 }
 0x9d0   :  { %6614 = vmatprep.subr.bf16.mxu0 %v9233_v33 }
 0x9d3   :  { %6615 = vmatpush3.bf16.msra.mxu0 %v9233_v33 }
 0x9d4   :  { %6616 = vmatprep.subr.bf16.mxu0 %v3618_v13 }
 0x9d6   :  { %6601 = vmatmul.mubr.bf16.gmra.mrb[76].mxu0 %v10052_v42  ;;  %v10066_v42 = vld [vmem:[#allocation69_spill] sm:$0xff] }
 0x9d7   :  { %6617 = vmatpush3.bf16.msra.mxu0 %v3618_v13  ;;  %6620 = vmatprep.mubr.bf16.mxu0 %v10053_v19 }
 0x9d8   :  { %6618 = vmatprep.subr.bf16.mxu0 %v9241_v58 }
 0x9db   :  { %6619 = vmatpush3.bf16.msra.mxu0 %v9241_v58  ;;  %v10064_v58 = vld [vmem:[#allocation67_spill] sm:$0xff] }
 0x9de   :  { %6621 = vmatmul.mubr.bf16.vlgmr.msra.gmra.mrb[64].mxu0 %v10054_v20 }
 0x9df   :  { %6624 = vmatprep.mubr.bf16.mxu0 %v10055_v48 }
 0x9e6   :  { %6625 = vmatmul.mubr.bf16.gmra.mrb[68].mxu0 %v10056_v27 }
 0x9e7   :  { %6628 = vmatprep.mubr.bf16.mxu0 %v10057_v40 }
 0x9ee   :  { %6629 = vmatmul.mubr.bf16.gmra.mrb[72].mxu0 %v10058_v47 }
 0x9ef   :  { %6632 = vmatprep.mubr.bf16.mxu0 %v10059_v1 }
 0x9f6   :  { %6633 = vmatmul.mubr.bf16.gmra.mrb[76].mxu0 %v10060_v24  ;;  %v10067_v24 = vld [vmem:[#allocation70_spill] sm:$0xff] }
 0x9f7   :  { %6748 = vmatprep.mubr.bf16.mxu0 %v10061_v26 }
 0xab1   :  { %v6622_v43 = vpop.f32.mrb[64].mxu0 }
 0xab2   :  { %v3888_v56 = vpop.f32.mrb[65].mxu0 }
 0xab3   :  { %v6623_v54 = vpop.f32.mrb[66].mxu0 }
 0xab4   :  { %v9297_v4 = vpack.c.bf16 %v6623_v54, %v6622_v43  ;;  %v3891_v38 = vpop.f32.mrb[67].mxu0 }
 0xab5   :  { %v9299_v33 = vpack.c.bf16 %v3891_v38, %v3888_v56 }
 0xab6   :  { %v3977_v44 = vunpack.c.l.bf16 %v9297_v4  ;;  %v3978_v50 = vunpack.c.h.bf16 %v9297_v4 }
 0xab7   :  { %v3975_v7 = vunpack.c.l.bf16 %v9299_v33  ;;  %v3976_v55 = vunpack.c.h.bf16 %v9299_v33  ;;  %6652 = vmatprep.mubr.bf16.mxu1 %v9299_v33 }
 0xab8   :  { %v9306_v31 = vsub.f32 %v6622_v43, %v3977_v44  ;;  %v9308_v12 = vsub.f32 %v6623_v54, %v3978_v50  ;;  %6653 = vmatmul.mubr.bf16.vlgmr.msra.gmra.mrb[64].mxu1 %v9297_v4 }
 0xab9   :  { %v9311_v36 = vsub.f32 %v3888_v56, %v3975_v7  ;;  %v9313_v51 = vsub.f32 %v3891_v38, %v3976_v55  ;;  %v6626_v46 = vpop.f32.mrb[68].mxu0  ;;  %6669 = vmatpush3.bf16.msra.mxu1 %v10029_v0  ;;  %v10068_v55 = vld [vmem:[#allocation71_spill] sm:$0xff] }
 0xaba   :  { %v4008_v15 = vpack.c.bf16 %v9308_v12, %v9306_v31  ;;  %v3904_v9 = vpop.f32.mrb[69].mxu0  ;;  %6670 = vmatprep.subr.bf16.mxu1 %v10062_v35  ;;  %v10072_v31 = vld [vmem:[#allocation27_spill] sm:$0xff]  ;;  %v10073_v12 = vld [vmem:[#allocation28_spill] sm:$0xff] }
 0xabb   :  { %v4007_v2 = vpack.c.bf16 %v9313_v51, %v9311_v36  ;;  %v6627_v59 = vpop.f32.mrb[70].mxu0  ;;  %v10074_v36 = vld [vmem:[#allocation29_spill] sm:$0xff]  ;;  %v10075_v51 = vld [vmem:[#allocation30_spill] sm:$0xff] }
 0xabc   :  { %v9321_v30 = vpack.c.bf16 %v6627_v59, %v6626_v46  ;;  %v3907_v60 = vpop.f32.mrb[71].mxu0 }
 0xabd   :  { %v9323_v8 = vpack.c.bf16 %v3907_v60, %v3904_v9  ;;  %6671 = vmatpush3.bf16.msra.mxu1 %v10062_v35 }
 0xabe   :  { %v3981_v3 = vunpack.c.l.bf16 %v9321_v30  ;;  %v3982_v25 = vunpack.c.h.bf16 %v9321_v30  ;;  %6672 = vmatprep.subr.bf16.mxu1 %v10063_v57 }
 0xabf   :  { %v3979_v5 = vunpack.c.l.bf16 %v9323_v8  ;;  %v3980_v6 = vunpack.c.h.bf16 %v9323_v8  ;;  %6656 = vmatprep.mubr.bf16.mxu1 %v9323_v8 }
 0xac0   :  { %v9332_v28 = vsub.f32 %v6626_v46, %v3981_v3  ;;  %v9334_v22 = vsub.f32 %v6627_v59, %v3982_v25  ;;  %6657 = vmatmul.mubr.bf16.gmra.mrb[68].mxu1 %v9321_v30  ;;  %v5150_v59 = vld [vmem:[%s9722_s1 + $0x310] sm:$0xff]  ;;  %v10080_v3 = vld [vmem:[#allocation38_spill] sm:$0xff] }
 0xac1   :  { %v9337_v34 = vsub.f32 %v3904_v9, %v3979_v5  ;;  %v9339_v52 = vsub.f32 %v3907_v60, %v3980_v6  ;;  %v6630_v10 = vpop.f32.mrb[72].mxu0  ;;  %6673 = vmatpush3.bf16.msra.mxu1 %v10063_v57  ;;  %v10077_v9 = vld [vmem:[#allocation2_spill] sm:$0xff]  ;;  %v10079_v60 = vld [vmem:[#allocation37_spill] sm:$0xff]  ;;  %v2599_v25 = vsub.f32 0.0, %v10080_v3 }
 0xac2   :  { %v4010_v53 = vpack.c.bf16 %v9334_v22, %v9332_v28  ;;  %v3920_v45 = vpop.f32.mrb[73].mxu0  ;;  %6674 = vmatprep.subr.bf16.mxu1 %v10064_v58  ;;  %v10081_v28 = vld [vmem:[#allocation39_spill] sm:$0xff] }
 0xac3   :  { %v4009_v13 = vpack.c.bf16 %v9339_v52, %v9337_v34  ;;  %v6631_v16 = vpop.f32.mrb[74].mxu0  ;;  %v2597_v22 = vsub.f32 0.0, %v10081_v28  ;;  %v5151_v52 = vld [vmem:[%s9722_s1 + $0x318] sm:$0xff] }
 0xac4   :  { %v3972_v41 = vpack.c.bf16 %v6631_v16, %v6630_v10  ;;  %v3923_v29 = vpop.f32.mrb[75].mxu0 }
 0xac5   :  { %v3971_v39 = vpack.c.bf16 %v3923_v29, %v3920_v45  ;;  %6675 = vmatpush3.bf16.msra.mxu1 %v10064_v58 }
 0xac6   :  { %v3985_v63 = vunpack.c.l.bf16 %v3972_v41  ;;  %v3986_v11 = vunpack.c.h.bf16 %v3972_v41  ;;  %6676 = vmatprep.subr.bf16.mxu1 %v10065_v14 }
 0xac7   :  { %v3983_v23 = vunpack.c.l.bf16 %v3971_v39  ;;  %v3984_v17 = vunpack.c.h.bf16 %v3971_v39  ;;  %6660 = vmatprep.mubr.bf16.mxu1 %v3971_v39 }
 0xac8   :  { %v9349_v62 = vsub.f32 %v6630_v10, %v3985_v63  ;;  %v9351_v32 = vsub.f32 %v6631_v16, %v3986_v11  ;;  %6661 = vmatmul.mubr.bf16.gmra.mrb[72].mxu1 %v3972_v41  ;;  %v10082_v10 = vld [vmem:[#allocation42_spill] sm:$0xff]  ;;  %v10084_v63 = vld [vmem:[#allocation44_spill] sm:$0xff] }
 0xac9   :  { %v3999_v37 = vsub.f32 %v3920_v45, %v3983_v23  ;;  %v4000_v61 = vsub.f32 %v3923_v29, %v3984_v17  ;;  %v6634_v49 = vpop.f32.mrb[76].mxu0  ;;  %6677 = vmatpush3.bf16.msra.mxu1 %v10065_v14  ;;  %v2615_v45 = vsub.f32 %v2599_v25, %v5151_v52  ;;  %v2603_v11 = vsub.f32 0.0, %v10084_v63 }
 0xaca   :  { %v4012_v18 = vpack.c.bf16 %v9351_v32, %v9349_v62  ;;  %v3936_v21 = vpop.f32.mrb[77].mxu0  ;;  %6678 = vmatprep.subr.bf16.mxu1 %v10066_v42  ;;  %v2567_v17 = vsub.f32 %v10080_v3, %v5151_v52  ;;  %v5154_v32 = vld [vmem:[%s9722_s1 + $0x330] sm:$0xff] }
 0xacb   :  { %v4011_v19 = vpack.c.bf16 %v4000_v61, %v3999_v37  ;;  %v6635_v20 = vpop.f32.mrb[78].mxu0  ;;  %v10086_v37 = vld [vmem:[#allocation50_spill] sm:$0xff] }
 0xacc   :  { %v3974_v48 = vpack.c.bf16 %v6635_v20, %v6634_v49  ;;  %v3939_v27 = vpop.f32.mrb[79].mxu0  ;;  %v2606_v61 = vsub.f32 0.0, %v10086_v37 }
 0xacd   :  { %v3973_v40 = vpack.c.bf16 %v3939_v27, %v3936_v21  ;;  %6679 = vmatpush3.bf16.msra.mxu1 %v10066_v42 }
 0xace   :  { %v3989_v47 = vunpack.c.l.bf16 %v3974_v48  ;;  %v3990_v1 = vunpack.c.h.bf16 %v3974_v48  ;;  %6680 = vmatprep.subr.bf16.mxu1 %v10067_v24 }
 0xacf   :  { %v3987_v43 = vunpack.c.l.bf16 %v3973_v40  ;;  %v3988_v56 = vunpack.c.h.bf16 %v3973_v40  ;;  %6664 = vmatprep.mubr.bf16.mxu1 %v3973_v40 }
 0xad0   :  { %v4005_v54 = vsub.f32 %v6634_v49, %v3989_v47  ;;  %v4006_v38 = vsub.f32 %v6635_v20, %v3990_v1  ;;  %6665 = vmatmul.mubr.bf16.gmra.mrb[76].mxu1 %v3974_v48  ;;  %v10087_v49 = vld [vmem:[#allocation52_spill] sm:$0xff]  ;;  %v10089_v20 = vld [vmem:[#allocation54_spill] sm:$0xff] }
 0xad1   :  { %v4003_v44 = vsub.f32 %v3936_v21, %v3987_v43  ;;  %v4004_v50 = vsub.f32 %v3939_v27, %v3988_v56  ;;  %6681 = vmatpush3.bf16.msra.mxu1 %v10067_v24  ;;  %6684 = vmatprep.mubr.bf16.mxu1 %v9299_v33  ;;  %v10071_v33 = vld [vmem:[#allocation26_spill] sm:$0xff]  ;;  %v10088_v21 = vld [vmem:[#allocation53_spill] sm:$0xff]  ;;  %v2631_v27 = vmax.f32 %v2615_v45, 0.0 }
 0xad2   :  { %v4014_v7 = vpack.c.bf16 %v4006_v38, %v4005_v54  ;;  %6682 = vmatprep.subr.bf16.mxu1 %v10068_v55  ;;  %v5152_v1 = vld [vmem:[%s9722_s1 + $0x320] sm:$0xff]  ;;  %v2570_v54 = vsub.f32 %v10082_v10, %v5154_v32 }
 0xad3   :  { %v4013_v46 = vpack.c.bf16 %v4004_v50, %v4003_v44  ;;  %v5155_v44 = vld [vmem:[%s9722_s1 + $0x338] sm:$0xff]  ;;  %v10091_v50 = vld [vmem:[#allocation60_spill] sm:$0xff] }
 0xad4   :  { %v2586_v3 = vmax.f32 %v2570_v54, 0.0 }
 0xad5   :  { %6683 = vmatpush3.bf16.msra.mxu1 %v10068_v55 }
 0xad6   :  { %6700 = vmatprep.subr.bf16.mxu1 %v10029_v0 }
 0xad8   :  { %6685 = vmatmul.mubr.bf16.vlgmr.msra.gmra.mrb[64].mxu1 %v9297_v4  ;;  %v10070_v4 = vld [vmem:[#allocation25_spill] sm:$0xff] }
 0xad9   :  { %6688 = vmatprep.mubr.bf16.mxu1 %v9323_v8  ;;  %6701 = vmatpush3.bf16.msra.mxu1 %v10029_v0  ;;  %v10069_v0 = vld [vmem:[#allocation3_spill] sm:$0xff]  ;;  %v2596_v8 = vsub.f32 0.0, %v10079_v60 }
 0xada   :  { %6702 = vmatprep.subr.bf16.mxu1 %v10062_v35 }
 0xadd   :  { %6703 = vmatpush3.bf16.msra.mxu1 %v10062_v35  ;;  %v10078_v35 = vld [vmem:[#allocation36_spill] sm:$0xff] }
 0xade   :  { %6704 = vmatprep.subr.bf16.mxu1 %v10063_v57 }
 0xae0   :  { %6689 = vmatmul.mubr.bf16.gmra.mrb[68].mxu1 %v9321_v30  ;;  %v5148_v30 = vld [vmem:[%s9722_s1 + $0x300] sm:$0xff] }
 0xae1   :  { %6692 = vmatprep.mubr.bf16.mxu1 %v3971_v39  ;;  %6705 = vmatpush3.bf16.msra.mxu1 %v10063_v57  ;;  %v2566_v57 = vsub.f32 %v10078_v35, %v5150_v59  ;;  %v2564_v6 = vsub.f32 %v10079_v60, %v5148_v30  ;;  %v2612_v34 = vsub.f32 %v2596_v8, %v5148_v30  ;;  %v5149_v39 = vld [vmem:[%s9722_s1 + $0x308] sm:$0xff] }
 0xae2   :  { %6706 = vmatprep.subr.bf16.mxu1 %v10064_v58  ;;  %v2613_v62 = vsub.f32 %v2597_v22, %v5149_v39  ;;  %v2571_v30 = vsub.f32 %v10084_v63, %v5155_v44 }
 0xae3   :  { %v2582_v16 = vmax.f32 %v2566_v57, 0.0  ;;  %v2580_v29 = vmax.f32 %v2564_v6, 0.0 }
 0xae4   :  { %v2587_v63 = vmax.f32 %v2571_v30, 0.0 }
 0xae5   :  { %6707 = vmatpush3.bf16.msra.mxu1 %v10064_v58  ;;  %v10083_v58 = vld [vmem:[#allocation43_spill] sm:$0xff] }
 0xae6   :  { %6708 = vmatprep.subr.bf16.mxu1 %v10065_v14 }
 0xae8   :  { %6693 = vmatmul.mubr.bf16.gmra.mrb[72].mxu1 %v3972_v41 }
 0xae9   :  { %6696 = vmatprep.mubr.bf16.mxu1 %v3973_v40  ;;  %6709 = vmatpush3.bf16.msra.mxu1 %v10065_v14  ;;  %v10085_v14 = vld [vmem:[#allocation45_spill] sm:$0xff]  ;;  %v2565_v40 = vsub.f32 %v10081_v28, %v5149_v39 }
 0xaea   :  { %6710 = vmatprep.subr.bf16.mxu1 %v10066_v42  ;;  %v2601_v23 = vsub.f32 0.0, %v10085_v14 }
 0xaed   :  { %6711 = vmatpush3.bf16.msra.mxu1 %v10066_v42  ;;  %v2607_v42 = vsub.f32 0.0, %v10088_v21 }
 0xaee   :  { %6712 = vmatprep.subr.bf16.mxu1 %v10067_v24 }
 0xaf0   :  { %6697 = vmatmul.mubr.bf16.gmra.mrb[76].mxu1 %v3974_v48  ;;  %v2605_v48 = vsub.f32 0.0, %v10089_v20 }
 0xaf1   :  { %6713 = vmatpush3.bf16.msra.mxu1 %v10067_v24  ;;  %6716 = vmatprep.mubr.bf16.mxu1 %v4007_v2  ;;  %v2598_v2 = vsub.f32 0.0, %v10078_v35  ;;  %v10090_v24 = vld [vmem:[#allocation59_spill] sm:$0xff] }
 0xaf2   :  { %6714 = vmatprep.subr.bf16.mxu1 %v10068_v55  ;;  %v2610_v43 = vsub.f32 0.0, %v10090_v24 }
 0xaf3   :  { %v2614_v5 = vsub.f32 %v2598_v2, %v5150_v59  ;;  %v2581_v2 = vmax.f32 %v2565_v40, 0.0 }
 0xaf5   :  { %6715 = vmatpush3.bf16.msra.mxu1 %v10068_v55  ;;  %v2630_v41 = vmax.f32 %v2614_v5, 0.0  ;;  %v2583_v55 = vmax.f32 %v2567_v17, 0.0  ;;  %v5158_v5 = vld [vmem:[%s9722_s1 + $0x350] sm:$0xff] }
 0xaf6   :  { %6828 = vmatprep.subr.bf16.mxu1 %v10069_v0  ;;  %v2622_v52 = vsub.f32 %v2606_v61, %v5158_v5 }
 0xaf7   :  { %v2646_v56 = vsub.f32 %v2582_v16, %v2630_v41  ;;  %v2647_v35 = vsub.f32 %v2583_v55, %v2631_v27 }
 0xaf8   :  { %6717 = vmatmul.mubr.bf16.vlgmr.msra.gmra.mrb[64].mxu1 %v4008_v15  ;;  %v10076_v15 = vld [vmem:[#allocation31_spill] sm:$0xff]  ;;  %v2638_v27 = vmax.f32 %v2622_v52, 0.0 }
 0xaf9   :  { %6720 = vmatprep.mubr.bf16.mxu1 %v4009_v13  ;;  %6829 = vmatpush3.bf16.msra.mxu1 %v10069_v0  ;;  %v2600_v13 = vsub.f32 0.0, %v10083_v58  ;;  %v2619_v0 = vsub.f32 %v2603_v11, %v5155_v44  ;;  %v2574_v11 = vsub.f32 %v10086_v37, %v5158_v5 }
 0xafa   :  { %6830 = vmatprep.subr.bf16.mxu1 %v10070_v4 }
 0xafb   :  { %v2616_v38 = vsub.f32 %v2600_v13, %v5152_v1 }
 0xafd   :  { %6831 = vmatpush3.bf16.msra.mxu1 %v10070_v4  ;;  %v5153_v4 = vld [vmem:[%s9722_s1 + $0x328] sm:$0xff]  ;;  %v2632_v25 = vmax.f32 %v2616_v38, 0.0 }
 0xafe   :  { %6832 = vmatprep.subr.bf16.mxu1 %v10071_v33  ;;  %v2569_v57 = vsub.f32 %v10085_v14, %v5153_v4  ;;  %v5159_v14 = vld [vmem:[%s9722_s1 + $0x358] sm:$0xff] }
 0xaff   :  { %v2575_v54 = vsub.f32 %v10088_v21, %v5159_v14  ;;  %v2623_v55 = vsub.f32 %v2607_v42, %v5159_v14  ;;  %v5162_v42 = vld [vmem:[%s9722_s1 + $0x370] sm:$0xff] }
 0xb00   :  { %6721 = vmatmul.mubr.bf16.gmra.mrb[68].mxu1 %v4010_v53  ;;  %v2602_v53 = vsub.f32 0.0, %v10082_v10  ;;  %v5156_v10 = vld [vmem:[%s9722_s1 + $0x340] sm:$0xff] }
 0xb01   :  { %6724 = vmatprep.mubr.bf16.mxu1 %v4011_v19  ;;  %6833 = vmatpush3.bf16.msra.mxu1 %v10071_v33  ;;  %v2628_v19 = vmax.f32 %v2612_v34, 0.0  ;;  %v10092_v33 = vld [vmem:[#allocation61_spill] sm:$0xff]  ;;  %v2635_v34 = vmax.f32 %v2619_v0, 0.0  ;;  %v2639_v5 = vmax.f32 %v2623_v55, 0.0 }
 0xb02   :  { %6834 = vmatprep.subr.bf16.mxu1 %v10072_v31  ;;  %v2618_v47 = vsub.f32 %v2602_v53, %v5154_v32  ;;  %v10093_v53 = vld [vmem:[#allocation62_spill] sm:$0xff]  ;;  %v2572_v32 = vsub.f32 %v10087_v49, %v5156_v10 }
 0xb03   :  { %v2609_v45 = vsub.f32 0.0, %v10093_v53 }
 0xb04   :  { %v2634_v59 = vmax.f32 %v2618_v47, 0.0  ;;  %v5157_v47 = vld [vmem:[%s9722_s1 + $0x348] sm:$0xff]  ;;  %v2588_v21 = vmax.f32 %v2572_v32, 0.0 }
 0xb05   :  { %6835 = vmatpush3.bf16.msra.mxu1 %v10072_v31  ;;  %v2611_v31 = vsub.f32 0.0, %v10092_v33 }
 0xb06   :  { %6836 = vmatprep.subr.bf16.mxu1 %v10073_v12  ;;  %v2650_v39 = vsub.f32 %v2586_v3, %v2634_v59  ;;  %v2590_v3 = vmax.f32 %v2574_v11, 0.0 }
 0xb08   :  { %6725 = vmatmul.mubr.bf16.gmra.mrb[72].mxu1 %v4012_v18  ;;  %v2604_v18 = vsub.f32 0.0, %v10087_v49 }
 0xb09   :  { %6728 = vmatprep.mubr.bf16.mxu1 %v4013_v46  ;;  %6837 = vmatpush3.bf16.msra.mxu1 %v10073_v12  ;;  %v2629_v46 = vmax.f32 %v2613_v62, 0.0  ;;  %v2644_v12 = vsub.f32 %v2580_v29, %v2628_v19  ;;  %v2585_v62 = vmax.f32 %v2569_v57, 0.0  ;;  %v2651_v19 = vsub.f32 %v2587_v63, %v2635_v34 }
 0xb0a   :  { %6838 = vmatprep.subr.bf16.mxu1 %v10074_v36  ;;  %v2620_v40 = vsub.f32 %v2604_v18, %v5156_v10  ;;  %v2621_v18 = vsub.f32 %v2605_v48, %v5157_v47 }
 0xb0b   :  { %v2645_v22 = vsub.f32 %v2581_v2, %v2629_v46 }
 0xb0c   :  { %v2636_v59 = vmax.f32 %v2620_v40, 0.0 }
 0xb0d   :  { %6839 = vmatpush3.bf16.msra.mxu1 %v10074_v36  ;;  %v2568_v36 = vsub.f32 %v10083_v58, %v5152_v1 }
 0xb0e   :  { %6840 = vmatprep.subr.bf16.mxu1 %v10075_v51  ;;  %v2652_v10 = vsub.f32 %v2588_v21, %v2636_v59 }
 0xb0f   :  { %v2584_v16 = vmax.f32 %v2568_v36, 0.0  ;;  %v2573_v36 = vsub.f32 %v10089_v20, %v5157_v47  ;;  %v5160_v20 = vld [vmem:[%s9722_s1 + $0x360] sm:$0xff] }
 0xb10   :  { %6729 = vmatmul.mubr.bf16.gmra.mrb[76].mxu1 %v4014_v7  ;;  %v2608_v7 = vsub.f32 0.0, %v10091_v50 }
 0xb11   :  { %6841 = vmatpush3.bf16.msra.mxu1 %v10075_v51  ;;  %v2617_v51 = vsub.f32 %v2601_v23, %v5153_v4  ;;  %v2648_v17 = vsub.f32 %v2584_v16, %v2632_v25  ;;  %v2589_v34 = vmax.f32 %v2573_v36, 0.0 }
 0xb12   :  { %6842 = vmatprep.subr.bf16.mxu1 %v10076_v15 }
 0xb13   :  { %v2633_v41 = vmax.f32 %v2617_v51, 0.0 }
 0xb15   :  { %6843 = vmatpush3.bf16.msra.mxu1 %v10076_v15  ;;  %v2649_v1 = vsub.f32 %v2585_v62, %v2633_v41 }
 0xb16   :  { %6860 = vmatprep.subr.bf16.mxu1 %v10077_v9 }
 0xbcb   :  { %v6718_v15 = vpop.f32.mrb[64].mxu1 }
 0xbcc   :  { %v4324_v60 = vadd.f32 %v6718_v15, %v2646_v56  ;;  %v4243_v8 = vpop.f32.mrb[65].mxu1 }
 0xbcd   :  { %v4322_v6 = vadd.f32 %v4243_v8, %v2644_v12  ;;  %v6719_v28 = vpop.f32.mrb[66].mxu1 }
 0xbce   :  { %v4325_v58 = vadd.f32 %v6719_v28, %v2647_v35  ;;  %v4246_v13 = vpop.f32.mrb[67].mxu1 }
 0xbcf   :  { %v4323_v29 = vadd.f32 %v4246_v13, %v2645_v22  ;;  %v2591_v22 = vmax.f32 %v2575_v54, 0.0  ;;  %v2626_v13 = vsub.f32 %v2610_v43, %v5162_v42 }
 0xbd0   :  { %v9469_v23 = vpack.c.bf16 %v4325_v58, %v4324_v60 }
 0xbd1   :  { %v9472_v61 = vpack.c.bf16 %v4323_v29, %v4322_v6  ;;  %v2655_v14 = vsub.f32 %v2591_v22, %v2639_v5 }
 0xbd2   :  { %v4349_v37 = vunpack.c.h.bf16 %v9469_v23  ;;  %v4348_v56 = vunpack.c.l.bf16 %v9469_v23 }
 0xbd3   :  { %v4347_v38 = vunpack.c.h.bf16 %v9472_v61  ;;  %v6722_v44 = vpop.f32.mrb[68].mxu1  ;;  %v4346_v49 = vunpack.c.l.bf16 %v9472_v61 }
 0xbd4   :  { %v4365_v46 = vsub.f32 %v4325_v58, %v4349_v37  ;;  %v4328_v0 = vadd.f32 %v6722_v44, %v2650_v39  ;;  %v4259_v4 = vpop.f32.mrb[69].mxu1  ;;  %v4364_v12 = vsub.f32 %v4324_v60, %v4348_v56  ;;  %v2637_v60 = vmax.f32 %v2621_v18, 0.0 }
 0xbd5   :  { %v4363_v51 = vsub.f32 %v4323_v29, %v4347_v38  ;;  %v4326_v15 = vadd.f32 %v4259_v4, %v2648_v17  ;;  %v6723_v35 = vpop.f32.mrb[70].mxu1  ;;  %v4362_v2 = vsub.f32 %v4322_v6, %v4346_v49  ;;  %v2654_v6 = vsub.f32 %v2590_v3, %v2638_v27 }
 0xbd6   :  { %v4329_v30 = vadd.f32 %v6723_v35, %v2651_v19  ;;  %v4262_v8 = vpop.f32.mrb[71].mxu1  ;;  %v4379_v25 = vpack.c.bf16 %v4365_v46, %v4364_v12  ;;  %v2578_v58 = vsub.f32 %v10090_v24, %v5162_v42  ;;  %v2576_v29 = vsub.f32 %v10091_v50, %v5160_v20  ;;  %v5163_v24 = vld [vmem:[%s9722_s1 + $0x378] sm:$0xff] }
 0xbd7   :  { %v4327_v48 = vadd.f32 %v4262_v8, %v2649_v1  ;;  %v4378_v57 = vpack.c.bf16 %v4363_v51, %v4362_v2  ;;  %v2624_v39 = vsub.f32 %v2608_v7, %v5160_v20  ;;  %v2653_v17 = vsub.f32 %v2589_v34, %v2637_v60  ;;  %v5161_v7 = vld [vmem:[%s9722_s1 + $0x368] sm:$0xff] }
 0xbd8   :  { %v9493_v28 = vpack.c.bf16 %v4329_v30, %v4328_v0  ;;  %v2627_v50 = vsub.f32 %v2611_v31, %v5163_v24  ;;  %v2625_v56 = vsub.f32 %v2609_v45, %v5161_v7  ;;  %v2642_v44 = vmax.f32 %v2626_v13, 0.0 }
 0xbd9   :  { %v9495_v52 = vpack.c.bf16 %v4327_v48, %v4326_v15  ;;  %6732 = vmatprep.subr.bf16.mxu0 %v4378_v57  ;;  %v2579_v55 = vsub.f32 %v10092_v33, %v5163_v24  ;;  %v2640_v46 = vmax.f32 %v2624_v39, 0.0  ;;  %v2594_v12 = vmax.f32 %v2578_v58, 0.0 }
 0xbda   :  { %v4353_v16 = vunpack.c.h.bf16 %v9493_v28  ;;  %6733 = vmatpush3.bf16.msra.mxu0 %v4378_v57  ;;  %v4352_v41 = vunpack.c.l.bf16 %v9493_v28  ;;  %v2643_v36 = vmax.f32 %v2627_v50, 0.0  ;;  %v2592_v45 = vmax.f32 %v2576_v29, 0.0  ;;  %v10094_v50 = vld [vmem:[#allocation5_spill] sm:$0xff] }
 0xbdb   :  { %v4351_v63 = vunpack.c.h.bf16 %v9495_v52  ;;  %v6726_v11 = vpop.f32.mrb[72].mxu1  ;;  %6734 = vmatprep.subr.bf16.mxu0 %v4379_v25  ;;  %v4350_v62 = vunpack.c.l.bf16 %v9495_v52  ;;  %v2658_v2 = vsub.f32 %v2594_v12, %v2642_v44  ;;  %v2595_v59 = vmax.f32 %v2579_v55, 0.0  ;;  %v10108_v44 = vld [vmem:[#allocation33_spill] sm:$0xff] }
 0xbdc   :  { %v4369_v43 = vsub.f32 %v4329_v30, %v4353_v16  ;;  %v4332_v32 = vadd.f32 %v6726_v11, %v2654_v6  ;;  %v4275_v19 = vpop.f32.mrb[73].mxu1  ;;  %v4368_v27 = vsub.f32 %v4328_v0, %v4352_v41  ;;  %v2577_v0 = vsub.f32 %v10093_v53, %v5161_v7  ;;  %v10095_v7 = vld [vmem:[#allocation6_spill] sm:$0xff] }
 0xbdd   :  { %v4367_v40 = vsub.f32 %v4327_v48, %v4351_v63  ;;  %v4330_v47 = vadd.f32 %v4275_v19, %v2652_v10  ;;  %v6727_v37 = vpop.f32.mrb[74].mxu1  ;;  %v4366_v1 = vsub.f32 %v4326_v15, %v4350_v62  ;;  %v2641_v15 = vmax.f32 %v2625_v56, 0.0  ;;  %v10100_v56 = vld [vmem:[#allocation32_spill] sm:$0xff] }
 0xbde   :  { %v4333_v54 = vadd.f32 %v6727_v37, %v2655_v14  ;;  %v4278_v38 = vpop.f32.mrb[75].mxu1  ;;  %6735 = vmatpush3.bf16.msra.mxu0 %v4379_v25  ;;  %v4381_v49 = vpack.c.bf16 %v4369_v43, %v4368_v27  ;;  %v2656_v53 = vsub.f32 %v2592_v45, %v2640_v46  ;;  %v2593_v3 = vmax.f32 %v2577_v0, 0.0  ;;  %v10098_v37 = vld [vmem:[#allocation12_spill] sm:$0xff] }
 0xbdf   :  { %v4331_v18 = vadd.f32 %v4278_v38, %v2653_v17  ;;  %v4380_v31 = vpack.c.bf16 %v4367_v40, %v4366_v1  ;;  %v2659_v57 = vsub.f32 %v2595_v59, %v2643_v36  ;;  %v10096_v40 = vld [vmem:[#allocation7_spill] sm:$0xff]  ;;  %v10107_v38 = vld [vmem:[#allocation21_spill] sm:$0xff] }
 0xbe0   :  { %v9519_v4 = vpack.c.bf16 %v4333_v54, %v4332_v32  ;;  %v2657_v22 = vsub.f32 %v2593_v3, %v2641_v15  ;;  %v10099_v1 = vld [vmem:[#allocation15_spill] sm:$0xff] }
 0xbe1   :  { %v9521_v51 = vpack.c.bf16 %v4331_v18, %v4330_v47  ;;  %6736 = vmatprep.subr.bf16.mxu0 %v4380_v31 }
 0xbe2   :  { %v4357_v35 = vunpack.c.h.bf16 %v9519_v4  ;;  %6737 = vmatpush3.bf16.msra.mxu0 %v4380_v31  ;;  %v4356_v33 = vunpack.c.l.bf16 %v9519_v4 }
 0xbe3   :  { %v4355_v30 = vunpack.c.h.bf16 %v9521_v51  ;;  %v6730_v8 = vpop.f32.mrb[76].mxu1  ;;  %6738 = vmatprep.subr.bf16.mxu0 %v4381_v49  ;;  %v4354_v25 = vunpack.c.l.bf16 %v9521_v51 }
 0xbe4   :  { %v4373_v21 = vsub.f32 %v4333_v54, %v4357_v35  ;;  %v4336_v42 = vadd.f32 %v6730_v8, %v2658_v2  ;;  %v4291_v48 = vpop.f32.mrb[77].mxu1  ;;  %v4372_v5 = vsub.f32 %v4332_v32, %v4356_v33  ;;  %v10106_v54 = vld [vmem:[#allocation20_spill] sm:$0xff]  ;;  %v10109_v8 = vld [vmem:[#allocation13_spill] sm:$0xff] }
 0xbe5   :  { %v4371_v60 = vsub.f32 %v4331_v18, %v4355_v30  ;;  %v4334_v20 = vadd.f32 %v4291_v48, %v2656_v53  ;;  %v6731_v6 = vpop.f32.mrb[78].mxu1  ;;  %v4370_v34 = vsub.f32 %v4330_v47, %v4354_v25  ;;  %v10097_v47 = vld [vmem:[#allocation9_spill] sm:$0xff] }
 0xbe6   :  { %v4337_v10 = vadd.f32 %v6731_v6, %v2659_v57  ;;  %v4294_v58 = vpop.f32.mrb[79].mxu1  ;;  %6739 = vmatpush3.bf16.msra.mxu0 %v4381_v49  ;;  %v4383_v13 = vpack.c.bf16 %v4373_v21, %v4372_v5  ;;  %v10110_v5 = vld [vmem:[#allocation14_spill] sm:$0xff] }
 0xbe7   :  { %v4335_v16 = vadd.f32 %v4294_v58, %v2657_v22  ;;  %v4382_v41 = vpack.c.bf16 %v4371_v60, %v4370_v34 }
 0xbe8   :  { %v9527_v29 = vpack.c.bf16 %v4337_v10, %v4336_v42 }
 0xbe9   :  { %v4344_v39 = vpack.c.bf16 %v4335_v16, %v4334_v20  ;;  %6740 = vmatprep.subr.bf16.mxu0 %v4382_v41 }
 0xbea   :  { %v4361_v63 = vunpack.c.h.bf16 %v9527_v29  ;;  %6741 = vmatpush3.bf16.msra.mxu0 %v4382_v41  ;;  %v4360_v11 = vunpack.c.l.bf16 %v9527_v29  ;;  %v10111_v41 = vld [vmem:[#allocation18_spill] sm:$0xff] }
 0xbeb   :  { %v4359_v14 = vunpack.c.h.bf16 %v4344_v39  ;;  %6742 = vmatprep.subr.bf16.mxu0 %v4383_v13  ;;  %v4358_v17 = vunpack.c.l.bf16 %v4344_v39 }
 0xbec   :  { %v4377_v62 = vsub.f32 %v4337_v10, %v4361_v63  ;;  %v4376_v24 = vsub.f32 %v4336_v42, %v4360_v11 }
 0xbed   :  { %v4375_v43 = vsub.f32 %v4335_v16, %v4359_v14  ;;  %v4374_v32 = vsub.f32 %v4334_v20, %v4358_v17 }
 0xbee   :  { %6743 = vmatpush3.bf16.msra.mxu0 %v4383_v13  ;;  %v4385_v19 = vpack.c.bf16 %v4377_v62, %v4376_v24  ;;  %v10112_v24 = vld [vmem:[#allocation19_spill] sm:$0xff] }
 0xbef   :  { %v4384_v27 = vpack.c.bf16 %v4375_v43, %v4374_v32 }
 0xbf1   :  { %6744 = vmatprep.subr.bf16.mxu0 %v4384_v27 }
 0xbf2   :  { %6745 = vmatpush3.bf16.msra.mxu0 %v4384_v27 }
 0xbf3   :  { %6746 = vmatprep.subr.bf16.mxu0 %v4385_v19 }
 0xbf6   :  { %6747 = vmatpush3.bf16.msra.mxu0 %v4385_v19 }
 0xbf7   :  { %6764 = vmatprep.subr.bf16.mxu0 %v9472_v61 }
 0xbf9   :  { %6749 = vmatmul.mubr.bf16.vlgmr.msra.gmra.mrb[80].mxu0 %v10094_v50 }
 0xbfa   :  { %6765 = vmatpush3.bf16.msra.mxu0 %v9472_v61  ;;  %6752 = vmatprep.mubr.bf16.mxu0 %v10095_v7 }
 0xbfb   :  { %6766 = vmatprep.subr.bf16.mxu0 %v9469_v23 }
 0xbfe   :  { %6767 = vmatpush3.bf16.msra.mxu0 %v9469_v23 }
 0xbff   :  { %6768 = vmatprep.subr.bf16.mxu0 %v9495_v52 }
 0xc01   :  { %6753 = vmatmul.mubr.bf16.gmra.mrb[84].mxu0 %v10096_v40 }
 0xc02   :  { %6769 = vmatpush3.bf16.msra.mxu0 %v9495_v52  ;;  %6756 = vmatprep.mubr.bf16.mxu0 %v10097_v47 }
 0xc03   :  { %6770 = vmatprep.subr.bf16.mxu0 %v9493_v28 }
 0xc06   :  { %6771 = vmatpush3.bf16.msra.mxu0 %v9493_v28 }
 0xc07   :  { %6772 = vmatprep.subr.bf16.mxu0 %v9521_v51 }
 0xc09   :  { %6757 = vmatmul.mubr.bf16.gmra.mrb[88].mxu0 %v10098_v37 }
 0xc0a   :  { %6773 = vmatpush3.bf16.msra.mxu0 %v9521_v51  ;;  %6760 = vmatprep.mubr.bf16.mxu0 %v10099_v1 }
 0xc0b   :  { %6774 = vmatprep.subr.bf16.mxu0 %v9519_v4 }
 0xc0e   :  { %6775 = vmatpush3.bf16.msra.mxu0 %v9519_v4 }
 0xc0f   :  { %6776 = vmatprep.subr.bf16.mxu0 %v4344_v39 }
 0xc11   :  { %6761 = vmatmul.mubr.bf16.gmra.mrb[92].mxu0 %v10100_v56 }
 0xc12   :  { %6777 = vmatpush3.bf16.msra.mxu0 %v4344_v39  ;;  %6780 = vmatprep.mubr.bf16.mxu0 %v10061_v26  ;;  %v10101_v26 = vld [vmem:[#allocation8_spill] sm:$0xff] }
 0xc13   :  { %6778 = vmatprep.subr.bf16.mxu0 %v9527_v29 }
 0xc16   :  { %6779 = vmatpush3.bf16.msra.mxu0 %v9527_v29 }
 0xc17   :  { %6796 = vmatprep.subr.bf16.mxu0 %v9472_v61 }
 0xc19   :  { %6781 = vmatmul.mubr.bf16.vlgmr.msra.gmra.mrb[80].mxu0 %v10094_v50 }
 0xc1a   :  { %6797 = vmatpush3.bf16.msra.mxu0 %v9472_v61  ;;  %6784 = vmatprep.mubr.bf16.mxu0 %v10095_v7  ;;  %v10103_v61 = vld [vmem:[#allocation11_spill] sm:$0xff] }
 0xc1b   :  { %6798 = vmatprep.subr.bf16.mxu0 %v9469_v23 }
 0xc1e   :  { %6799 = vmatpush3.bf16.msra.mxu0 %v9469_v23  ;;  %v10102_v23 = vld [vmem:[#allocation10_spill] sm:$0xff] }
 0xc1f   :  { %6800 = vmatprep.subr.bf16.mxu0 %v9495_v52 }
 0xc21   :  { %6785 = vmatmul.mubr.bf16.gmra.mrb[84].mxu0 %v10096_v40 }
 0xc22   :  { %6801 = vmatpush3.bf16.msra.mxu0 %v9495_v52  ;;  %6788 = vmatprep.mubr.bf16.mxu0 %v10097_v47  ;;  %v10105_v52 = vld [vmem:[#allocation17_spill] sm:$0xff] }
 0xc23   :  { %6802 = vmatprep.subr.bf16.mxu0 %v9493_v28 }
 0xc26   :  { %6803 = vmatpush3.bf16.msra.mxu0 %v9493_v28  ;;  %v10104_v28 = vld [vmem:[#allocation16_spill] sm:$0xff] }
 0xc27   :  { %6804 = vmatprep.subr.bf16.mxu0 %v9521_v51 }
 0xc29   :  { %6789 = vmatmul.mubr.bf16.gmra.mrb[88].mxu0 %v10098_v37 }
 0xc2a   :  { %6805 = vmatpush3.bf16.msra.mxu0 %v9521_v51  ;;  %6792 = vmatprep.mubr.bf16.mxu0 %v10099_v1  ;;  %v10113_v1 = vld [vmem:[#allocation22_spill] sm:$0xff] }
 0xc2b   :  { %6806 = vmatprep.subr.bf16.mxu0 %v9519_v4 }
 0xc2e   :  { %6807 = vmatpush3.bf16.msra.mxu0 %v9519_v4 }
 0xc2f   :  { %6808 = vmatprep.subr.bf16.mxu0 %v4344_v39 }
 0xc31   :  { %6793 = vmatmul.mubr.bf16.gmra.mrb[92].mxu0 %v10100_v56 }
 0xc32   :  { %6809 = vmatpush3.bf16.msra.mxu0 %v4344_v39  ;;  %6812 = vmatprep.mubr.bf16.mxu0 %v10101_v26 }
 0xc33   :  { %6810 = vmatprep.subr.bf16.mxu0 %v9527_v29 }
 0xc36   :  { %6811 = vmatpush3.bf16.msra.mxu0 %v9527_v29 }
 0xc39   :  { %6813 = vmatmul.mubr.bf16.vlgmr.msra.gmra.mrb[80].mxu0 %v10102_v23 }
 0xc3a   :  { %6816 = vmatprep.mubr.bf16.mxu0 %v10103_v61 }
 0xc41   :  { %6817 = vmatmul.mubr.bf16.gmra.mrb[84].mxu0 %v10104_v28 }
 0xc42   :  { %6820 = vmatprep.mubr.bf16.mxu0 %v10105_v52 }
 0xc49   :  { %6821 = vmatmul.mubr.bf16.gmra.mrb[88].mxu0 %v10106_v54 }
 0xc4a   :  { %6824 = vmatprep.mubr.bf16.mxu0 %v10107_v38  ;;  %v10114_v38 = vld [vmem:[#allocation23_spill] sm:$0xff] }
 0xc51   :  { %6825 = vmatmul.mubr.bf16.gmra.mrb[92].mxu0 %v10108_v44 }
 0xd0c   :  { %v6814_v49 = vpop.f32.mrb[80].mxu0 }
 0xd0d   :  { %v4614_v55 = vpop.f32.mrb[81].mxu0 }
 0xd0e   :  { %v6815_v18 = vpop.f32.mrb[82].mxu0 }
 0xd0f   :  { %v9582_v31 = vpack.c.bf16 %v6815_v18, %v6814_v49  ;;  %v4617_v46 = vpop.f32.mrb[83].mxu0 }
 0xd10   :  { %v9584_v0 = vpack.c.bf16 %v4617_v46, %v4614_v55 }
 0xd11   :  { %v4703_v4 = vunpack.c.l.bf16 %v9582_v31  ;;  %v4704_v12 = vunpack.c.h.bf16 %v9582_v31 }
 0xd12   :  { %v4701_v36 = vunpack.c.l.bf16 %v9584_v0  ;;  %v4702_v51 = vunpack.c.h.bf16 %v9584_v0  ;;  %6844 = vmatprep.mubr.bf16.mxu1 %v9584_v0 }
 0xd13   :  { %v9591_v45 = vsub.f32 %v6814_v49, %v4703_v4  ;;  %v9593_v15 = vsub.f32 %v6815_v18, %v4704_v12  ;;  %6845 = vmatmul.mubr.bf16.vlgmr.msra.gmra.mrb[80].mxu1 %v9582_v31 }
 0xd14   :  { %v9596_v35 = vsub.f32 %v4614_v55, %v4701_v36  ;;  %v9598_v2 = vsub.f32 %v4617_v46, %v4702_v51  ;;  %v6818_v59 = vpop.f32.mrb[84].mxu0  ;;  %6861 = vmatpush3.bf16.msra.mxu1 %v10077_v9  ;;  %v10115_v36 = vld [vmem:[#allocation24_spill] sm:$0xff] }
 0xd15   :  { %v4734_v33 = vpack.c.bf16 %v9593_v15, %v9591_v45  ;;  %v4630_v30 = vpop.f32.mrb[85].mxu0  ;;  %6862 = vmatprep.subr.bf16.mxu1 %v10109_v8 }
 0xd16   :  { %v4733_v53 = vpack.c.bf16 %v9598_v2, %v9596_v35  ;;  %v6819_v3 = vpop.f32.mrb[86].mxu0 }
 0xd17   :  { %v9606_v25 = vpack.c.bf16 %v6819_v3, %v6818_v59  ;;  %v4633_v21 = vpop.f32.mrb[87].mxu0 }
 0xd18   :  { %v9608_v42 = vpack.c.bf16 %v4633_v21, %v4630_v30  ;;  %6863 = vmatpush3.bf16.msra.mxu1 %v10109_v8 }
 0xd19   :  { %v4707_v48 = vunpack.c.l.bf16 %v9606_v25  ;;  %v4708_v57 = vunpack.c.h.bf16 %v9606_v25  ;;  %6864 = vmatprep.subr.bf16.mxu1 %v10110_v5 }
 0xd1a   :  { %v4705_v60 = vunpack.c.l.bf16 %v9608_v42  ;;  %v4706_v20 = vunpack.c.h.bf16 %v9608_v42  ;;  %6848 = vmatprep.mubr.bf16.mxu1 %v9608_v42 }
 0xd1b   :  { %v9617_v6 = vsub.f32 %v6818_v59, %v4707_v48  ;;  %v9619_v22 = vsub.f32 %v6819_v3, %v4708_v57  ;;  %6849 = vmatmul.mubr.bf16.gmra.mrb[84].mxu1 %v9606_v25 }
 0xd1c   :  { %v9622_v34 = vsub.f32 %v4630_v30, %v4705_v60  ;;  %v9624_v10 = vsub.f32 %v4633_v21, %v4706_v20  ;;  %v6822_v58 = vpop.f32.mrb[88].mxu0  ;;  %6865 = vmatpush3.bf16.msra.mxu1 %v10110_v5 }
 0xd1d   :  { %v4736_v13 = vpack.c.bf16 %v9619_v22, %v9617_v6  ;;  %v4646_v16 = vpop.f32.mrb[89].mxu0  ;;  %6866 = vmatprep.subr.bf16.mxu1 %v10111_v41 }
 0xd1e   :  { %v4735_v29 = vpack.c.bf16 %v9624_v10, %v9622_v34  ;;  %v6823_v39 = vpop.f32.mrb[90].mxu0 }
 0xd1f   :  { %v4698_v63 = vpack.c.bf16 %v6823_v39, %v6822_v58  ;;  %v4649_v11 = vpop.f32.mrb[91].mxu0 }
 0xd20   :  { %v4697_v14 = vpack.c.bf16 %v4649_v11, %v4646_v16  ;;  %6867 = vmatpush3.bf16.msra.mxu1 %v10111_v41 }
 0xd21   :  { %v4711_v17 = vunpack.c.l.bf16 %v4698_v63  ;;  %v4712_v62 = vunpack.c.h.bf16 %v4698_v63  ;;  %6868 = vmatprep.subr.bf16.mxu1 %v10112_v24 }
 0xd22   :  { %v4709_v43 = vunpack.c.l.bf16 %v4697_v14  ;;  %v4710_v32 = vunpack.c.h.bf16 %v4697_v14  ;;  %6852 = vmatprep.mubr.bf16.mxu1 %v4697_v14 }
 0xd23   :  { %v4727_v19 = vsub.f32 %v6822_v58, %v4711_v17  ;;  %v4728_v27 = vsub.f32 %v6823_v39, %v4712_v62  ;;  %6853 = vmatmul.mubr.bf16.gmra.mrb[88].mxu1 %v4698_v63 }
 0xd24   :  { %v4725_v50 = vsub.f32 %v4646_v16, %v4709_v43  ;;  %v4726_v7 = vsub.f32 %v4649_v11, %v4710_v32  ;;  %v6826_v40 = vpop.f32.mrb[92].mxu0  ;;  %6869 = vmatpush3.bf16.msra.mxu1 %v10112_v24 }
 0xd25   :  { %v4738_v47 = vpack.c.bf16 %v4728_v27, %v4727_v19  ;;  %v4662_v37 = vpop.f32.mrb[93].mxu0  ;;  %6870 = vmatprep.subr.bf16.mxu1 %v10113_v1 }
 0xd26   :  { %v4737_v56 = vpack.c.bf16 %v4726_v7, %v4725_v50  ;;  %v6827_v26 = vpop.f32.mrb[94].mxu0 }
 0xd27   :  { %v4700_v23 = vpack.c.bf16 %v6827_v26, %v6826_v40  ;;  %v4665_v61 = vpop.f32.mrb[95].mxu0 }
 0xd28   :  { %v4699_v28 = vpack.c.bf16 %v4665_v61, %v4662_v37  ;;  %6871 = vmatpush3.bf16.msra.mxu1 %v10113_v1 }
 0xd29   :  { %v4715_v52 = vunpack.c.l.bf16 %v4700_v23  ;;  %v4716_v54 = vunpack.c.h.bf16 %v4700_v23  ;;  %6872 = vmatprep.subr.bf16.mxu1 %v10114_v38 }
 0xd2a   :  { %v4713_v44 = vunpack.c.l.bf16 %v4699_v28  ;;  %v4714_v49 = vunpack.c.h.bf16 %v4699_v28  ;;  %6856 = vmatprep.mubr.bf16.mxu1 %v4699_v28 }
 0xd2b   :  { %v4731_v55 = vsub.f32 %v6826_v40, %v4715_v52  ;;  %v4732_v18 = vsub.f32 %v6827_v26, %v4716_v54  ;;  %6857 = vmatmul.mubr.bf16.gmra.mrb[92].mxu1 %v4700_v23 }
 0xd2c   :  { %v4729_v46 = vsub.f32 %v4662_v37, %v4713_v44  ;;  %v4730_v4 = vsub.f32 %v4665_v61, %v4714_v49  ;;  %6873 = vmatpush3.bf16.msra.mxu1 %v10114_v38  ;;  %6876 = vmatprep.mubr.bf16.mxu1 %v9584_v0 }
 0xd2d   :  { %v4740_v12 = vpack.c.bf16 %v4732_v18, %v4731_v55  ;;  %6874 = vmatprep.subr.bf16.mxu1 %v10115_v36 }
 0xd2e   :  { %v4739_v51 = vpack.c.bf16 %v4730_v4, %v4729_v46 }
 0xd30   :  { %6875 = vmatpush3.bf16.msra.mxu1 %v10115_v36 }
 0xd31   :  { %6892 = vmatprep.subr.bf16.mxu1 %v10077_v9 }
 0xd33   :  { %6877 = vmatmul.mubr.bf16.vlgmr.msra.gmra.mrb[80].mxu1 %v9582_v31 }
 0xd34   :  { %6880 = vmatprep.mubr.bf16.mxu1 %v9608_v42  ;;  %6893 = vmatpush3.bf16.msra.mxu1 %v10077_v9 }
 0xd35   :  { %6894 = vmatprep.subr.bf16.mxu1 %v10109_v8 }
 0xd38   :  { %6895 = vmatpush3.bf16.msra.mxu1 %v10109_v8 }
 0xd39   :  { %6896 = vmatprep.subr.bf16.mxu1 %v10110_v5 }
 0xd3b   :  { %6881 = vmatmul.mubr.bf16.gmra.mrb[84].mxu1 %v9606_v25 }
 0xd3c   :  { %6884 = vmatprep.mubr.bf16.mxu1 %v4697_v14  ;;  %6897 = vmatpush3.bf16.msra.mxu1 %v10110_v5 }
 0xd3d   :  { %6898 = vmatprep.subr.bf16.mxu1 %v10111_v41 }
 0xd40   :  { %6899 = vmatpush3.bf16.msra.mxu1 %v10111_v41 }
 0xd41   :  { %6900 = vmatprep.subr.bf16.mxu1 %v10112_v24 }
 0xd43   :  { %6885 = vmatmul.mubr.bf16.gmra.mrb[88].mxu1 %v4698_v63 }
 0xd44   :  { %6888 = vmatprep.mubr.bf16.mxu1 %v4699_v28  ;;  %6901 = vmatpush3.bf16.msra.mxu1 %v10112_v24 }
 0xd45   :  { %6902 = vmatprep.subr.bf16.mxu1 %v10113_v1 }
 0xd48   :  { %6903 = vmatpush3.bf16.msra.mxu1 %v10113_v1 }
 0xd49   :  { %6904 = vmatprep.subr.bf16.mxu1 %v10114_v38 }
 0xd4b   :  { %6889 = vmatmul.mubr.bf16.gmra.mrb[92].mxu1 %v4700_v23 }
 0xd4c   :  { %6905 = vmatpush3.bf16.msra.mxu1 %v10114_v38  ;;  %6908 = vmatprep.mubr.bf16.mxu1 %v4733_v53 }
 0xd4d   :  { %6906 = vmatprep.subr.bf16.mxu1 %v10115_v36 }
 0xd50   :  { %6907 = vmatpush3.bf16.msra.mxu1 %v10115_v36 }
 0xd53   :  { %6909 = vmatmul.mubr.bf16.vlgmr.msra.gmra.mrb[80].mxu1 %v4734_v33 }
 0xd54   :  { %6912 = vmatprep.mubr.bf16.mxu1 %v4735_v29 }
 0xd5b   :  { %6913 = vmatmul.mubr.bf16.gmra.mrb[84].mxu1 %v4736_v13 }
 0xd5c   :  { %6916 = vmatprep.mubr.bf16.mxu1 %v4737_v56 }
 0xd63   :  { %6917 = vmatmul.mubr.bf16.gmra.mrb[88].mxu1 %v4738_v47 }
 0xd64   :  { %6920 = vmatprep.mubr.bf16.mxu1 %v4739_v51 }
 0xd6b   :  { %6921 = vmatmul.mubr.bf16.gmra.mrb[92].mxu1 %v4740_v12 }
 0xe26   :  { %v6910_v9 = vpop.f32.mrb[80].mxu1 }
 0xe27   :  { %5050 = vst [vmem:[%s9723_s2 + $0x10] sm:$0xff] %v6910_v9  ;;  %v4969_v31 = vpop.f32.mrb[81].mxu1 }
 0xe28   :  { %5048 = vst [vmem:[%s9723_s2] sm:$0xff] %v4969_v31  ;;  %v6911_v0 = vpop.f32.mrb[82].mxu1 }
 0xe29   :  { %5051 = vst [vmem:[%s9723_s2 + $0x18] sm:$0xff] %v6911_v0  ;;  %v4972_v45 = vpop.f32.mrb[83].mxu1 }
 0xe2a   :  { %5049 = vst [vmem:[%s9723_s2 + $0x8] sm:$0xff] %v4972_v45 }
 0xe2e   :  { %v6914_v15 = vpop.f32.mrb[84].mxu1 }
 0xe2f   :  { %5054 = vst [vmem:[%s9723_s2 + $0x30] sm:$0xff] %v6914_v15  ;;  %v4985_v35 = vpop.f32.mrb[85].mxu1 }
 0xe30   :  { %5052 = vst [vmem:[%s9723_s2 + $0x20] sm:$0xff] %v4985_v35  ;;  %v6915_v2 = vpop.f32.mrb[86].mxu1 }
 0xe31   :  { %5055 = vst [vmem:[%s9723_s2 + $0x38] sm:$0xff] %v6915_v2  ;;  %v4988_v59 = vpop.f32.mrb[87].mxu1 }
 0xe32   :  { %5053 = vst [vmem:[%s9723_s2 + $0x28] sm:$0xff] %v4988_v59 }
 0xe36   :  { %v6918_v33 = vpop.f32.mrb[88].mxu1 }
 0xe37   :  { %5058 = vst [vmem:[%s9723_s2 + $0x50] sm:$0xff] %v6918_v33  ;;  %v5001_v30 = vpop.f32.mrb[89].mxu1 }
 0xe38   :  { %5056 = vst [vmem:[%s9723_s2 + $0x40] sm:$0xff] %v5001_v30  ;;  %v6919_v8 = vpop.f32.mrb[90].mxu1 }
 0xe39   :  { %5059 = vst [vmem:[%s9723_s2 + $0x58] sm:$0xff] %v6919_v8  ;;  %v5004_v53 = vpop.f32.mrb[91].mxu1 }
 0xe3a   :  { %5057 = vst [vmem:[%s9723_s2 + $0x48] sm:$0xff] %v5004_v53 }
 0xe3e   :  { %v6922_v3 = vpop.f32.mrb[92].mxu1 }
 0xe3f   :  { %5062 = vst [vmem:[%s9723_s2 + $0x70] sm:$0xff] %v6922_v3  ;;  %v5017_v25 = vpop.f32.mrb[93].mxu1 }
 0xe40   :  { %5060 = vst [vmem:[%s9723_s2 + $0x60] sm:$0xff] %v5017_v25  ;;  %v6923_v21 = vpop.f32.mrb[94].mxu1 }
 0xe41   :  { %5063 = vst [vmem:[%s9723_s2 + $0x78] sm:$0xff] %v6923_v21  ;;  %v5020_v42 = vpop.f32.mrb[95].mxu1 }
 0xe42   :  { %5061 = vst [vmem:[%s9723_s2 + $0x68] sm:$0xff] %v5020_v42 }

</bundles_post_ra>
